<compile_context>
chip_gen: v7x
topology: tpu7x:2x2x1
jax: 0.10.0
libtpu: 0.0.40
codegen_flags: <defaults>
</compile_context>

<pallas_src>
from functools import partial

import jax
import jax.numpy as jnp
from jax import lax
from jax.experimental import pallas as pl
from jax.experimental.pallas import tpu as pltpu

# ----- small ViT config consistent with MasQCLIP's VisionTransformer -----
INPUT_RES = 32          # input_resolution
PATCH     = 16          # patch_size
WIDTH     = 256         # d_model (vis_width)
HEADS     = 2           # n_head  -> head_dim = 128 (lane aligned)
LAYERS    = 2           # transformer layers
OUT_DIM   = 128         # output_dim (CLIP embed dim)
HEAD_DIM  = WIDTH // HEADS
GRID_HW   = INPUT_RES // PATCH
NUM_PATCH = GRID_HW * GRID_HW
PC        = NUM_PATCH + 1            # clip tokens (cls + patches)
PDIM      = 3 * PATCH * PATCH        # flattened patch dim (conv1 contraction)

NEG_INF = jnp.float32(-1e30)  # stands in for float('-inf'); exp() underflows to exactly 0


def _round_up(x, m):
    return (x + m - 1) // m * m


# ---------------------------------------------------------------------------
# in-kernel helpers (f32 math)
# ---------------------------------------------------------------------------
def _ln(x, g, b, eps=1e-5):
    xf = x.astype(jnp.float32)                      # torch LayerNorm subclass: fp32
    mu = jnp.mean(xf, axis=-1, keepdims=True)
    var = jnp.mean(jnp.square(xf - mu), axis=-1, keepdims=True)
    return (xf - mu) * lax.rsqrt(var + eps) * g + b


def _softmax(x):
    m = jnp.max(x, axis=-1, keepdims=True)
    e = jnp.exp(x - m)
    return e * pl.reciprocal(jnp.sum(e, axis=-1, keepdims=True), approx=True)


# ---------------------------------------------------------------------------
# fused kernel body: one (batch image, layer) grid step
# ---------------------------------------------------------------------------
def fused_forward_kernel(nq_pad, pc_pad,
                         patches_ref, bias_ref, txt_ref, conv_w_ref, add_ref,
                         ln_pre_g_ref, ln_pre_b_ref,
                         in_w_ref, in_b_ref, nq_w_ref, nq_b_ref,
                         out_w_ref, out_b_ref,
                         ln1_g_ref, ln1_b_ref, ln2_g_ref, ln2_b_ref,
                         fc_w_ref, fc_b_ref, pj_w_ref, pj_b_ref,
                         ln_post_g_ref, ln_post_b_ref, proj_ref,
                         o_ref, tok_sc, q_sc):
    l = pl.program_id(1)
    bf16 = jnp.bfloat16

    # ---- layer 0 only: patch embed (conv1 as matmul) + token table + ln_pre
    @pl.when(l == 0)
    def _():
        emb = jnp.dot(patches_ref[0], conv_w_ref[...],
                      preferred_element_type=jnp.float32)               # (S, W)
        tok_sc[...] = _ln(emb + add_ref[...], ln_pre_g_ref[...], ln_pre_b_ref[...])

    tok = tok_sc[...]                                                   # (S, W) f32
    bias = bias_ref[0]                                                  # (S, Pc) f32

    # ---- attention branch (MasQCLIP dual path: clip self-attn + masked queries)
    y = _ln(tok, ln1_g_ref[0], ln1_b_ref[0])
    clip_y = y[nq_pad:, :].astype(bf16)                                 # (Pc, W)
    mask_y = y[:nq_pad, :].astype(bf16)                                 # (nq, W)

    # 1/sqrt(head_dim) is pre-folded into in_w/in_b (q slice) and nq_w/nq_b.
    qkv = jnp.dot(clip_y, in_w_ref[0],
                  preferred_element_type=jnp.float32) + in_b_ref[0]     # (Pc, 3W)
    new_q = jnp.dot(mask_y, nq_w_ref[0],
                    preferred_element_type=jnp.float32) + nq_b_ref[0]   # (nq, W)

    # unified query rows [mask queries ; clip queries] assembled with two
    # tile-aligned scratch stores (no concat).
    q_sc[:nq_pad, :] = new_q
    q_sc[nq_pad:, :] = qkv[:, :WIDTH]
    q_all = q_sc[...]                                                   # (S, W)

    w_out = out_w_ref[0]                                                # (W, W)
    attn = out_b_ref[0]                                                 # (1, W) -> broadcast
    for h in range(HEADS):      # static unroll; every head slice is 128 lanes
        sl = slice(h * HEAD_DIM, (h + 1) * HEAD_DIM)
        qh = q_all[:, sl].astype(bf16)                                  # (S, D)
        kh = qkv[:, WIDTH + h * HEAD_DIM:WIDTH + (h + 1) * HEAD_DIM].astype(bf16)
        vh = qkv[:, 2 * WIDTH + h * HEAD_DIM:2 * WIDTH + (h + 1) * HEAD_DIM].astype(bf16)
        s = jnp.einsum('qd,kd->qk', qh, kh,
                       preferred_element_type=jnp.float32) + bias       # (S, Pc) f32
        p = _softmax(s).astype(bf16)
        oh = jnp.dot(p, vh, preferred_element_type=jnp.float32)         # (S, D)
        # out-proj decomposed per head: concat(heads) @ W == sum_h oh @ W[hD:(h+1)D]
        attn = attn + jnp.dot(oh.astype(bf16), w_out[sl, :],
                              preferred_element_type=jnp.float32)
    tok = tok + attn                                                    # residual 1

    # ---- MLP branch (QuickGELU) --------------------------------------------
    y2 = _ln(tok, ln2_g_ref[0], ln2_b_ref[0])
    h1 = jnp.dot(y2.astype(bf16), fc_w_ref[0],
                 preferred_element_type=jnp.float32) + fc_b_ref[0]
    h1 = h1 * (1.0 / (1.0 + jnp.exp(-1.702 * h1)))                      # QuickGELU
    h2 = jnp.dot(h1.astype(bf16), pj_w_ref[0],
                 preferred_element_type=jnp.float32) + pj_b_ref[0]
    tok = tok + h2                                                      # residual 2
    tok_sc[...] = tok

    # ---- last layer only: ln_post + projection + L2 norm + cosine logits ---
    @pl.when(l == pl.num_programs(1) - 1)
    def _():
        emb = _ln(tok[:nq_pad, :], ln_post_g_ref[...], ln_post_b_ref[...])
        feats = jnp.dot(emb.astype(bf16), proj_ref[...],
                        preferred_element_type=jnp.float32)             # (nq, C)
        feats = feats * lax.rsqrt(jnp.sum(feats * feats, axis=-1, keepdims=True) + 1e-12)
        logits = jnp.dot(feats.astype(bf16), txt_ref[...],
                         preferred_element_type=jnp.float32) * 100.0    # (nq, N)
        o_ref[0, :, :] = logits.astype(o_ref.dtype)


# ---------------------------------------------------------------------------
# pallas_call wrapper: grid = (batch, layers)
# ---------------------------------------------------------------------------
def fused_forward(weights, patches_in, attn_bias, txt_t, add_tab,
                  nq_pad, pc_pad, n_pad):
    bs = patches_in.shape[0]
    seq_pad = nq_pad + pc_pad
    kernel = partial(fused_forward_kernel, nq_pad, pc_pad)

    def per_batch(*tail):     # batch-sliced, resident across the layer axis
        return pl.BlockSpec((1,) + tail, lambda b, l, t=len(tail): (b,) + (0,) * t)

    def shared(*shape):       # whole array, DMA'd once, resident
        return pl.BlockSpec(shape, lambda b, l, t=len(shape): (0,) * t)

    def per_layer(*tail):     # one layer's weight slice; pipelined along layer axis
        return pl.BlockSpec((1,) + tail, lambda b, l, t=len(tail): (l,) + (0,) * t)

    in_specs = [
        per_batch(seq_pad, PDIM),                                # patches (bf16)
        per_batch(seq_pad, pc_pad),                              # additive attn bias
        shared(OUT_DIM, n_pad),                                  # text features^T (bf16)
        shared(PDIM, WIDTH),                                     # conv1 as patch matmul
        shared(seq_pad, WIDTH),                                  # cls/pos/mask add table
        shared(1, WIDTH), shared(1, WIDTH),                      # ln_pre
        per_layer(WIDTH, 3 * WIDTH), per_layer(1, 3 * WIDTH),    # in_proj
        per_layer(WIDTH, WIDTH), per_layer(1, WIDTH),            # new_q_proj
        per_layer(WIDTH, WIDTH), per_layer(1, WIDTH),            # out_proj
        per_layer(1, WIDTH), per_layer(1, WIDTH),                # ln_1
        per_layer(1, WIDTH), per_layer(1, WIDTH),                # ln_2
        per_layer(WIDTH, 4 * WIDTH), per_layer(1, 4 * WIDTH),    # mlp c_fc
        per_layer(4 * WIDTH, WIDTH), per_layer(1, WIDTH),        # mlp c_proj
        shared(1, WIDTH), shared(1, WIDTH),                      # ln_post
        shared(WIDTH, OUT_DIM),                                  # visual projection
    ]
    args = (patches_in, attn_bias, txt_t,
            weights['conv_w'], add_tab,
            weights['ln_pre_g'], weights['ln_pre_b'],
            weights['in_w'], weights['in_b'], weights['nq_w'], weights['nq_b'],
            weights['out_w'], weights['out_b'],
            weights['ln1_g'], weights['ln1_b'], weights['ln2_g'], weights['ln2_b'],
            weights['fc_w'], weights['fc_b'], weights['pj_w'], weights['pj_b'],
            weights['ln_post_g'], weights['ln_post_b'], weights['proj'])

    return pl.pallas_call(
        kernel,
        out_shape=jax.ShapeDtypeStruct((bs, nq_pad, n_pad), jnp.float32),
        grid=(bs, LAYERS),
        in_specs=in_specs,
        out_specs=pl.BlockSpec((1, nq_pad, n_pad), lambda b, l: (b, 0, 0)),
        scratch_shapes=[pltpu.VMEM((seq_pad, WIDTH), jnp.float32),   # resident tokens
                        pltpu.VMEM((seq_pad, WIDTH), jnp.float32)],  # unified q rows
        compiler_params=pltpu.CompilerParams(
            dimension_semantics=("parallel", "arbitrary")),
    )(*args)


# ---------------------------------------------------------------------------
# plain-JAX glue (preprocessing / padded operand assembly)
# ---------------------------------------------------------------------------
def preprocess_image(img):
    bs = img.shape[0]
    # TODO(synk): torch F.interpolate bicubic uses spline a=-0.75; jax bicubic uses
    # Keys a=-0.5 -> tiny numeric preprocessing difference (kept as JAX glue).
    x = jax.image.resize(img / 255.0, (bs, 3, INPUT_RES, INPUT_RES), method='bicubic')
    mean = jnp.array([0.48145466, 0.4578275, 0.40821073], jnp.float32).reshape(1, 3, 1, 1)
    std = jnp.array([0.26862954, 0.26130258, 0.27577711], jnp.float32).reshape(1, 3, 1, 1)
    return (x - mean) / std


def extract_patches(x):
    bs = x.shape[0]
    x = x.reshape(bs, 3, GRID_HW, PATCH, GRID_HW, PATCH)
    x = x.transpose(0, 2, 4, 1, 3, 5)                      # (bs, gh, gw, 3, p, p)
    return x.reshape(bs, NUM_PATCH, PDIM)


def build_attn_bias(masks, nq_pad, pc_pad):
    """Additive attention bias over the padded (seq_pad, pc_pad) layout.

    Rows [0, nq): real mask queries -- attend cls always, patch p iff mask > 0.
    Rows [nq, nq_pad) and every clip-query row: attend all real clip keys.
    Key columns [PC, pc_pad): padding -- always masked (never all-masked rows).
    """
    bs, nq = masks.shape[:2]
    m = jax.image.resize(masks, (bs, nq, INPUT_RES, INPUT_RES),
                         method='bilinear', antialias=False)
    m = m.reshape(bs, nq, GRID_HW, PATCH, GRID_HW, PATCH).max(axis=(3, 5))  # max_pool2d
    bin_m = (m > 0.0).reshape(bs, nq, NUM_PATCH)
    attend = jnp.concatenate([jnp.ones((bs, nq, 1), bool), bin_m], axis=2)   # (bs,nq,PC)
    mask_rows = jnp.concatenate(
        [jnp.where(attend, 0.0, NEG_INF),
         jnp.full((bs, nq, pc_pad - PC), NEG_INF)], axis=2)                  # (bs,nq,Pc')
    other_row = jnp.concatenate(
        [jnp.zeros((PC,), jnp.float32), jnp.full((pc_pad - PC,), NEG_INF)])
    n_other = (nq_pad - nq) + pc_pad
    other = jnp.broadcast_to(other_row[None, None, :], (bs, n_other, pc_pad))
    return jnp.concatenate([mask_rows, other], axis=1).astype(jnp.float32)


def encode_text(key, num_classes):
    # TODO(synk): real path requires CLIP's BPE tokenizer + text transformer;
    # synthesize deterministic L2-normalised text embeddings instead (incl. 'Background').
    t = jax.random.normal(key, (num_classes + 1, OUT_DIM), jnp.float32)
    return t / jnp.linalg.norm(t, axis=-1, keepdims=True)


def prepare_weights(params):
    """Fold the 1/sqrt(head_dim) attention scale into the q projections (host side)."""
    st = params['stack']
    scale = HEAD_DIM ** -0.5
    qcols = jnp.concatenate([jnp.full((WIDTH,), scale, jnp.float32),
                             jnp.ones((2 * WIDTH,), jnp.float32)])
    w = dict(st)
    w['in_w'] = (st['in_w'].astype(jnp.float32) * qcols).astype(jnp.bfloat16)
    w['in_b'] = st['in_b'] * qcols
    w['nq_w'] = (st['nq_w'].astype(jnp.float32) * scale).astype(jnp.bfloat16)
    w['nq_b'] = st['nq_b'] * scale
    for k in ('conv_w', 'ln_pre_g', 'ln_pre_b', 'ln_post_g', 'ln_post_b', 'proj'):
        w[k] = params[k]
    return w


def masqclip_forward(params, img, masks, txt_feats):
    bs, nq = masks.shape[:2]
    n = txt_feats.shape[0]
    nq_pad = _round_up(nq, 8)
    pc_pad = _round_up(PC, 8)
    n_pad = _round_up(n, 128)            # lane-dense logits store

    # preprocessing + padded operand assembly (cheap XLA glue)
    x = preprocess_image(img)
    patches = extract_patches(x)                                          # (bs, P, PDIM)
    # rows: [0, nq_pad) mask tokens, [nq_pad] cls, then patches, then padding.
    # mask/cls/padding rows have zero patch content so the single patch-embed
    # matmul inside the kernel directly produces the full (seq_pad, W) block.
    patches_in = jnp.concatenate(
        [jnp.zeros((bs, nq_pad + 1, PDIM), jnp.float32), patches,
         jnp.zeros((bs, pc_pad - PC, PDIM), jnp.float32)],
        axis=1).astype(jnp.bfloat16)                                      # (bs, S', PDIM)

    cls, pos = params['class_emb'], params['pos_emb']
    add_tab = jnp.concatenate(
        [jnp.broadcast_to((cls + params['mask_emb'])[None, :], (nq, WIDTH)),
         jnp.zeros((nq_pad - nq, WIDTH), jnp.float32),
         (cls + pos[0])[None, :], pos[1:],
         jnp.zeros((pc_pad - PC, WIDTH), jnp.float32)], axis=0)           # (S', W)

    attn_bias = build_attn_bias(masks, nq_pad, pc_pad)                    # (bs, S', Pc')
    txt_t = jnp.concatenate(
        [txt_feats, jnp.zeros((n_pad - n, OUT_DIM), jnp.float32)],
        axis=0).T.astype(jnp.bfloat16)                                    # (C, N') bf16

    weights = prepare_weights(params)
    logits = fused_forward(weights, patches_in, attn_bias, txt_t, add_tab,
                           nq_pad, pc_pad, n_pad)                         # [Pallas]
    return logits[:, :nq, :n]


# ---------------------------------------------------------------------------
# parameters
# ---------------------------------------------------------------------------
def init_params(key):
    keys = jax.random.split(key, 4 + LAYERS)
    s = WIDTH ** -0.5

    def nrm(k, shape, scale=0.02, dtype=jnp.float32):
        return (scale * jax.random.normal(k, shape, jnp.float32)).astype(dtype)

    params = {
        # Linear weights pre-transposed to (in, out) so the kernel does x @ W.
        # Matmul weights stored in bf16 (MXU operands); biases / LN params in f32.
        'conv_w': nrm(keys[0], (PDIM, WIDTH), dtype=jnp.bfloat16),
        'class_emb': s * jax.random.normal(keys[1], (WIDTH,), jnp.float32),
        'pos_emb': s * jax.random.normal(keys[2], (PC, WIDTH), jnp.float32),
        'ln_pre_g': jnp.ones((1, WIDTH), jnp.float32),
        'ln_pre_b': jnp.zeros((1, WIDTH), jnp.float32),
        'ln_post_g': jnp.ones((1, WIDTH), jnp.float32),
        'ln_post_b': jnp.zeros((1, WIDTH), jnp.float32),
        'proj': (s * jax.random.normal(keys[3], (WIDTH, OUT_DIM), jnp.float32)
                 ).astype(jnp.bfloat16),
    }
    params['mask_emb'] = params['pos_emb'][0]     # mask_embeddings = positional_embedding[0]

    per_layer = {name: [] for name in
                 ('in_w', 'in_b', 'nq_w', 'nq_b', 'out_w', 'out_b',
                  'ln1_g', 'ln1_b', 'ln2_g', 'ln2_b',
                  'fc_w', 'fc_b', 'pj_w', 'pj_b')}
    for l in range(LAYERS):
        k = jax.random.split(keys[4 + l], 10)
        per_layer['in_w'].append(nrm(k[0], (WIDTH, 3 * WIDTH), dtype=jnp.bfloat16))
        per_layer['in_b'].append(nrm(k[1], (1, 3 * WIDTH)))
        per_layer['nq_w'].append(nrm(k[2], (WIDTH, WIDTH), dtype=jnp.bfloat16))
        per_layer['nq_b'].append(nrm(k[3], (1, WIDTH)))
        per_layer['out_w'].append(nrm(k[4], (WIDTH, WIDTH), dtype=jnp.bfloat16))
        per_layer['out_b'].append(nrm(k[5], (1, WIDTH)))
        per_layer['ln1_g'].append(jnp.ones((1, WIDTH), jnp.float32))
        per_layer['ln1_b'].append(jnp.zeros((1, WIDTH), jnp.float32))
        per_layer['ln2_g'].append(jnp.ones((1, WIDTH), jnp.float32))
        per_layer['ln2_b'].append(jnp.zeros((1, WIDTH), jnp.float32))
        per_layer['fc_w'].append(nrm(k[6], (WIDTH, 4 * WIDTH), dtype=jnp.bfloat16))
        per_layer['fc_b'].append(nrm(k[7], (1, 4 * WIDTH)))
        per_layer['pj_w'].append(nrm(k[8], (4 * WIDTH, WIDTH), dtype=jnp.bfloat16))
        per_layer['pj_b'].append(nrm(k[9], (1, WIDTH)))
    # stacked across layers: one ref per parameter kind, BlockSpec picks layer l
    params['stack'] = {name: jnp.stack(v, axis=0) for name, v in per_layer.items()}
    return params


if __name__ == "__main__":
    key = jax.random.PRNGKey(0)
    kp, ki, km, kt = jax.random.split(key, 4)

    params = init_params(kp)
    bs, nq, n_classes = 2, 4, 6
    img = jax.random.uniform(ki, (bs, 3, 48, 48), jnp.float32, 0.0, 255.0)   # NCHW
    masks = jax.random.normal(km, (bs, nq, 24, 24), jnp.float32)             # predicted masks
    txt_feats = encode_text(kt, n_classes)                                   # (n_classes+1, C)

    logits = jax.jit(masqclip_forward)(params, img, masks, txt_feats)
    logits = jax.block_until_ready(logits)
    assert logits.shape == (bs, nq, n_classes + 1)
    assert bool(jnp.all(jnp.isfinite(logits)))
    print("KERNEL_OK")
</pallas_src>

<mosaic_0001>
module attributes {stable_mosaic.version = 11 : i64} {
  func.func @fused_forward_kernel(%arg0: i32, %arg1: i32, %arg2: memref<1x16x768xbf16, #tpu.memory_space<vmem>>, %arg3: memref<1x16x8xf32, #tpu.memory_space<vmem>>, %arg4: memref<128x128xbf16, #tpu.memory_space<vmem>>, %arg5: memref<768x256xbf16, #tpu.memory_space<vmem>>, %arg6: memref<16x256xf32, #tpu.memory_space<vmem>>, %arg7: memref<1x256xf32, #tpu.memory_space<vmem>>, %arg8: memref<1x256xf32, #tpu.memory_space<vmem>>, %arg9: memref<1x256x768xbf16, #tpu.memory_space<vmem>>, %arg10: memref<1x1x768xf32, #tpu.memory_space<vmem>>, %arg11: memref<1x256x256xbf16, #tpu.memory_space<vmem>>, %arg12: memref<1x1x256xf32, #tpu.memory_space<vmem>>, %arg13: memref<1x256x256xbf16, #tpu.memory_space<vmem>>, %arg14: memref<1x1x256xf32, #tpu.memory_space<vmem>>, %arg15: memref<1x1x256xf32, #tpu.memory_space<vmem>>, %arg16: memref<1x1x256xf32, #tpu.memory_space<vmem>>, %arg17: memref<1x1x256xf32, #tpu.memory_space<vmem>>, %arg18: memref<1x1x256xf32, #tpu.memory_space<vmem>>, %arg19: memref<1x256x1024xbf16, #tpu.memory_space<vmem>>, %arg20: memref<1x1x1024xf32, #tpu.memory_space<vmem>>, %arg21: memref<1x1024x256xbf16, #tpu.memory_space<vmem>>, %arg22: memref<1x1x256xf32, #tpu.memory_space<vmem>>, %arg23: memref<1x256xf32, #tpu.memory_space<vmem>>, %arg24: memref<1x256xf32, #tpu.memory_space<vmem>>, %arg25: memref<256x128xbf16, #tpu.memory_space<vmem>>, %arg26: memref<1x8x128xf32, #tpu.memory_space<vmem>>, %arg27: memref<16x256xf32, #tpu.memory_space<vmem>>, %arg28: memref<16x256xf32, #tpu.memory_space<vmem>>) attributes {dimension_semantics = [#tpu.dimension_semantics<parallel>, #tpu.dimension_semantics<arbitrary>], iteration_bounds = array<i64: 2, 2>, scalar_prefetch = 0 : i64, scratch_operands = 2 : i64, tpu.core_type = #tpu.core_type<tc>, window_params = [{transform_indices = @transform_0, window_bounds = array<i64: 1, 16, 768>}, {transform_indices = @transform_1, window_bounds = array<i64: 1, 16, 8>}, {pipeline_mode = #tpu.pipeline_mode<synchronous>, transform_indices = @transform_2, window_bounds = array<i64: 128, 128>}, {pipeline_mode = #tpu.pipeline_mode<synchronous>, transform_indices = @transform_3, window_bounds = array<i64: 768, 256>}, {pipeline_mode = #tpu.pipeline_mode<synchronous>, transform_indices = @transform_4, window_bounds = array<i64: 16, 256>}, {pipeline_mode = #tpu.pipeline_mode<synchronous>, transform_indices = @transform_5, window_bounds = array<i64: 1, 256>}, {pipeline_mode = #tpu.pipeline_mode<synchronous>, transform_indices = @transform_6, window_bounds = array<i64: 1, 256>}, {transform_indices = @transform_7, window_bounds = array<i64: 1, 256, 768>}, {transform_indices = @transform_8, window_bounds = array<i64: 1, 1, 768>}, {transform_indices = @transform_9, window_bounds = array<i64: 1, 256, 256>}, {transform_indices = @transform_10, window_bounds = array<i64: 1, 1, 256>}, {transform_indices = @transform_11, window_bounds = array<i64: 1, 256, 256>}, {transform_indices = @transform_12, window_bounds = array<i64: 1, 1, 256>}, {transform_indices = @transform_13, window_bounds = array<i64: 1, 1, 256>}, {transform_indices = @transform_14, window_bounds = array<i64: 1, 1, 256>}, {transform_indices = @transform_15, window_bounds = array<i64: 1, 1, 256>}, {transform_indices = @transform_16, window_bounds = array<i64: 1, 1, 256>}, {transform_indices = @transform_17, window_bounds = array<i64: 1, 256, 1024>}, {transform_indices = @transform_18, window_bounds = array<i64: 1, 1, 1024>}, {transform_indices = @transform_19, window_bounds = array<i64: 1, 1024, 256>}, {transform_indices = @transform_20, window_bounds = array<i64: 1, 1, 256>}, {pipeline_mode = #tpu.pipeline_mode<synchronous>, transform_indices = @transform_21, window_bounds = array<i64: 1, 256>}, {pipeline_mode = #tpu.pipeline_mode<synchronous>, transform_indices = @transform_22, window_bounds = array<i64: 1, 256>}, {pipeline_mode = #tpu.pipeline_mode<synchronous>, transform_indices = @transform_23, window_bounds = array<i64: 256, 128>}, {transform_indices = @transform_24, window_bounds = array<i64: 1, 8, 128>}]} {
    %c0_i32 = arith.constant 0 : i32
    %0 = arith.cmpi eq, %arg1, %c0_i32 : i32
    %1 = arith.extui %0 : i1 to i32
    %c0_i32_0 = arith.constant 0 : i32
    %2 = arith.cmpi ne, %1, %c0_i32_0 : i32
    scf.if %2 {
      %c0_81 = arith.constant 0 : index
      %c0_82 = arith.constant 0 : index
      %c0_83 = arith.constant 0 : index
      %163 = vector.load %arg2[%c0_81, %c0_82, %c0_83] : memref<1x16x768xbf16, #tpu.memory_space<vmem>>, vector<1x16x768xbf16>
      %164 = vector.shape_cast %163 : vector<1x16x768xbf16> to vector<16x768xbf16>
      %c0_84 = arith.constant 0 : index
      %c0_85 = arith.constant 0 : index
      %165 = vector.load %arg5[%c0_84, %c0_85] : memref<768x256xbf16, #tpu.memory_space<vmem>>, vector<768x256xbf16>
      %cst_86 = arith.constant dense<0.000000e+00> : vector<16x256xf32>
      %166 = tpu.matmul %164, %165, %cst_86 {dimension_numbers = #tpu.dot_dimension_numbers<[1], [0], [0], [1], [0, 0, 1, 1], [], []>} : vector<16x768xbf16>, vector<768x256xbf16>, vector<16x256xf32> -> vector<16x256xf32>
      %c0_87 = arith.constant 0 : index
      %c0_88 = arith.constant 0 : index
      %167 = vector.load %arg6[%c0_87, %c0_88] : memref<16x256xf32, #tpu.memory_space<vmem>>, vector<16x256xf32>
      %168 = arith.addf %166, %167 : vector<16x256xf32>
      %c0_89 = arith.constant 0 : index
      %c0_90 = arith.constant 0 : index
      %169 = vector.load %arg7[%c0_89, %c0_90] : memref<1x256xf32, #tpu.memory_space<vmem>>, vector<1x256xf32>
      %c0_91 = arith.constant 0 : index
      %c0_92 = arith.constant 0 : index
      %170 = vector.load %arg8[%c0_91, %c0_92] : memref<1x256xf32, #tpu.memory_space<vmem>>, vector<1x256xf32>
      %cst_93 = arith.constant dense<0.000000e+00> : vector<16xf32>
      %171 = vector.multi_reduction <add>, %168, %cst_93 [1] : vector<16x256xf32> to vector<16xf32>
      %172 = vector.shape_cast %171 : vector<16xf32> to vector<16x1xf32>
      %cst_94 = arith.constant 2.560000e+02 : f32
      %173 = vector.broadcast %cst_94 : f32 to vector<16x1xf32>
      %174 = arith.divf %172, %173 : vector<16x1xf32>
      %175 = vector.broadcast %174 : vector<16x1xf32> to vector<16x256xf32>
      %176 = arith.subf %168, %175 : vector<16x256xf32>
      %177 = arith.mulf %176, %176 : vector<16x256xf32>
      %cst_95 = arith.constant dense<0.000000e+00> : vector<16xf32>
      %178 = vector.multi_reduction <add>, %177, %cst_95 [1] : vector<16x256xf32> to vector<16xf32>
      %179 = vector.shape_cast %178 : vector<16xf32> to vector<16x1xf32>
      %cst_96 = arith.constant 2.560000e+02 : f32
      %180 = vector.broadcast %cst_96 : f32 to vector<16x1xf32>
      %181 = arith.divf %179, %180 : vector<16x1xf32>
      %182 = vector.broadcast %174 : vector<16x1xf32> to vector<16x256xf32>
      %183 = arith.subf %168, %182 : vector<16x256xf32>
      %cst_97 = arith.constant 9.99999974E-6 : f32
      %184 = vector.broadcast %cst_97 : f32 to vector<16x1xf32>
      %185 = arith.addf %181, %184 : vector<16x1xf32>
      %186 = math.rsqrt %185 : vector<16x1xf32>
      %187 = vector.broadcast %186 : vector<16x1xf32> to vector<16x256xf32>
      %188 = arith.mulf %183, %187 : vector<16x256xf32>
      %189 = vector.broadcast %169 : vector<1x256xf32> to vector<16x256xf32>
      %190 = arith.mulf %188, %189 : vector<16x256xf32>
      %191 = vector.broadcast %170 : vector<1x256xf32> to vector<16x256xf32>
      %192 = arith.addf %190, %191 : vector<16x256xf32>
      %c0_98 = arith.constant 0 : index
      %c0_99 = arith.constant 0 : index
      %193 = vector.load %arg27[%c0_98, %c0_99] : memref<16x256xf32, #tpu.memory_space<vmem>>, vector<16x256xf32>
      tpu.vector_store %arg27[%c0_98, %c0_99], %192 {strides = array<i32>} : memref<16x256xf32, #tpu.memory_space<vmem>>, vector<16x256xf32>,
    } else {
    }
    %c0 = arith.constant 0 : index
    %c0_1 = arith.constant 0 : index
    %3 = vector.load %arg27[%c0, %c0_1] : memref<16x256xf32, #tpu.memory_space<vmem>>, vector<16x256xf32>
    %c0_2 = arith.constant 0 : index
    %c0_3 = arith.constant 0 : index
    %c0_4 = arith.constant 0 : index
    %4 = vector.load %arg3[%c0_2, %c0_3, %c0_4] : memref<1x16x8xf32, #tpu.memory_space<vmem>>, vector<1x16x8xf32>
    %5 = vector.shape_cast %4 : vector<1x16x8xf32> to vector<16x8xf32>
    %c0_5 = arith.constant 0 : index
    %c0_6 = arith.constant 0 : index
    %c0_7 = arith.constant 0 : index
    %6 = vector.load %arg15[%c0_5, %c0_6, %c0_7] : memref<1x1x256xf32, #tpu.memory_space<vmem>>, vector<1x1x256xf32>
    %7 = vector.shape_cast %6 : vector<1x1x256xf32> to vector<1x256xf32>
    %c0_8 = arith.constant 0 : index
    %c0_9 = arith.constant 0 : index
    %c0_10 = arith.constant 0 : index
    %8 = vector.load %arg16[%c0_8, %c0_9, %c0_10] : memref<1x1x256xf32, #tpu.memory_space<vmem>>, vector<1x1x256xf32>
    %9 = vector.shape_cast %8 : vector<1x1x256xf32> to vector<1x256xf32>
    %cst = arith.constant dense<0.000000e+00> : vector<16xf32>
    %10 = vector.multi_reduction <add>, %3, %cst [1] : vector<16x256xf32> to vector<16xf32>
    %11 = vector.shape_cast %10 : vector<16xf32> to vector<16x1xf32>
    %cst_11 = arith.constant 2.560000e+02 : f32
    %12 = vector.broadcast %cst_11 : f32 to vector<16x1xf32>
    %13 = arith.divf %11, %12 : vector<16x1xf32>
    %14 = vector.broadcast %13 : vector<16x1xf32> to vector<16x256xf32>
    %15 = arith.subf %3, %14 : vector<16x256xf32>
    %16 = arith.mulf %15, %15 : vector<16x256xf32>
    %cst_12 = arith.constant dense<0.000000e+00> : vector<16xf32>
    %17 = vector.multi_reduction <add>, %16, %cst_12 [1] : vector<16x256xf32> to vector<16xf32>
    %18 = vector.shape_cast %17 : vector<16xf32> to vector<16x1xf32>
    %cst_13 = arith.constant 2.560000e+02 : f32
    %19 = vector.broadcast %cst_13 : f32 to vector<16x1xf32>
    %20 = arith.divf %18, %19 : vector<16x1xf32>
    %21 = vector.broadcast %13 : vector<16x1xf32> to vector<16x256xf32>
    %22 = arith.subf %3, %21 : vector<16x256xf32>
    %cst_14 = arith.constant 9.99999974E-6 : f32
    %23 = vector.broadcast %cst_14 : f32 to vector<16x1xf32>
    %24 = arith.addf %20, %23 : vector<16x1xf32>
    %25 = math.rsqrt %24 : vector<16x1xf32>
    %26 = vector.broadcast %25 : vector<16x1xf32> to vector<16x256xf32>
    %27 = arith.mulf %22, %26 : vector<16x256xf32>
    %28 = vector.broadcast %7 : vector<1x256xf32> to vector<16x256xf32>
    %29 = arith.mulf %27, %28 : vector<16x256xf32>
    %30 = vector.broadcast %9 : vector<1x256xf32> to vector<16x256xf32>
    %31 = arith.addf %29, %30 : vector<16x256xf32>
    %32 = vector.extract_strided_slice %31 {offsets = [8, 0], sizes = [8, 256], strides = [1, 1]} : vector<16x256xf32> to vector<8x256xf32>
    %33 = arith.truncf %32 : vector<8x256xf32> to vector<8x256xbf16>
    %34 = vector.extract_strided_slice %31 {offsets = [0, 0], sizes = [8, 256], strides = [1, 1]} : vector<16x256xf32> to vector<8x256xf32>
    %35 = arith.truncf %34 : vector<8x256xf32> to vector<8x256xbf16>
    %c0_15 = arith.constant 0 : index
    %c0_16 = arith.constant 0 : index
    %c0_17 = arith.constant 0 : index
    %36 = vector.load %arg9[%c0_15, %c0_16, %c0_17] : memref<1x256x768xbf16, #tpu.memory_space<vmem>>, vector<1x256x768xbf16>
    %37 = vector.shape_cast %36 : vector<1x256x768xbf16> to vector<256x768xbf16>
    %cst_18 = arith.constant dense<0.000000e+00> : vector<8x768xf32>
    %38 = tpu.matmul %33, %37, %cst_18 {dimension_numbers = #tpu.dot_dimension_numbers<[1], [0], [0], [1], [0, 0, 1, 1], [], []>} : vector<8x256xbf16>, vector<256x768xbf16>, vector<8x768xf32> -> vector<8x768xf32>
    %c0_19 = arith.constant 0 : index
    %c0_20 = arith.constant 0 : index
    %c0_21 = arith.constant 0 : index
    %39 = vector.load %arg10[%c0_19, %c0_20, %c0_21] : memref<1x1x768xf32, #tpu.memory_space<vmem>>, vector<1x1x768xf32>
    %40 = vector.shape_cast %39 : vector<1x1x768xf32> to vector<1x768xf32>
    %41 = vector.broadcast %40 : vector<1x768xf32> to vector<8x768xf32>
    %42 = arith.addf %38, %41 : vector<8x768xf32>
    %c0_22 = arith.constant 0 : index
    %c0_23 = arith.constant 0 : index
    %c0_24 = arith.constant 0 : index
    %43 = vector.load %arg11[%c0_22, %c0_23, %c0_24] : memref<1x256x256xbf16, #tpu.memory_space<vmem>>, vector<1x256x256xbf16>
    %44 = vector.shape_cast %43 : vector<1x256x256xbf16> to vector<256x256xbf16>
    %cst_25 = arith.constant dense<0.000000e+00> : vector<8x256xf32>
    %45 = tpu.matmul %35, %44, %cst_25 {dimension_numbers = #tpu.dot_dimension_numbers<[1], [0], [0], [1], [0, 0, 1, 1], [], []>} : vector<8x256xbf16>, vector<256x256xbf16>, vector<8x256xf32> -> vector<8x256xf32>
    %c0_26 = arith.constant 0 : index
    %c0_27 = arith.constant 0 : index
    %c0_28 = arith.constant 0 : index
    %46 = vector.load %arg12[%c0_26, %c0_27, %c0_28] : memref<1x1x256xf32, #tpu.memory_space<vmem>>, vector<1x1x256xf32>
    %47 = vector.shape_cast %46 : vector<1x1x256xf32> to vector<1x256xf32>
    %48 = vector.broadcast %47 : vector<1x256xf32> to vector<8x256xf32>
    %49 = arith.addf %45, %48 : vector<8x256xf32>
    %c0_29 = arith.constant 0 : index
    %c0_30 = arith.constant 0 : index
    %50 = vector.load %arg28[%c0_29, %c0_30] : memref<16x256xf32, #tpu.memory_space<vmem>>, vector<8x256xf32>
    tpu.vector_store %arg28[%c0_29, %c0_30], %49 {strides = array<i32>} : memref<16x256xf32, #tpu.memory_space<vmem>>, vector<8x256xf32>,
    %51 = vector.extract_strided_slice %42 {offsets = [0, 0], sizes = [8, 256], strides = [1, 1]} : vector<8x768xf32> to vector<8x256xf32>
    %c8 = arith.constant 8 : index
    %c0_31 = arith.constant 0 : index
    %52 = vector.load %arg28[%c8, %c0_31] : memref<16x256xf32, #tpu.memory_space<vmem>>, vector<8x256xf32>
    tpu.vector_store %arg28[%c8, %c0_31], %51 {strides = array<i32>} : memref<16x256xf32, #tpu.memory_space<vmem>>, vector<8x256xf32>,
    %c0_32 = arith.constant 0 : index
    %c0_33 = arith.constant 0 : index
    %53 = vector.load %arg28[%c0_32, %c0_33] : memref<16x256xf32, #tpu.memory_space<vmem>>, vector<16x256xf32>
    %c0_34 = arith.constant 0 : index
    %c0_35 = arith.constant 0 : index
    %c0_36 = arith.constant 0 : index
    %54 = vector.load %arg13[%c0_34, %c0_35, %c0_36] : memref<1x256x256xbf16, #tpu.memory_space<vmem>>, vector<1x256x256xbf16>
    %55 = vector.shape_cast %54 : vector<1x256x256xbf16> to vector<256x256xbf16>
    %c0_37 = arith.constant 0 : index
    %c0_38 = arith.constant 0 : index
    %c0_39 = arith.constant 0 : index
    %56 = vector.load %arg14[%c0_37, %c0_38, %c0_39] : memref<1x1x256xf32, #tpu.memory_space<vmem>>, vector<1x1x256xf32>
    %57 = vector.shape_cast %56 : vector<1x1x256xf32> to vector<1x256xf32>
    %58 = vector.extract_strided_slice %53 {offsets = [0, 0], sizes = [16, 128], strides = [1, 1]} : vector<16x256xf32> to vector<16x128xf32>
    %59 = arith.truncf %58 : vector<16x128xf32> to vector<16x128xbf16>
    %60 = vector.extract_strided_slice %42 {offsets = [0, 256], sizes = [8, 128], strides = [1, 1]} : vector<8x768xf32> to vector<8x128xf32>
    %61 = arith.truncf %60 : vector<8x128xf32> to vector<8x128xbf16>
    %62 = vector.extract_strided_slice %42 {offsets = [0, 512], sizes = [8, 128], strides = [1, 1]} : vector<8x768xf32> to vector<8x128xf32>
    %63 = arith.truncf %62 : vector<8x128xf32> to vector<8x128xbf16>
    "tpu.trace_start"() <{level = 10 : i32, message = "qd,kd->qk"}> : () -> ()
    %cst_40 = arith.constant dense<0.000000e+00> : vector<16x8xf32>
    %64 = tpu.matmul %59, %61, %cst_40 {dimension_numbers = #tpu.dot_dimension_numbers<[1], [1], [0], [0], [0, 0, 1, 0], [], []>} : vector<16x128xbf16>, vector<8x128xbf16>, vector<16x8xf32> -> vector<16x8xf32>
    "tpu.trace_stop"() : () -> ()
    %65 = arith.addf %64, %5 : vector<16x8xf32>
    %cst_41 = arith.constant dense<0xFF800000> : vector<16xf32>
    %66 = vector.multi_reduction <maximumf>, %65, %cst_41 [1] : vector<16x8xf32> to vector<16xf32>
    %67 = vector.shape_cast %66 : vector<16xf32> to vector<16x1xf32>
    %68 = vector.broadcast %67 : vector<16x1xf32> to vector<16x8xf32>
    %69 = arith.subf %65, %68 : vector<16x8xf32>
    %70 = math.exp %69 : vector<16x8xf32>
    %cst_42 = arith.constant dense<0.000000e+00> : vector<16xf32>
    %71 = vector.multi_reduction <add>, %70, %cst_42 [1] : vector<16x8xf32> to vector<16xf32>
    %72 = vector.shape_cast %71 : vector<16xf32> to vector<16x1xf32>
    %73 = tpu.reciprocal %72 {approx = true} : vector<16x1xf32> -> vector<16x1xf32>
    %74 = vector.broadcast %73 : vector<16x1xf32> to vector<16x8xf32>
    %75 = arith.mulf %70, %74 : vector<16x8xf32>
    %76 = arith.truncf %75 : vector<16x8xf32> to vector<16x8xbf16>
    %cst_43 = arith.constant dense<0.000000e+00> : vector<16x128xf32>
    %77 = tpu.matmul %76, %63, %cst_43 {dimension_numbers = #tpu.dot_dimension_numbers<[1], [0], [0], [1], [0, 0, 1, 1], [], []>} : vector<16x8xbf16>, vector<8x128xbf16>, vector<16x128xf32> -> vector<16x128xf32>
    %78 = arith.truncf %77 : vector<16x128xf32> to vector<16x128xbf16>
    %79 = vector.extract_strided_slice %55 {offsets = [0, 0], sizes = [128, 256], strides = [1, 1]} : vector<256x256xbf16> to vector<128x256xbf16>
    %cst_44 = arith.constant dense<0.000000e+00> : vector<16x256xf32>
    %80 = tpu.matmul %78, %79, %cst_44 {dimension_numbers = #tpu.dot_dimension_numbers<[1], [0], [0], [1], [0, 0, 1, 1], [], []>} : vector<16x128xbf16>, vector<128x256xbf16>, vector<16x256xf32> -> vector<16x256xf32>
    %81 = vector.broadcast %57 : vector<1x256xf32> to vector<16x256xf32>
    %82 = arith.addf %81, %80 : vector<16x256xf32>
    %83 = vector.extract_strided_slice %53 {offsets = [0, 128], sizes = [16, 128], strides = [1, 1]} : vector<16x256xf32> to vector<16x128xf32>
    %84 = arith.truncf %83 : vector<16x128xf32> to vector<16x128xbf16>
    %85 = vector.extract_strided_slice %42 {offsets = [0, 384], sizes = [8, 128], strides = [1, 1]} : vector<8x768xf32> to vector<8x128xf32>
    %86 = arith.truncf %85 : vector<8x128xf32> to vector<8x128xbf16>
    %87 = vector.extract_strided_slice %42 {offsets = [0, 640], sizes = [8, 128], strides = [1, 1]} : vector<8x768xf32> to vector<8x128xf32>
    %88 = arith.truncf %87 : vector<8x128xf32> to vector<8x128xbf16>
    "tpu.trace_start"() <{level = 10 : i32, message = "qd,kd->qk"}> : () -> ()
    %cst_45 = arith.constant dense<0.000000e+00> : vector<16x8xf32>
    %89 = tpu.matmul %84, %86, %cst_45 {dimension_numbers = #tpu.dot_dimension_numbers<[1], [1], [0], [0], [0, 0, 1, 0], [], []>} : vector<16x128xbf16>, vector<8x128xbf16>, vector<16x8xf32> -> vector<16x8xf32>
    "tpu.trace_stop"() : () -> ()
    %90 = arith.addf %89, %5 : vector<16x8xf32>
    %cst_46 = arith.constant dense<0xFF800000> : vector<16xf32>
    %91 = vector.multi_reduction <maximumf>, %90, %cst_46 [1] : vector<16x8xf32> to vector<16xf32>
    %92 = vector.shape_cast %91 : vector<16xf32> to vector<16x1xf32>
    %93 = vector.broadcast %92 : vector<16x1xf32> to vector<16x8xf32>
    %94 = arith.subf %90, %93 : vector<16x8xf32>
    %95 = math.exp %94 : vector<16x8xf32>
    %cst_47 = arith.constant dense<0.000000e+00> : vector<16xf32>
    %96 = vector.multi_reduction <add>, %95, %cst_47 [1] : vector<16x8xf32> to vector<16xf32>
    %97 = vector.shape_cast %96 : vector<16xf32> to vector<16x1xf32>
    %98 = tpu.reciprocal %97 {approx = true} : vector<16x1xf32> -> vector<16x1xf32>
    %99 = vector.broadcast %98 : vector<16x1xf32> to vector<16x8xf32>
    %100 = arith.mulf %95, %99 : vector<16x8xf32>
    %101 = arith.truncf %100 : vector<16x8xf32> to vector<16x8xbf16>
    %cst_48 = arith.constant dense<0.000000e+00> : vector<16x128xf32>
    %102 = tpu.matmul %101, %88, %cst_48 {dimension_numbers = #tpu.dot_dimension_numbers<[1], [0], [0], [1], [0, 0, 1, 1], [], []>} : vector<16x8xbf16>, vector<8x128xbf16>, vector<16x128xf32> -> vector<16x128xf32>
    %103 = arith.truncf %102 : vector<16x128xf32> to vector<16x128xbf16>
    %104 = vector.extract_strided_slice %55 {offsets = [128, 0], sizes = [128, 256], strides = [1, 1]} : vector<256x256xbf16> to vector<128x256xbf16>
    %cst_49 = arith.constant dense<0.000000e+00> : vector<16x256xf32>
    %105 = tpu.matmul %103, %104, %cst_49 {dimension_numbers = #tpu.dot_dimension_numbers<[1], [0], [0], [1], [0, 0, 1, 1], [], []>} : vector<16x128xbf16>, vector<128x256xbf16>, vector<16x256xf32> -> vector<16x256xf32>
    %106 = arith.addf %82, %105 : vector<16x256xf32>
    %107 = arith.addf %3, %106 : vector<16x256xf32>
    %c0_50 = arith.constant 0 : index
    %c0_51 = arith.constant 0 : index
    %c0_52 = arith.constant 0 : index
    %108 = vector.load %arg17[%c0_50, %c0_51, %c0_52] : memref<1x1x256xf32, #tpu.memory_space<vmem>>, vector<1x1x256xf32>
    %109 = vector.shape_cast %108 : vector<1x1x256xf32> to vector<1x256xf32>
    %c0_53 = arith.constant 0 : index
    %c0_54 = arith.constant 0 : index
    %c0_55 = arith.constant 0 : index
    %110 = vector.load %arg18[%c0_53, %c0_54, %c0_55] : memref<1x1x256xf32, #tpu.memory_space<vmem>>, vector<1x1x256xf32>
    %111 = vector.shape_cast %110 : vector<1x1x256xf32> to vector<1x256xf32>
    %cst_56 = arith.constant dense<0.000000e+00> : vector<16xf32>
    %112 = vector.multi_reduction <add>, %107, %cst_56 [1] : vector<16x256xf32> to vector<16xf32>
    %113 = vector.shape_cast %112 : vector<16xf32> to vector<16x1xf32>
    %cst_57 = arith.constant 2.560000e+02 : f32
    %114 = vector.broadcast %cst_57 : f32 to vector<16x1xf32>
    %115 = arith.divf %113, %114 : vector<16x1xf32>
    %116 = vector.broadcast %115 : vector<16x1xf32> to vector<16x256xf32>
    %117 = arith.subf %107, %116 : vector<16x256xf32>
    %118 = arith.mulf %117, %117 : vector<16x256xf32>
    %cst_58 = arith.constant dense<0.000000e+00> : vector<16xf32>
    %119 = vector.multi_reduction <add>, %118, %cst_58 [1] : vector<16x256xf32> to vector<16xf32>
    %120 = vector.shape_cast %119 : vector<16xf32> to vector<16x1xf32>
    %cst_59 = arith.constant 2.560000e+02 : f32
    %121 = vector.broadcast %cst_59 : f32 to vector<16x1xf32>
    %122 = arith.divf %120, %121 : vector<16x1xf32>
    %123 = vector.broadcast %115 : vector<16x1xf32> to vector<16x256xf32>
    %124 = arith.subf %107, %123 : vector<16x256xf32>
    %cst_60 = arith.constant 9.99999974E-6 : f32
    %125 = vector.broadcast %cst_60 : f32 to vector<16x1xf32>
    %126 = arith.addf %122, %125 : vector<16x1xf32>
    %127 = math.rsqrt %126 : vector<16x1xf32>
    %128 = vector.broadcast %127 : vector<16x1xf32> to vector<16x256xf32>
    %129 = arith.mulf %124, %128 : vector<16x256xf32>
    %130 = vector.broadcast %109 : vector<1x256xf32> to vector<16x256xf32>
    %131 = arith.mulf %129, %130 : vector<16x256xf32>
    %132 = vector.broadcast %111 : vector<1x256xf32> to vector<16x256xf32>
    %133 = arith.addf %131, %132 : vector<16x256xf32>
    %134 = arith.truncf %133 : vector<16x256xf32> to vector<16x256xbf16>
    %c0_61 = arith.constant 0 : index
    %c0_62 = arith.constant 0 : index
    %c0_63 = arith.constant 0 : index
    %135 = vector.load %arg19[%c0_61, %c0_62, %c0_63] : memref<1x256x1024xbf16, #tpu.memory_space<vmem>>, vector<1x256x1024xbf16>
    %136 = vector.shape_cast %135 : vector<1x256x1024xbf16> to vector<256x1024xbf16>
    %cst_64 = arith.constant dense<0.000000e+00> : vector<16x1024xf32>
    %137 = tpu.matmul %134, %136, %cst_64 {dimension_numbers = #tpu.dot_dimension_numbers<[1], [0], [0], [1], [0, 0, 1, 1], [], []>} : vector<16x256xbf16>, vector<256x1024xbf16>, vector<16x1024xf32> -> vector<16x1024xf32>
    %c0_65 = arith.constant 0 : index
    %c0_66 = arith.constant 0 : index
    %c0_67 = arith.constant 0 : index
    %138 = vector.load %arg20[%c0_65, %c0_66, %c0_67] : memref<1x1x1024xf32, #tpu.memory_space<vmem>>, vector<1x1x1024xf32>
    %139 = vector.shape_cast %138 : vector<1x1x1024xf32> to vector<1x1024xf32>
    %140 = vector.broadcast %139 : vector<1x1024xf32> to vector<16x1024xf32>
    %141 = arith.addf %137, %140 : vector<16x1024xf32>
    %cst_68 = arith.constant -1.702000e+00 : f32
    %142 = vector.broadcast %cst_68 : f32 to vector<16x1024xf32>
    %143 = arith.mulf %142, %141 : vector<16x1024xf32>
    %144 = math.exp %143 : vector<16x1024xf32>
    %cst_69 = arith.constant 1.000000e+00 : f32
    %145 = vector.broadcast %cst_69 : f32 to vector<16x1024xf32>
    %146 = arith.addf %145, %144 : vector<16x1024xf32>
    %cst_70 = arith.constant 1.000000e+00 : f32
    %147 = vector.broadcast %cst_70 : f32 to vector<16x1024xf32>
    %148 = arith.divf %147, %146 : vector<16x1024xf32>
    %149 = arith.mulf %141, %148 : vector<16x1024xf32>
    %150 = arith.truncf %149 : vector<16x1024xf32> to vector<16x1024xbf16>
    %c0_71 = arith.constant 0 : index
    %c0_72 = arith.constant 0 : index
    %c0_73 = arith.constant 0 : index
    %151 = vector.load %arg21[%c0_71, %c0_72, %c0_73] : memref<1x1024x256xbf16, #tpu.memory_space<vmem>>, vector<1x1024x256xbf16>
    %152 = vector.shape_cast %151 : vector<1x1024x256xbf16> to vector<1024x256xbf16>
    %cst_74 = arith.constant dense<0.000000e+00> : vector<16x256xf32>
    %153 = tpu.matmul %150, %152, %cst_74 {dimension_numbers = #tpu.dot_dimension_numbers<[1], [0], [0], [1], [0, 0, 1, 1], [], []>} : vector<16x1024xbf16>, vector<1024x256xbf16>, vector<16x256xf32> -> vector<16x256xf32>
    %c0_75 = arith.constant 0 : index
    %c0_76 = arith.constant 0 : index
    %c0_77 = arith.constant 0 : index
    %154 = vector.load %arg22[%c0_75, %c0_76, %c0_77] : memref<1x1x256xf32, #tpu.memory_space<vmem>>, vector<1x1x256xf32>
    %155 = vector.shape_cast %154 : vector<1x1x256xf32> to vector<1x256xf32>
    %156 = vector.broadcast %155 : vector<1x256xf32> to vector<16x256xf32>
    %157 = arith.addf %153, %156 : vector<16x256xf32>
    %158 = arith.addf %107, %157 : vector<16x256xf32>
    %c0_78 = arith.constant 0 : index
    %c0_79 = arith.constant 0 : index
    %159 = vector.load %arg27[%c0_78, %c0_79] : memref<16x256xf32, #tpu.memory_space<vmem>>, vector<16x256xf32>
    tpu.vector_store %arg27[%c0_78, %c0_79], %158 {strides = array<i32>} : memref<16x256xf32, #tpu.memory_space<vmem>>, vector<16x256xf32>,
    %c1_i32 = arith.constant 1 : i32
    %160 = arith.cmpi eq, %arg1, %c1_i32 : i32
    %161 = arith.extui %160 : i1 to i32
    %c0_i32_80 = arith.constant 0 : i32
    %162 = arith.cmpi ne, %161, %c0_i32_80 : i32
    scf.if %162 {
      %163 = vector.extract_strided_slice %158 {offsets = [0, 0], sizes = [8, 256], strides = [1, 1]} : vector<16x256xf32> to vector<8x256xf32>
      %c0_81 = arith.constant 0 : index
      %c0_82 = arith.constant 0 : index
      %164 = vector.load %arg23[%c0_81, %c0_82] : memref<1x256xf32, #tpu.memory_space<vmem>>, vector<1x256xf32>
      %c0_83 = arith.constant 0 : index
      %c0_84 = arith.constant 0 : index
      %165 = vector.load %arg24[%c0_83, %c0_84] : memref<1x256xf32, #tpu.memory_space<vmem>>, vector<1x256xf32>
      %cst_85 = arith.constant dense<0.000000e+00> : vector<8xf32>
      %166 = vector.multi_reduction <add>, %163, %cst_85 [1] : vector<8x256xf32> to vector<8xf32>
      %167 = vector.shape_cast %166 : vector<8xf32> to vector<8x1xf32>
      %cst_86 = arith.constant 2.560000e+02 : f32
      %168 = vector.broadcast %cst_86 : f32 to vector<8x1xf32>
      %169 = arith.divf %167, %168 : vector<8x1xf32>
      %170 = vector.broadcast %169 : vector<8x1xf32> to vector<8x256xf32>
      %171 = arith.subf %163, %170 : vector<8x256xf32>
      %172 = arith.mulf %171, %171 : vector<8x256xf32>
      %cst_87 = arith.constant dense<0.000000e+00> : vector<8xf32>
      %173 = vector.multi_reduction <add>, %172, %cst_87 [1] : vector<8x256xf32> to vector<8xf32>
      %174 = vector.shape_cast %173 : vector<8xf32> to vector<8x1xf32>
      %cst_88 = arith.constant 2.560000e+02 : f32
      %175 = vector.broadcast %cst_88 : f32 to vector<8x1xf32>
      %176 = arith.divf %174, %175 : vector<8x1xf32>
      %177 = vector.broadcast %169 : vector<8x1xf32> to vector<8x256xf32>
      %178 = arith.subf %163, %177 : vector<8x256xf32>
      %cst_89 = arith.constant 9.99999974E-6 : f32
      %179 = vector.broadcast %cst_89 : f32 to vector<8x1xf32>
      %180 = arith.addf %176, %179 : vector<8x1xf32>
      %181 = math.rsqrt %180 : vector<8x1xf32>
      %182 = vector.broadcast %181 : vector<8x1xf32> to vector<8x256xf32>
      %183 = arith.mulf %178, %182 : vector<8x256xf32>
      %184 = vector.broadcast %164 : vector<1x256xf32> to vector<8x256xf32>
      %185 = arith.mulf %183, %184 : vector<8x256xf32>
      %186 = vector.broadcast %165 : vector<1x256xf32> to vector<8x256xf32>
      %187 = arith.addf %185, %186 : vector<8x256xf32>
      %188 = arith.truncf %187 : vector<8x256xf32> to vector<8x256xbf16>
      %c0_90 = arith.constant 0 : index
      %c0_91 = arith.constant 0 : index
      %189 = vector.load %arg25[%c0_90, %c0_91] : memref<256x128xbf16, #tpu.memory_space<vmem>>, vector<256x128xbf16>
      %cst_92 = arith.constant dense<0.000000e+00> : vector<8x128xf32>
      %190 = tpu.matmul %188, %189, %cst_92 {dimension_numbers = #tpu.dot_dimension_numbers<[1], [0], [0], [1], [0, 0, 1, 1], [], []>} : vector<8x256xbf16>, vector<256x128xbf16>, vector<8x128xf32> -> vector<8x128xf32>
      %191 = arith.mulf %190, %190 : vector<8x128xf32>
      %cst_93 = arith.constant dense<0.000000e+00> : vector<8xf32>
      %192 = vector.multi_reduction <add>, %191, %cst_93 [1] : vector<8x128xf32> to vector<8xf32>
      %193 = vector.shape_cast %192 : vector<8xf32> to vector<8x1xf32>
      %cst_94 = arith.constant 9.99999996E-13 : f32
      %194 = vector.broadcast %cst_94 : f32 to vector<8x1xf32>
      %195 = arith.addf %193, %194 : vector<8x1xf32>
      %196 = math.rsqrt %195 : vector<8x1xf32>
      %197 = vector.broadcast %196 : vector<8x1xf32> to vector<8x128xf32>
      %198 = arith.mulf %190, %197 : vector<8x128xf32>
      %199 = arith.truncf %198 : vector<8x128xf32> to vector<8x128xbf16>
      %c0_95 = arith.constant 0 : index
      %c0_96 = arith.constant 0 : index
      %200 = vector.load %arg4[%c0_95, %c0_96] : memref<128x128xbf16, #tpu.memory_space<vmem>>, vector<128x128xbf16>
      %cst_97 = arith.constant dense<0.000000e+00> : vector<8x128xf32>
      %201 = tpu.matmul %199, %200, %cst_97 {dimension_numbers = #tpu.dot_dimension_numbers<[1], [0], [0], [1], [0, 0, 1, 1], [], []>} : vector<8x128xbf16>, vector<128x128xbf16>, vector<8x128xf32> -> vector<8x128xf32>
      %cst_98 = arith.constant 1.000000e+02 : f32
      %202 = vector.broadcast %cst_98 : f32 to vector<8x128xf32>
      %203 = arith.mulf %201, %202 : vector<8x128xf32>
      %c0_99 = arith.constant 0 : index
      %c0_100 = arith.constant 0 : index
      %c0_101 = arith.constant 0 : index
      %204 = vector.load %arg26[%c0_99, %c0_100, %c0_101] : memref<1x8x128xf32, #tpu.memory_space<vmem>>, vector<1x8x128xf32>
      %205 = vector.shape_cast %204 : vector<1x8x128xf32> to vector<8x128xf32>
      %206 = vector.shape_cast %203 : vector<8x128xf32> to vector<1x8x128xf32>
      tpu.vector_store %arg26[%c0_99, %c0_100, %c0_101], %206 {strides = array<i32>} : memref<1x8x128xf32, #tpu.memory_space<vmem>>, vector<1x8x128xf32>,
    } else {
    }
    return
  }
  func.func @transform_0(%arg0: i32, %arg1: i32) -> (i32, i32, i32) {
    %c0_i32 = arith.constant 0 : i32
    %c0_i32_0 = arith.constant 0 : i32
    %c0_i32_1 = arith.constant 0 : i32
    return %arg0, %c0_i32, %c0_i32_0 : i32, i32, i32
  }
  func.func @transform_1(%arg0: i32, %arg1: i32) -> (i32, i32, i32) {
    %c0_i32 = arith.constant 0 : i32
    %c0_i32_0 = arith.constant 0 : i32
    %c0_i32_1 = arith.constant 0 : i32
    return %arg0, %c0_i32, %c0_i32_0 : i32, i32, i32
  }
  func.func @transform_2(%arg0: i32, %arg1: i32) -> (i32, i32) {
    %c0_i32 = arith.constant 0 : i32
    %c0_i32_0 = arith.constant 0 : i32
    %c0_i32_1 = arith.constant 0 : i32
    return %c0_i32, %c0_i32_0 : i32, i32
  }
  func.func @transform_3(%arg0: i32, %arg1: i32) -> (i32, i32) {
    %c0_i32 = arith.constant 0 : i32
    %c0_i32_0 = arith.constant 0 : i32
    %c0_i32_1 = arith.constant 0 : i32
    return %c0_i32, %c0_i32_0 : i32, i32
  }
  func.func @transform_4(%arg0: i32, %arg1: i32) -> (i32, i32) {
    %c0_i32 = arith.constant 0 : i32
    %c0_i32_0 = arith.constant 0 : i32
    %c0_i32_1 = arith.constant 0 : i32
    return %c0_i32, %c0_i32_0 : i32, i32
  }
  func.func @transform_5(%arg0: i32, %arg1: i32) -> (i32, i32) {
    %c0_i32 = arith.constant 0 : i32
    %c0_i32_0 = arith.constant 0 : i32
    %c0_i32_1 = arith.constant 0 : i32
    return %c0_i32, %c0_i32_0 : i32, i32
  }
  func.func @transform_6(%arg0: i32, %arg1: i32) -> (i32, i32) {
    %c0_i32 = arith.constant 0 : i32
    %c0_i32_0 = arith.constant 0 : i32
    %c0_i32_1 = arith.constant 0 : i32
    return %c0_i32, %c0_i32_0 : i32, i32
  }
  func.func @transform_7(%arg0: i32, %arg1: i32) -> (i32, i32, i32) {
    %c0_i32 = arith.constant 0 : i32
    %c0_i32_0 = arith.constant 0 : i32
    %c0_i32_1 = arith.constant 0 : i32
    return %arg1, %c0_i32, %c0_i32_0 : i32, i32, i32
  }
  func.func @transform_8(%arg0: i32, %arg1: i32) -> (i32, i32, i32) {
    %c0_i32 = arith.constant 0 : i32
    %c0_i32_0 = arith.constant 0 : i32
    %c0_i32_1 = arith.constant 0 : i32
    return %arg1, %c0_i32, %c0_i32_0 : i32, i32, i32
  }
  func.func @transform_9(%arg0: i32, %arg1: i32) -> (i32, i32, i32) {
    %c0_i32 = arith.constant 0 : i32
    %c0_i32_0 = arith.constant 0 : i32
    %c0_i32_1 = arith.constant 0 : i32
    return %arg1, %c0_i32, %c0_i32_0 : i32, i32, i32
  }
  func.func @transform_10(%arg0: i32, %arg1: i32) -> (i32, i32, i32) {
    %c0_i32 = arith.constant 0 : i32
    %c0_i32_0 = arith.constant 0 : i32
    %c0_i32_1 = arith.constant 0 : i32
    return %arg1, %c0_i32, %c0_i32_0 : i32, i32, i32
  }
  func.func @transform_11(%arg0: i32, %arg1: i32) -> (i32, i32, i32) {
    %c0_i32 = arith.constant 0 : i32
    %c0_i32_0 = arith.constant 0 : i32
    %c0_i32_1 = arith.constant 0 : i32
    return %arg1, %c0_i32, %c0_i32_0 : i32, i32, i32
  }
  func.func @transform_12(%arg0: i32, %arg1: i32) -> (i32, i32, i32) {
    %c0_i32 = arith.constant 0 : i32
    %c0_i32_0 = arith.constant 0 : i32
    %c0_i32_1 = arith.constant 0 : i32
    return %arg1, %c0_i32, %c0_i32_0 : i32, i32, i32
  }
  func.func @transform_13(%arg0: i32, %arg1: i32) -> (i32, i32, i32) {
    %c0_i32 = arith.constant 0 : i32
    %c0_i32_0 = arith.constant 0 : i32
    %c0_i32_1 = arith.constant 0 : i32
    return %arg1, %c0_i32, %c0_i32_0 : i32, i32, i32
  }
  func.func @transform_14(%arg0: i32, %arg1: i32) -> (i32, i32, i32) {
    %c0_i32 = arith.constant 0 : i32
    %c0_i32_0 = arith.constant 0 : i32
    %c0_i32_1 = arith.constant 0 : i32
    return %arg1, %c0_i32, %c0_i32_0 : i32, i32, i32
  }
  func.func @transform_15(%arg0: i32, %arg1: i32) -> (i32, i32, i32) {
    %c0_i32 = arith.constant 0 : i32
    %c0_i32_0 = arith.constant 0 : i32
    %c0_i32_1 = arith.constant 0 : i32
    return %arg1, %c0_i32, %c0_i32_0 : i32, i32, i32
  }
  func.func @transform_16(%arg0: i32, %arg1: i32) -> (i32, i32, i32) {
    %c0_i32 = arith.constant 0 : i32
    %c0_i32_0 = arith.constant 0 : i32
    %c0_i32_1 = arith.constant 0 : i32
    return %arg1, %c0_i32, %c0_i32_0 : i32, i32, i32
  }
  func.func @transform_17(%arg0: i32, %arg1: i32) -> (i32, i32, i32) {
    %c0_i32 = arith.constant 0 : i32
    %c0_i32_0 = arith.constant 0 : i32
    %c0_i32_1 = arith.constant 0 : i32
    return %arg1, %c0_i32, %c0_i32_0 : i32, i32, i32
  }
  func.func @transform_18(%arg0: i32, %arg1: i32) -> (i32, i32, i32) {
    %c0_i32 = arith.constant 0 : i32
    %c0_i32_0 = arith.constant 0 : i32
    %c0_i32_1 = arith.constant 0 : i32
    return %arg1, %c0_i32, %c0_i32_0 : i32, i32, i32
  }
  func.func @transform_19(%arg0: i32, %arg1: i32) -> (i32, i32, i32) {
    %c0_i32 = arith.constant 0 : i32
    %c0_i32_0 = arith.constant 0 : i32
    %c0_i32_1 = arith.constant 0 : i32
    return %arg1, %c0_i32, %c0_i32_0 : i32, i32, i32
  }
  func.func @transform_20(%arg0: i32, %arg1: i32) -> (i32, i32, i32) {
    %c0_i32 = arith.constant 0 : i32
    %c0_i32_0 = arith.constant 0 : i32
    %c0_i32_1 = arith.constant 0 : i32
    return %arg1, %c0_i32, %c0_i32_0 : i32, i32, i32
  }
  func.func @transform_21(%arg0: i32, %arg1: i32) -> (i32, i32) {
    %c0_i32 = arith.constant 0 : i32
    %c0_i32_0 = arith.constant 0 : i32
    %c0_i32_1 = arith.constant 0 : i32
    return %c0_i32, %c0_i32_0 : i32, i32
  }
  func.func @transform_22(%arg0: i32, %arg1: i32) -> (i32, i32) {
    %c0_i32 = arith.constant 0 : i32
    %c0_i32_0 = arith.constant 0 : i32
    %c0_i32_1 = arith.constant 0 : i32
    return %c0_i32, %c0_i32_0 : i32, i32
  }
  func.func @transform_23(%arg0: i32, %arg1: i32) -> (i32, i32) {
    %c0_i32 = arith.constant 0 : i32
    %c0_i32_0 = arith.constant 0 : i32
    %c0_i32_1 = arith.constant 0 : i32
    return %c0_i32, %c0_i32_0 : i32, i32
  }
  func.func @transform_24(%arg0: i32, %arg1: i32) -> (i32, i32, i32) {
    %c0_i32 = arith.constant 0 : i32
    %c0_i32_0 = arith.constant 0 : i32
    %c0_i32_1 = arith.constant 0 : i32
    return %arg0, %c0_i32, %c0_i32_0 : i32, i32, i32
  }
}

</mosaic_0001>

<bundles_post_ra>
// kernel: masqclip_forward.1
= control target key start
LH: loop header
LB: loop body
LE: loop exit
PB: predicated region body
PF: predicated region fallthrough
CT: control target
= control target key end

     0   :  { %s7763_s26 = smov 0   ;;  %s7765_s27 = smov 0   ;;  %s9015_s0 = inlined_call_operand.vmem [shape: bf16[2,16,768], index: 0, kind: input, shape index: {}]   ;;  %s9016_s1 = inlined_call_operand.vmem [shape: f32[2,16,8], index: 1, kind: input, shape index: {}]   ;;  %s9017_s2 = inlined_call_operand.vmem [shape: bf16[128,128], index: 2, kind: input, shape index: {}]   ;;  %s9018_s3 = inlined_call_operand.vmem [shape: bf16[768,256], index: 3, kind: input, shape index: {}]   ;;  %s9019_s4 = inlined_call_operand.vmem [shape: f32[16,256], index: 4, kind: input, shape index: {}]   ;;  %s9020_s5 = inlined_call_operand.vmem [shape: f32[1,256], index: 5, kind: input, shape index: {}]   ;;  %s9021_s6 = inlined_call_operand.vmem [shape: f32[1,256], index: 6, kind: input, shape index: {}]   ;;  %s9022_s7 = inlined_call_operand.vmem [shape: bf16[2,256,768], index: 7, kind: input, shape index: {}]   ;;  %s9023_s8 = inlined_call_operand.vmem [shape: f32[2,1,768], index: 8, kind: input, shape index: {}]   ;;  %s9024_s9 = inlined_call_operand.vmem [shape: bf16[2,256,256], index: 9, kind: input, shape index: {}]   ;;  %s9025_s10 = inlined_call_operand.vmem [shape: f32[2,1,256], index: 10, kind: input, shape index: {}]   ;;  %s9026_s11 = inlined_call_operand.vmem [shape: bf16[2,256,256], index: 11, kind: input, shape index: {}]   ;;  %s9027_s12 = inlined_call_operand.vmem [shape: f32[2,1,256], index: 12, kind: input, shape index: {}]   ;;  %s9028_s13 = inlined_call_operand.vmem [shape: f32[2,1,256], index: 13, kind: input, shape index: {}]   ;;  %s9029_s14 = inlined_call_operand.vmem [shape: f32[2,1,256], index: 14, kind: input, shape index: {}]   ;;  %s9030_s15 = inlined_call_operand.vmem [shape: f32[2,1,256], index: 15, kind: input, shape index: {}]   ;;  %s9031_s16 = inlined_call_operand.vmem [shape: f32[2,1,256], index: 16, kind: input, shape index: {}]   ;;  %s9032_s17 = inlined_call_operand.vmem [shape: bf16[2,256,1024], index: 17, kind: input, shape index: {}]   ;;  %s9033_s18 = inlined_call_operand.vmem [shape: f32[2,1,1024], index: 18, kind: input, shape index: {}]   ;;  %s9034_s19 = inlined_call_operand.vmem [shape: bf16[2,1024,256], index: 19, kind: input, shape index: {}]   ;;  %s9035_s20 = inlined_call_operand.vmem [shape: f32[2,1,256], index: 20, kind: input, shape index: {}]   ;;  %s9036_s21 = inlined_call_operand.vmem [shape: f32[1,256], index: 21, kind: input, shape index: {}]   ;;  %s9037_s22 = inlined_call_operand.vmem [shape: f32[1,256], index: 22, kind: input, shape index: {}]   ;;  %s9038_s23 = inlined_call_operand.vmem [shape: bf16[256,128], index: 23, kind: input, shape index: {}]   ;;  %s9039_s24 = inlined_call_operand.vmem [shape: f32[2,8,128], index: 24, kind: output, shape index: {}]  }
   0x1   :  { %9049 = sst [smem:[#allocation11_spill]] %s9015_s0  ;;  %s7767_s28 = smov 0  }
   0x2   :  { %9050 = sst [smem:[#allocation12_spill]] %s9016_s1 }
   0x3   :  { %9051 = sst [smem:[#allocation13_spill]] %s9017_s2 }
   0x4   :  { %9052 = sst [smem:[#allocation14_spill]] %s9018_s3 }
   0x5   :  { %9053 = sst [smem:[#allocation15_spill]] %s9019_s4 }
   0x6   :  { %9054 = sst [smem:[#allocation16_spill]] %s9020_s5  ;;  %s7761_s5 = smov 0  }
   0x7   :  { %9055 = sst [smem:[#allocation17_spill]] %s9021_s6  ;;  %s7769_s6 = smov 0  }
   0x8   :  { %9056 = sst [smem:[#allocation18_spill]] %s9022_s7 }
   0x9   :  { %9057 = sst [smem:[#allocation19_spill]] %s9023_s8 }
   0xa   :  { %9058 = sst [smem:[#allocation20_spill]] %s9024_s9 }
   0xb   :  { %9059 = sst [smem:[#allocation21_spill]] %s9026_s11 }
   0xc   :  { %9060 = sst [smem:[#allocation22_spill]] %s9027_s12 }
   0xd   :  { %9061 = sst [smem:[#allocation23_spill]] %s9030_s15 }
   0xe   :  { %9062 = sst [smem:[#allocation24_spill]] %s9031_s16 }
   0xf   :  { %9063 = sst [smem:[#allocation25_spill]] %s9032_s17 }
  0x10   :  { %9064 = sst [smem:[#allocation26_spill]] %s9033_s18 }
  0x11   :  { %9065 = sst [smem:[#allocation27_spill]] %s9034_s19 }
  0x12   :  { %9066 = sst [smem:[#allocation28_spill]] %s9035_s20 }
  0x13   :  { %9067 = sst [smem:[#allocation29_spill]] %s9036_s21 }
  0x14   :  { %9068 = sst [smem:[#allocation30_spill]] %s9037_s22 }
  0x15   :  { %9069 = sst [smem:[#allocation31_spill]] %s9038_s23 }
  0x16   :  { %9070 = sst [smem:[#allocation32_spill]] %s9039_s24 }
  0x17 LB: > { %9071 = sst [smem:[#allocation4_spill]] %s7613_s5  ;;  %s43_s2 = sadd.s32 1, %s7621_s27  ;;  %s7629_s6 = sphi %s7769_s6, %s34_s6   ;;  %s7625_s28 = sphi %s7767_s28, %s9119_s28   ;;  %s7621_s27 = sphi %s7765_s27, %s9118_s27   ;;  %s7617_s26 = sphi %s7763_s26, %s9117_s26   ;;  %s7613_s5 = sphi %s7761_s5, %s9116_s5  }
  0x18   : > { %9072 = sst [smem:[#allocation5_spill]] %s7621_s27  ;;  %s46_s29 = sadd.s32 1, %s7625_s28 }
  0x19   : > { %9073 = sst [smem:[#allocation6_spill]] %s7625_s28  ;;  %p44_p0 = scmp.ge.s32.totalorder %s43_s2, 2 }
  0x1a   : > { %9074 = sst [smem:[#allocation7_spill]] %s7629_s6  ;;  %p6140_p1 = scmp.ge.s32.totalorder %s7629_s6, 1 }
  0x1b   : > { %p815_p2 = scmp.lt.s32.totalorder %s7629_s6, 5  ;;  %s9121_s2 = smov (%p44_p0, %s43_s2), 0 }
  0x1c   : > { %9075 = sst [smem:[#allocation8_spill]] %s9121_s2  ;;  %s9123_s29 = smov (!%p44_p0, %s46_s29), %s7625_s28 }
  0x1d   : > { %p816_p3 = pnand %p6140_p1, %p815_p2  ;;  %p48_p4 = scmp.ge.s32.totalorder %s9123_s29, 2 }
  0x1f   : > { %s9125_s29 = smov (%p48_p4, %s9123_s29), 0  ;;  %819 = sbr.rel (%p816_p3) target bundleno = 5073 (0x13d1), region = 116 }
  0x20   : > { %9076 = sst [smem:[#allocation9_spill]] %s9125_s29 }
  0x26   : > { %p946_p5 = scmp.lt.s32.totalorder %s7617_s26, 1  ;;  %p956_p6 = scmp.lt.s32.totalorder %s7613_s5, 1 }
  0x27   : > { %s9077_s8 = sld [smem:[#allocation12_spill]]  ;;  %s9078_s27 = sld [smem:[#allocation11_spill]] }
  0x28   : > { %s9127_s26 = smov (!%p946_p5, %s7617_s26), 1  ;;  %s9079_s23 = sld [smem:[#allocation18_spill]] }
  0x29   : > { %s957_s0 = scalar_select %p956_p6, %s7613_s5, 1 }
  0x2a   : > { %s6834_s7 = smul.u32 48, %s9127_s26  ;;  %s6710_s30 = sshll.u32 %s9127_s26, 4 }
  0x2b   : > { %s6835_s1 = smul.u32 768, %s957_s0  ;;  %s6711_s5 = sshll.u32 %s957_s0, 8 }
  0x2c   : > { %s6836_s29 = smul.u32 6, %s957_s0  ;;  %s9080_s18 = sld [smem:[#allocation19_spill]] }
  0x2d   : > { %s7798_s4 = scalar_lea.vmem %s9077_s8, %s6710_s30  ;;  %s7803_s6 = scalar_lea.vmem %s9078_s27, %s6834_s7 }
  0x2e   : > { %s7808_s24 = scalar_lea.vmem %s9079_s23, %s6835_s1  ;;  %s9081_s9 = sld [smem:[#allocation20_spill]] }
  0x2f   : > { %s7820_s28 = sshll.u32 %s957_s0, 1  ;;  %s9082_s11 = sld [smem:[#allocation21_spill]] }
  0x30   : > { %s6713_s20 = sshll.u32 %s957_s0, 10  ;;  %s6157_s21 = sshll.u32 %s957_s0, 3 }
  0x31   : > { %s9088_s1 = sld [smem:[#allocation26_spill]]  ;;  %s6161_s0 = sshll.u32 %s9127_s26, 3 }
  0x32   : > { %s7813_s17 = scalar_lea.vmem %s9080_s18, %s6836_s29  ;;  %s9087_s29 = sld [smem:[#allocation25_spill]] }
  0x33   : > { %s9091_s22 = sld [smem:[#allocation32_spill]]  ;;  %s9092_s23 = sld [smem:[#allocation4_spill]] }
  0x34   : > { %s7818_s25 = scalar_lea.vmem %s9081_s9, %s6711_s5  ;;  %s9089_s9 = sld [smem:[#allocation27_spill]] }
  0x35   : > { %s7825_s19 = scalar_lea.vmem %s9082_s11, %s6711_s5 }
  0x36   : > { %9083 = sst [smem:[#allocation10_spill]] %s7825_s19  ;;  %s9090_s19 = sld [smem:[#allocation28_spill]] }
  0x37   : > { %s7859_s30 = scalar_lea.vmem %s9088_s1, %s6157_s21 }
  0x38   : > { %s7854_s12 = scalar_lea.vmem %s9087_s29, %s6713_s20 }
  0x39   : > { %s7873_s29 = scalar_lea.vmem %s9091_s22, %s6161_s0  ;;  %p6162_p7 = scmp.ne.s32.totalorder %s9092_s23, 0 }
  0x3a   : > { %s7864_s2 = scalar_lea.vmem %s9089_s9, %s6713_s20  ;;  %s9093_s7 = sld [smem:[#allocation14_spill]] (!%p6162_p7)  ;;  %v6938_v19 = vld [vmem:[%s7803_s6 + $0xc] ss:$24 sps:$4 sm:$0xff] (!%p6162_p7)   ;;  %v6936_v57 = vld [vmem:[%s7803_s6 + $0x8] ss:$24 sps:$4 sm:$0xff] (!%p6162_p7)  }
  0x3b   : > { %1025 = sbr.rel (%p6162_p7) target bundleno = 728 (0x2d8), region = 120  ;;  %1717 = vmatprep.mubr.bf16.mxu0 (!%p6162_p7), %v6938_v19  ;;  %v7028_v62 = vld [vmem:[%s7803_s6 + $0x4] ss:$24 sps:$4 sm:$0xff] (!%p6162_p7)   ;;  %s9094_s27 = sld [smem:[#allocation15_spill]] (!%p6162_p7) }
  0x3c   : > { %s1016_s18 = scalar_lea.vmem %s9090_s19, %s7820_s28  ;;  %1674 = vmatprep.mubr.bf16.mxu1 (!%p6162_p7), %v7028_v62  ;;  %s9096_s11 = sld [smem:[#allocation16_spill]] (!%p6162_p7) }
  0x3d   : > { %s9097_s22 = sld [smem:[#allocation17_spill]] (!%p6162_p7) }
  0x40   : > { %v6882_v0 = vld [vmem:[%s9093_s7 + $0x104] ss:$8 sps:$4 sm:$0xff] (!%p6162_p7)   ;;  %v6884_v1 = vld [vmem:[%s9093_s7 + $0x100] ss:$8 sps:$4 sm:$0xff] (!%p6162_p7)   ;;  %v6885_v2 = vld [vmem:[%s9093_s7 + $0x114] ss:$8 sps:$4 sm:$0xff] (!%p6162_p7)  }
  0x41   : > { %1685 = vmatprep.subr.bf16.mxu0 (!%p6162_p7), %v6882_v0  ;;  %v6887_v3 = vld [vmem:[%s9093_s7 + $0x110] ss:$8 sps:$4 sm:$0xff] (!%p6162_p7)   ;;  %v6888_v4 = vld [vmem:[%s9093_s7 + $0x124] ss:$8 sps:$4 sm:$0xff] (!%p6162_p7)   ;;  %v6890_v5 = vld [vmem:[%s9093_s7 + $0x120] ss:$8 sps:$4 sm:$0xff] (!%p6162_p7)   ;;  %s9095_s20 = smov (!%p6162_p7), %s9094_s27 }
  0x42   : > { %1686 = vmatpush1.bf16.msra.mxu0 %v6884_v1  ;;  %v6891_v6 = vld [vmem:[%s9093_s7 + $0x134] ss:$8 sps:$4 sm:$0xff]   ;;  %v6893_v7 = vld [vmem:[%s9093_s7 + $0x130] ss:$8 sps:$4 sm:$0xff]   ;;  %v6894_v8 = vld [vmem:[%s9093_s7 + $0x144] ss:$8 sps:$4 sm:$0xff]  }
  0x43   : > { %1687 = vmatprep.subr.bf16.mxu0 %v6885_v2  ;;  %v6896_v9 = vld [vmem:[%s9093_s7 + $0x140] ss:$8 sps:$4 sm:$0xff]   ;;  %v6897_v10 = vld [vmem:[%s9093_s7 + $0x154] ss:$8 sps:$4 sm:$0xff]   ;;  %v6899_v11 = vld [vmem:[%s9093_s7 + $0x150] ss:$8 sps:$4 sm:$0xff]  }
  0x44   : > { %v6900_v12 = vld [vmem:[%s9093_s7 + $0x164] ss:$8 sps:$4 sm:$0xff]   ;;  %v6929_v14 = vld [vmem:[%s9093_s7] ss:$8 sps:$4 sm:$0xff]   ;;  %v6933_v16 = vld [vmem:[%s9093_s7 + $0x14] ss:$8 sps:$4 sm:$0xff]  }
  0x45   : > { %v6927_v13 = vld [vmem:[%s9093_s7 + $0x4] ss:$8 sps:$4 sm:$0xff]   ;;  %v6902_v15 = vld [vmem:[%s9093_s7 + $0x160] ss:$8 sps:$4 sm:$0xff]   ;;  %v6935_v17 = vld [vmem:[%s9093_s7 + $0x10] ss:$8 sps:$4 sm:$0xff]  }
  0x46   : > { %1688 = vmatpush1.bf16.msra.mxu0 %v6887_v3  ;;  %1642 = vmatprep.subr.bf16.mxu1 %v6927_v13  ;;  %v6903_v18 = vld [vmem:[%s9093_s7 + $0x174] ss:$8 sps:$4 sm:$0xff]   ;;  %v6905_v20 = vld [vmem:[%s9093_s7 + $0x170] ss:$8 sps:$4 sm:$0xff]   ;;  %v6942_v21 = vld [vmem:[%s9093_s7 + $0x24] ss:$8 sps:$4 sm:$0xff]  }
  0x47   : > { %1689 = vmatprep.subr.bf16.mxu0 %v6888_v4  ;;  %1643 = vmatpush1.bf16.msra.mxu1 %v6929_v14  ;;  %v6944_v22 = vld [vmem:[%s9093_s7 + $0x20] ss:$8 sps:$4 sm:$0xff]   ;;  %v6906_v23 = vld [vmem:[%s9093_s7 + $0x184] ss:$8 sps:$4 sm:$0xff]   ;;  %v6948_v25 = vld [vmem:[%s9093_s7 + $0x34] ss:$8 sps:$4 sm:$0xff]  }
  0x48   : > { %1644 = vmatprep.subr.bf16.mxu1 %v6933_v16  ;;  %v6908_v24 = vld [vmem:[%s9093_s7 + $0x180] ss:$8 sps:$4 sm:$0xff]   ;;  %v6909_v26 = vld [vmem:[%s9093_s7 + $0x194] ss:$8 sps:$4 sm:$0xff]   ;;  %v6950_v27 = vld [vmem:[%s9093_s7 + $0x30] ss:$8 sps:$4 sm:$0xff]  }
  0x49   : > { %v6954_v28 = vld [vmem:[%s9093_s7 + $0x44] ss:$8 sps:$4 sm:$0xff]   ;;  %v6911_v29 = vld [vmem:[%s9093_s7 + $0x190] ss:$8 sps:$4 sm:$0xff]   ;;  %v6956_v31 = vld [vmem:[%s9093_s7 + $0x40] ss:$8 sps:$4 sm:$0xff]  }
  0x4a   : > { %1690 = vmatpush1.bf16.msra.mxu0 %v6890_v5  ;;  %v6912_v30 = vld [vmem:[%s9093_s7 + $0x1a4] ss:$8 sps:$4 sm:$0xff]   ;;  %v6960_v32 = vld [vmem:[%s9093_s7 + $0x54] ss:$8 sps:$4 sm:$0xff]   ;;  %v6914_v33 = vld [vmem:[%s9093_s7 + $0x1a0] ss:$8 sps:$4 sm:$0xff]  }
  0x4b   : > { %1691 = vmatprep.subr.bf16.mxu0 %v6891_v6  ;;  %1645 = vmatpush1.bf16.msra.mxu1 %v6935_v17  ;;  %v6915_v34 = vld [vmem:[%s9093_s7 + $0x1b4] ss:$8 sps:$4 sm:$0xff]   ;;  %v6962_v35 = vld [vmem:[%s9093_s7 + $0x50] ss:$8 sps:$4 sm:$0xff]   ;;  %v6966_v36 = vld [vmem:[%s9093_s7 + $0x64] ss:$8 sps:$4 sm:$0xff]  }
  0x4c   : > { %1646 = vmatprep.subr.bf16.mxu1 %v6942_v21  ;;  %v6917_v37 = vld [vmem:[%s9093_s7 + $0x1b0] ss:$8 sps:$4 sm:$0xff]   ;;  %v6918_v38 = vld [vmem:[%s9093_s7 + $0x1c4] ss:$8 sps:$4 sm:$0xff]   ;;  %v6968_v39 = vld [vmem:[%s9093_s7 + $0x60] ss:$8 sps:$4 sm:$0xff]  }
  0x4d   : > { %v6972_v40 = vld [vmem:[%s9093_s7 + $0x74] ss:$8 sps:$4 sm:$0xff]   ;;  %v6920_v41 = vld [vmem:[%s9093_s7 + $0x1c0] ss:$8 sps:$4 sm:$0xff]   ;;  %v6974_v43 = vld [vmem:[%s9093_s7 + $0x70] ss:$8 sps:$4 sm:$0xff]  }
  0x4e   : > { %1692 = vmatpush1.bf16.msra.mxu0 %v6893_v7  ;;  %v6921_v42 = vld [vmem:[%s9093_s7 + $0x1d4] ss:$8 sps:$4 sm:$0xff]   ;;  %v6978_v44 = vld [vmem:[%s9093_s7 + $0x84] ss:$8 sps:$4 sm:$0xff]   ;;  %v6923_v45 = vld [vmem:[%s9093_s7 + $0x1d0] ss:$8 sps:$4 sm:$0xff]  }
  0x4f   : > { %1693 = vmatprep.subr.bf16.mxu0 %v6894_v8  ;;  %1647 = vmatpush1.bf16.msra.mxu1 %v6944_v22  ;;  %v6924_v46 = vld [vmem:[%s9093_s7 + $0x1e4] ss:$8 sps:$4 sm:$0xff]   ;;  %v6980_v47 = vld [vmem:[%s9093_s7 + $0x80] ss:$8 sps:$4 sm:$0xff]   ;;  %v6984_v48 = vld [vmem:[%s9093_s7 + $0x94] ss:$8 sps:$4 sm:$0xff]  }
  0x50   : > { %1648 = vmatprep.subr.bf16.mxu1 %v6948_v25  ;;  %v6926_v49 = vld [vmem:[%s9093_s7 + $0x1e0] ss:$8 sps:$4 sm:$0xff]   ;;  %v6930_v50 = vld [vmem:[%s9093_s7 + $0x1f4] ss:$8 sps:$4 sm:$0xff]   ;;  %v6986_v51 = vld [vmem:[%s9093_s7 + $0x90] ss:$8 sps:$4 sm:$0xff]  }
  0x51   : > { %v6990_v52 = vld [vmem:[%s9093_s7 + $0xa4] ss:$8 sps:$4 sm:$0xff]   ;;  %v6932_v53 = vld [vmem:[%s9093_s7 + $0x1f0] ss:$8 sps:$4 sm:$0xff]   ;;  %v6992_v55 = vld [vmem:[%s9093_s7 + $0xa0] ss:$8 sps:$4 sm:$0xff]  }
  0x52   : > { %1694 = vmatpush1.bf16.msra.mxu0 %v6896_v9  ;;  %v6941_v54 = vld [vmem:[%s9093_s7 + $0x204] ss:$8 sps:$4 sm:$0xff]   ;;  %v6996_v56 = vld [vmem:[%s9093_s7 + $0xb4] ss:$8 sps:$4 sm:$0xff]   ;;  %v6939_v58 = vld [vmem:[%s9093_s7 + $0x200] ss:$8 sps:$4 sm:$0xff]  }
  0x53   : > { %1695 = vmatprep.subr.bf16.mxu0 %v6897_v10  ;;  %1649 = vmatpush1.bf16.msra.mxu1 %v6950_v27  ;;  %v6947_v59 = vld [vmem:[%s9093_s7 + $0x214] ss:$8 sps:$4 sm:$0xff]   ;;  %v6998_v60 = vld [vmem:[%s9093_s7 + $0xb0] ss:$8 sps:$4 sm:$0xff]   ;;  %v7002_v61 = vld [vmem:[%s9093_s7 + $0xc4] ss:$8 sps:$4 sm:$0xff]  }
  0x54   : > { %1650 = vmatprep.subr.bf16.mxu1 %v6954_v28  ;;  %v6945_v63 = vld [vmem:[%s9093_s7 + $0x210] ss:$8 sps:$4 sm:$0xff]   ;;  %v7004_v0 = vld [vmem:[%s9093_s7 + $0xc0] ss:$8 sps:$4 sm:$0xff]   ;;  %v7034_v1 = vld [vmem:[%s7803_s6 + $0x14] ss:$24 sps:$4 sm:$0xff]  }
  0x55   : > { %v6953_v2 = vld [vmem:[%s9093_s7 + $0x224] ss:$8 sps:$4 sm:$0xff]   ;;  %v7008_v3 = vld [vmem:[%s9093_s7 + $0xd4] ss:$8 sps:$4 sm:$0xff]   ;;  %v6951_v4 = vld [vmem:[%s9093_s7 + $0x220] ss:$8 sps:$4 sm:$0xff]  }
  0x56   : > { %1696 = vmatpush1.bf16.msra.mxu0 %v6899_v11  ;;  %v7010_v5 = vld [vmem:[%s9093_s7 + $0xd0] ss:$8 sps:$4 sm:$0xff]   ;;  %v6959_v6 = vld [vmem:[%s9093_s7 + $0x234] ss:$8 sps:$4 sm:$0xff]   ;;  %v7014_v7 = vld [vmem:[%s9093_s7 + $0xe4] ss:$8 sps:$4 sm:$0xff]  }
  0x57   : > { %1697 = vmatprep.subr.bf16.mxu0 %v6900_v12  ;;  %1651 = vmatpush1.bf16.msra.mxu1 %v6956_v31  ;;  %v6957_v8 = vld [vmem:[%s9093_s7 + $0x230] ss:$8 sps:$4 sm:$0xff]   ;;  %v7016_v9 = vld [vmem:[%s9093_s7 + $0xe0] ss:$8 sps:$4 sm:$0xff]   ;;  %v6965_v10 = vld [vmem:[%s9093_s7 + $0x244] ss:$8 sps:$4 sm:$0xff]  }
  0x58   : > { %1652 = vmatprep.subr.bf16.mxu1 %v6960_v32  ;;  %v7020_v11 = vld [vmem:[%s9093_s7 + $0xf4] ss:$8 sps:$4 sm:$0xff]   ;;  %v6963_v12 = vld [vmem:[%s9093_s7 + $0x240] ss:$8 sps:$4 sm:$0xff]   ;;  %v7022_v13 = vld [vmem:[%s9093_s7 + $0xf0] ss:$8 sps:$4 sm:$0xff]  }
  0x59   : > { %v6971_v14 = vld [vmem:[%s9093_s7 + $0x254] ss:$8 sps:$4 sm:$0xff]   ;;  %v6969_v16 = vld [vmem:[%s9093_s7 + $0x250] ss:$8 sps:$4 sm:$0xff]   ;;  %v6977_v17 = vld [vmem:[%s9093_s7 + $0x264] ss:$8 sps:$4 sm:$0xff]  }
  0x5a   : > { %1698 = vmatpush1.bf16.msra.mxu0 %v6902_v15  ;;  %v7026_v15 = vld [vmem:[%s7803_s6] ss:$24 sps:$4 sm:$0xff]   ;;  %v6983_v19 = vld [vmem:[%s9093_s7 + $0x274] ss:$8 sps:$4 sm:$0xff]   ;;  %v6989_v21 = vld [vmem:[%s9093_s7 + $0x284] ss:$8 sps:$4 sm:$0xff]  }
  0x5b   : > { %1699 = vmatprep.subr.bf16.mxu0 %v6903_v18  ;;  %1653 = vmatpush1.bf16.msra.mxu1 %v6962_v35  ;;  %v6975_v18 = vld [vmem:[%s9093_s7 + $0x260] ss:$8 sps:$4 sm:$0xff]   ;;  %v7001_v25 = vld [vmem:[%s9093_s7 + $0x2a4] ss:$8 sps:$4 sm:$0xff]   ;;  %v7007_v27 = vld [vmem:[%s9093_s7 + $0x2b4] ss:$8 sps:$4 sm:$0xff]  }
  0x5c   : > { %1654 = vmatprep.subr.bf16.mxu1 %v6966_v36  ;;  %v6987_v22 = vld [vmem:[%s9093_s7 + $0x280] ss:$8 sps:$4 sm:$0xff]   ;;  %v7005_v28 = vld [vmem:[%s9093_s7 + $0x2b0] ss:$8 sps:$4 sm:$0xff]   ;;  %v7019_v31 = vld [vmem:[%s9093_s7 + $0x2d4] ss:$8 sps:$4 sm:$0xff]  }
  0x5d   : > { %v7017_v32 = vld [vmem:[%s9093_s7 + $0x2d0] ss:$8 sps:$4 sm:$0xff]   ;;  %v7031_v35 = vld [vmem:[%s9093_s7 + $0x2f4] ss:$8 sps:$4 sm:$0xff]  }
  0x5e   : > { %1700 = vmatpush1.bf16.msra.mxu0 %v6905_v20  ;;  %v6981_v20 = vld [vmem:[%s9093_s7 + $0x270] ss:$8 sps:$4 sm:$0xff]  }
  0x5f   : > { %1701 = vmatprep.subr.bf16.mxu0 %v6906_v23  ;;  %1655 = vmatpush1.bf16.msra.mxu1 %v6968_v39  ;;  %v6995_v23 = vld [vmem:[%s9093_s7 + $0x294] ss:$8 sps:$4 sm:$0xff]   ;;  %v7029_v36 = vld [vmem:[%s9093_s7 + $0x2f0] ss:$8 sps:$4 sm:$0xff]  }
  0x60   : > { %1656 = vmatprep.subr.bf16.mxu1 %v6972_v40 }
  0x62   : > { %1702 = vmatpush1.bf16.msra.mxu0 %v6908_v24  ;;  %v6993_v24 = vld [vmem:[%s9093_s7 + $0x290] ss:$8 sps:$4 sm:$0xff]  }
  0x63   : > { %1703 = vmatprep.subr.bf16.mxu0 %v6909_v26  ;;  %1657 = vmatpush1.bf16.msra.mxu1 %v6974_v43  ;;  %v6999_v26 = vld [vmem:[%s9093_s7 + $0x2a0] ss:$8 sps:$4 sm:$0xff]  }
  0x64   : > { %1658 = vmatprep.subr.bf16.mxu1 %v6978_v44  ;;  %v1129_v43 = vld [vmem:[%s9095_s20 + $0x8] sm:$0xff] }
  0x66   : > { %1704 = vmatpush1.bf16.msra.mxu0 %v6911_v29  ;;  %v7013_v29 = vld [vmem:[%s9093_s7 + $0x2c4] ss:$8 sps:$4 sm:$0xff]  }
  0x67   : > { %1705 = vmatprep.subr.bf16.mxu0 %v6912_v30  ;;  %1659 = vmatpush1.bf16.msra.mxu1 %v6980_v47  ;;  %v7011_v30 = vld [vmem:[%s9093_s7 + $0x2c0] ss:$8 sps:$4 sm:$0xff]   ;;  %v1131_v47 = vld [vmem:[%s9095_s20 + $0x18] sm:$0xff] }
  0x68   : > { %1660 = vmatprep.subr.bf16.mxu1 %v6984_v48 }
  0x6a   : > { %1706 = vmatpush1.bf16.msra.mxu0 %v6914_v33  ;;  %v7025_v33 = vld [vmem:[%s9093_s7 + $0x2e4] ss:$8 sps:$4 sm:$0xff]  }
  0x6b   : > { %1707 = vmatprep.subr.bf16.mxu0 %v6915_v34  ;;  %1661 = vmatpush1.bf16.msra.mxu1 %v6986_v51  ;;  %v7023_v34 = vld [vmem:[%s9093_s7 + $0x2e0] ss:$8 sps:$4 sm:$0xff]  }
  0x6c   : > { %1662 = vmatprep.subr.bf16.mxu1 %v6990_v52 }
  0x6e   : > { %1708 = vmatpush1.bf16.msra.mxu0 %v6917_v37  ;;  %v7032_v37 = vld [vmem:[%s7803_s6 + $0x10] ss:$24 sps:$4 sm:$0xff]  }
  0x6f   : > { %1709 = vmatprep.subr.bf16.mxu0 %v6918_v38  ;;  %1663 = vmatpush1.bf16.msra.mxu1 %v6992_v55 }
  0x70   : > { %1664 = vmatprep.subr.bf16.mxu1 %v6996_v56 }
  0x72   : > { %1710 = vmatpush1.bf16.msra.mxu0 %v6920_v41 }
  0x73   : > { %1711 = vmatprep.subr.bf16.mxu0 %v6921_v42  ;;  %1665 = vmatpush1.bf16.msra.mxu1 %v6998_v60  ;;  %v1128_v42 = vld [vmem:[%s9094_s27] sm:$0xff] }
  0x74   : > { %1666 = vmatprep.subr.bf16.mxu1 %v7002_v61 }
  0x76   : > { %1712 = vmatpush1.bf16.msra.mxu0 %v6923_v45 }
  0x77   : > { %1713 = vmatprep.subr.bf16.mxu0 %v6924_v46  ;;  %1667 = vmatpush1.bf16.msra.mxu1 %v7004_v0  ;;  %v1130_v46 = vld [vmem:[%s9095_s20 + $0x10] sm:$0xff] }
  0x78   : > { %1668 = vmatprep.subr.bf16.mxu1 %v7008_v3 }
  0x7a   : > { %1714 = vmatpush1.bf16.msra.mxu0 %v6926_v49 }
  0x7b   : > { %1715 = vmatprep.subr.bf16.mxu0 %v6930_v50  ;;  %1669 = vmatpush1.bf16.msra.mxu1 %v7010_v5 }
  0x7c   : > { %1670 = vmatprep.subr.bf16.mxu1 %v7014_v7 }
  0x7e   : > { %1716 = vmatpush1.bf16.msra.mxu0 %v6932_v53 }
  0x7f   : > { %1728 = vmatprep.subr.bf16.mxu0 %v6941_v54  ;;  %1671 = vmatpush1.bf16.msra.mxu1 %v7016_v9 }
  0x80   : > { %1672 = vmatprep.subr.bf16.mxu1 %v7020_v11 }
  0x81   : > { %1718 = vmatmul.mubr.bf16.vlgmr.msra.gmra.mrb[0].mxu0 %v6936_v57 }
  0x82   : > { %1729 = vmatpush1.bf16.msra.mxu0 %v6939_v58  ;;  %1760 = vmatprep.mubr.bf16.mxu0 %v7034_v1 }
  0x83   : > { %1730 = vmatprep.subr.bf16.mxu0 %v6947_v59  ;;  %1673 = vmatpush1.bf16.msra.mxu1 %v7022_v13 }
  0x86   : > { %1731 = vmatpush1.bf16.msra.mxu0 %v6945_v63  ;;  %1675 = vmatmul.mubr.bf16.vlgmr.msra.gmra.mrb[0].mxu1 %v7026_v15 }
  0x87   : > { %1732 = vmatprep.subr.bf16.mxu0 %v6953_v2 }
  0x8a   : > { %1733 = vmatpush1.bf16.msra.mxu0 %v6951_v4 }
  0x8b   : > { %1734 = vmatprep.subr.bf16.mxu0 %v6959_v6 }
  0x8e   : > { %1735 = vmatpush1.bf16.msra.mxu0 %v6957_v8 }
  0x8f   : > { %1736 = vmatprep.subr.bf16.mxu0 %v6965_v10 }
  0x92   : > { %1737 = vmatpush1.bf16.msra.mxu0 %v6963_v12  ;;  %v1807_v12 = vlaneseq }
  0x93   : > { %1738 = vmatprep.subr.bf16.mxu0 %v6971_v14 }
  0x96   : > { %1739 = vmatpush1.bf16.msra.mxu0 %v6969_v16  ;;  %v1808_v16 = vshrl.u32 %v1807_v12, 7 }
  0x97   : > { %1740 = vmatprep.subr.bf16.mxu0 %v6977_v17 }
  0x9a   : > { %1741 = vmatpush1.bf16.msra.mxu0 %v6975_v18  ;;  %v1809_v18 = vsub.s32 0, %v1808_v16 }
  0x9b   : > { %1742 = vmatprep.subr.bf16.mxu0 %v6983_v19  ;;  %v1813_v19 = vsub.s32 1, %v1808_v16 }
  0x9e   : > { %1743 = vmatpush1.bf16.msra.mxu0 %v6981_v20  ;;  %v1771_v20 = vld [vmem:[%s9096_s11] sm:$0x3] }
  0x9f   : > { %1744 = vmatprep.subr.bf16.mxu0 %v6989_v21  ;;  %v1772_v21 = vld [vmem:[%s9097_s22] sm:$0x3] }
  0xa2   : > { %1745 = vmatpush1.bf16.msra.mxu0 %v6987_v22  ;;  %v1810_v22 = vrot.slane %v1771_v20, %v1809_v18 }
  0xa3   : > { %1746 = vmatprep.subr.bf16.mxu0 %v6995_v23  ;;  %v1814_v23 = vrot.slane %v1771_v20, %v1813_v19 }
  0xa6   : > { %1747 = vmatpush1.bf16.msra.mxu0 %v6993_v24 }
  0xa7   : > { %1748 = vmatprep.subr.bf16.mxu0 %v7001_v25  ;;  %v1825_v25 = vrot.slane %v1772_v21, %v1809_v18 }
  0xaa   : > { %1749 = vmatpush1.bf16.msra.mxu0 %v6999_v26  ;;  %v1829_v26 = vrot.slane %v1772_v21, %v1813_v19 }
  0xab   : > { %1750 = vmatprep.subr.bf16.mxu0 %v7007_v27 }
  0xae   : > { %1751 = vmatpush1.bf16.msra.mxu0 %v7005_v28 }
  0xaf   : > { %1752 = vmatprep.subr.bf16.mxu0 %v7013_v29 }
  0xb2   : > { %1753 = vmatpush1.bf16.msra.mxu0 %v7011_v30 }
  0xb3   : > { %1754 = vmatprep.subr.bf16.mxu0 %v7019_v31 }
  0xb6   : > { %1755 = vmatpush1.bf16.msra.mxu0 %v7017_v32 }
  0xb7   : > { %1756 = vmatprep.subr.bf16.mxu0 %v7025_v33 }
  0xba   : > { %1757 = vmatpush1.bf16.msra.mxu0 %v7023_v34 }
  0xbb   : > { %1758 = vmatprep.subr.bf16.mxu0 %v7031_v35 }
  0xbe   : > { %1759 = vmatpush1.bf16.msra.mxu0 %v7029_v36 }
  0xc1   : > { %1761 = vmatmul.mubr.bf16.vlgmr.msra.gmra.mrb[0].mxu0 %v7032_v37 }
 0x159   : > { %v1676_v38 = vpop.f32.mrb[0].mxu1 }
 0x15a   : > { %v1678_v39 = vpop.f32.mrb[1].mxu1  ;;  %v1677_v44 = vadd.f32 %v1676_v38, %v1128_v42 }
 0x15b   : > { %v1680_v40 = vpop.f32.mrb[2].mxu1  ;;  %v1679_v45 = vadd.f32 %v1678_v39, %v1129_v43 }
 0x15c   : > { %v1682_v41 = vpop.f32.mrb[3].mxu1  ;;  %v1681_v49 = vadd.f32 %v1680_v40, %v1130_v46 }
 0x15d   : > { %v1683_v52 = vadd.f32 %v1682_v41, %v1131_v47 }
 0x194   : > { %v1762_v48 = vpop.f32.mrb[0].mxu0 }
 0x195   : > { %v6799_v50 = vadd.f32 %v1762_v48, %v1677_v44  ;;  %v1764_v51 = vpop.f32.mrb[1].mxu0 }
 0x196   : > { %v6801_v53 = vadd.f32 %v1764_v51, %v1679_v45  ;;  %v1766_v54 = vpop.f32.mrb[2].mxu0 }
 0x197   : > { %v6803_v55 = vadd.f32 %v1766_v54, %v1681_v49  ;;  %v1768_v56 = vpop.f32.mrb[3].mxu0 }
 0x198   : > { %v6805_v57 = vadd.f32 %v1768_v56, %v1683_v52  ;;  %v1773_v58 = vadd.f32 %v6801_v53, %v6799_v50 }
 0x19a   : > { %1774 = vadd.xlane.f32.xlu0 %v1773_v58  ;;  %v1776_v59 = vadd.f32 %v6805_v57, %v6803_v55 }
 0x19e   : > { %1777 = vadd.xlane.f32.xlu0 %v1776_v59 }
 0x227   : > { %v1775_v60 = vpop.xlane.xlu0 %1774 }
 0x228   : > { %v1780_v61 = vmul.f32 0.00390625, %v1775_v60 }
 0x22a   : > { %v1782_v62 = vsub.f32 %v6799_v50, %v1780_v61  ;;  %v1783_v63 = vsub.f32 %v6801_v53, %v1780_v61 }
 0x22b   : > { %v1778_v0 = vpop.xlane.xlu0 %1777 }
 0x22c   : > { %v1781_v1 = vmul.f32 0.00390625, %v1778_v0  ;;  %v1786_v2 = vmul.f32 %v1782_v62, %v1782_v62  ;;  %v1787_v3 = vmul.f32 %v1783_v63, %v1783_v63 }
 0x22e   : > { %v1784_v4 = vsub.f32 %v6803_v55, %v1781_v1  ;;  %v1785_v5 = vsub.f32 %v6805_v57, %v1781_v1  ;;  %v1790_v6 = vadd.f32 %v1787_v3, %v1786_v2 }
 0x230   : > { %1791 = vadd.xlane.f32.xlu1 %v1790_v6  ;;  %v1788_v7 = vmul.f32 %v1784_v4, %v1784_v4  ;;  %v1789_v8 = vmul.f32 %v1785_v5, %v1785_v5 }
 0x232   : > { %v1793_v9 = vadd.f32 %v1789_v8, %v1788_v7 }
 0x234   : > { %1794 = vadd.xlane.f32.xlu1 %v1793_v9 }
 0x2bd   : > { %v1792_v10 = vpop.xlane.xlu1 %1791 }
 0x2be   : > { %v1796_v11 = vmul.f32 0.00390625, %v1792_v10 }
 0x2c0   : > { %v1798_v13 = vadd.f32 1e-05, %v1796_v11 }
 0x2c1   : > { %v1795_v14 = vpop.xlane.xlu1 %1794 }
 0x2c2   : > { %7035 = vrsqrt.f32 %v1798_v13  ;;  %v1797_v15 = vmul.f32 0.00390625, %v1795_v14 }
 0x2c4   : > { %v1799_v17 = vadd.f32 1e-05, %v1797_v15 }
 0x2c6   : > { %7037 = vrsqrt.f32 %v1799_v17 }
 0x2cc   : > { %v7036_v24 = vpop.eup %7035 }
 0x2cd   : > { %v1802_v27 = vmul.f32 %v7036_v24, %v1782_v62  ;;  %v1803_v28 = vmul.f32 %v7036_v24, %v1783_v63 }
 0x2cf   : > { %v1817_v29 = vmul.f32 %v1810_v22, %v1802_v27  ;;  %v1818_v30 = vmul.f32 %v1814_v23, %v1803_v28 }
 0x2d0   : > { %v7038_v31 = vpop.eup %7037 }
 0x2d1   : > { %v1832_v32 = vadd.f32 %v1825_v25, %v1817_v29  ;;  %v1833_v33 = vadd.f32 %v1829_v26, %v1818_v30  ;;  %v1804_v34 = vmul.f32 %v7038_v31, %v1784_v4  ;;  %v1805_v35 = vmul.f32 %v7038_v31, %v1785_v5 }
 0x2d3   : > { %1836 = vst [vmem:[#allocation2] sm:$0xff] %v1832_v32  ;;  %1837 = vst [vmem:[#allocation2 + $0x8] sm:$0xff] %v1833_v33  ;;  %v1819_v36 = vmul.f32 %v1810_v22, %v1804_v34  ;;  %v1820_v37 = vmul.f32 %v1814_v23, %v1805_v35 }
 0x2d5   : > { %v1834_v38 = vadd.f32 %v1825_v25, %v1819_v36  ;;  %v1835_v39 = vadd.f32 %v1829_v26, %v1820_v37 }
 0x2d7   : > { %1838 = vst [vmem:[#allocation2 + $0x10] sm:$0xff] %v1834_v38  ;;  %1839 = vst [vmem:[#allocation2 + $0x18] sm:$0xff] %v1835_v39 }
 0x2d8 PF: > { %v7039_v46 = vld [vmem:[%s7808_s24 + $0x4] ss:$24 sps:$4 sm:$0xff]   ;;  %v7041_v47 = vld [vmem:[%s7808_s24] ss:$24 sps:$4 sm:$0xff]   ;;  %v7042_v48 = vld [vmem:[%s7808_s24 + $0x34] ss:$24 sps:$4 sm:$0xff]   ;;  %v1882_v32 = vlaneseq  ;;  %s9098_s1 = scalar_lea.vmem %s9028_s13, %s7820_s28  ;;  %s9099_s8 = scalar_lea.vmem %s9029_s14, %s7820_s28 }
 0x2d9   : > { %2523 = vmatprep.subr.bf16.mxu0 %v7039_v46  ;;  %v7044_v49 = vld [vmem:[%s7808_s24 + $0x30] ss:$24 sps:$4 sm:$0xff]   ;;  %v7045_v50 = vld [vmem:[%s7808_s24 + $0x64] ss:$24 sps:$4 sm:$0xff]   ;;  %v7047_v51 = vld [vmem:[%s7808_s24 + $0x60] ss:$24 sps:$4 sm:$0xff]  }
 0x2da   : > { %v1840_v42 = vld [vmem:[#allocation2] sm:$0xff]  ;;  %v1841_v44 = vld [vmem:[#allocation2 + $0x8] sm:$0xff]  ;;  %2524 = vmatpush1.bf16.msra.mxu0 %v7041_v47  ;;  %v8221_v36 = vshrl.u32 %v1882_v32, 7  ;;  %vm7632_vm0 = vmmov 0   ;;  %vm3003_vm1 = vcmask 1043456   ;;  %vm2976_vm2 = vcmask 64512  }
 0x2db   : > { %v1848_v45 = vadd.f32 %v1841_v44, %v1840_v42  ;;  %2525 = vmatprep.subr.bf16.mxu0 %v7042_v48  ;;  %v7048_v52 = vld [vmem:[%s7808_s24 + $0x94] ss:$24 sps:$4 sm:$0xff]   ;;  %v7050_v53 = vld [vmem:[%s7808_s24 + $0x90] ss:$24 sps:$4 sm:$0xff]   ;;  %v7051_v54 = vld [vmem:[%s7808_s24 + $0xc4] ss:$24 sps:$4 sm:$0xff]  }
 0x2dc   : > { %v7053_v55 = vld [vmem:[%s7808_s24 + $0xc0] ss:$24 sps:$4 sm:$0xff]   ;;  %v7054_v56 = vld [vmem:[%s7808_s24 + $0xf4] ss:$24 sps:$4 sm:$0xff]   ;;  %v7056_v57 = vld [vmem:[%s7808_s24 + $0xf0] ss:$24 sps:$4 sm:$0xff]  }
 0x2dd   : > { %1849 = vadd.xlane.f32.xlu1 %v1848_v45  ;;  %v7057_v58 = vld [vmem:[%s7808_s24 + $0x124] ss:$24 sps:$4 sm:$0xff]   ;;  %v7059_v59 = vld [vmem:[%s7808_s24 + $0x120] ss:$24 sps:$4 sm:$0xff]   ;;  %v7060_v60 = vld [vmem:[%s7808_s24 + $0x154] ss:$24 sps:$4 sm:$0xff]  }
 0x2de   : > { %v1842_v40 = vld [vmem:[#allocation2 + $0x10] sm:$0xff]  ;;  %v1843_v41 = vld [vmem:[#allocation2 + $0x18] sm:$0xff]  ;;  %2526 = vmatpush1.bf16.msra.mxu0 %v7044_v49  ;;  %v7089_v28 = vld [vmem:[%s7808_s24 + $0xc] ss:$24 sps:$4 sm:$0xff]   ;;  %v8224_v37 = vsub.s32 1, %v8221_v36  ;;  %v8227_v38 = vsub.s32 0, %v8221_v36 }
 0x2df   : > { %v1851_v43 = vadd.f32 %v1843_v41, %v1842_v40  ;;  %2527 = vmatprep.subr.bf16.mxu0 %v7045_v50  ;;  %v7062_v61 = vld [vmem:[%s7808_s24 + $0x150] ss:$24 sps:$4 sm:$0xff]   ;;  %v7063_v62 = vld [vmem:[%s7808_s24 + $0x184] ss:$24 sps:$4 sm:$0xff]   ;;  %v7065_v63 = vld [vmem:[%s7808_s24 + $0x180] ss:$24 sps:$4 sm:$0xff]  }
 0x2e0   : > { %v7066_v0 = vld [vmem:[%s7808_s24 + $0x1b4] ss:$24 sps:$4 sm:$0xff]   ;;  %v7068_v1 = vld [vmem:[%s7808_s24 + $0x1b0] ss:$24 sps:$4 sm:$0xff]   ;;  %v7069_v2 = vld [vmem:[%s7808_s24 + $0x1e4] ss:$24 sps:$4 sm:$0xff]  }
 0x2e1   : > { %1852 = vadd.xlane.f32.xlu0 %v1851_v43  ;;  %v7071_v17 = vld [vmem:[%s7808_s24 + $0x1e0] ss:$24 sps:$4 sm:$0xff]   ;;  %v7072_v18 = vld [vmem:[%s7808_s24 + $0x214] ss:$24 sps:$4 sm:$0xff]   ;;  %v7074_v19 = vld [vmem:[%s7808_s24 + $0x210] ss:$24 sps:$4 sm:$0xff]  }
 0x2e2   : > { %2528 = vmatpush1.bf16.msra.mxu0 %v7047_v51  ;;  %v7075_v20 = vld [vmem:[%s7808_s24 + $0x244] ss:$24 sps:$4 sm:$0xff]   ;;  %v7077_v21 = vld [vmem:[%s7808_s24 + $0x240] ss:$24 sps:$4 sm:$0xff]   ;;  %v7078_v22 = vld [vmem:[%s7808_s24 + $0x274] ss:$24 sps:$4 sm:$0xff]  }
 0x2e3   : > { %2529 = vmatprep.subr.bf16.mxu0 %v7048_v52  ;;  %v7080_v23 = vld [vmem:[%s7808_s24 + $0x270] ss:$24 sps:$4 sm:$0xff]   ;;  %v7081_v24 = vld [vmem:[%s7808_s24 + $0x2a4] ss:$24 sps:$4 sm:$0xff]   ;;  %v7083_v25 = vld [vmem:[%s7808_s24 + $0x2a0] ss:$24 sps:$4 sm:$0xff]  }
 0x2e4   : > { %v7084_v26 = vld [vmem:[%s7808_s24 + $0x2d4] ss:$24 sps:$4 sm:$0xff]   ;;  %v7086_v27 = vld [vmem:[%s7808_s24 + $0x2d0] ss:$24 sps:$4 sm:$0xff]   ;;  %v1846_v39 = vld [vmem:[%s9098_s1] sm:$0x3] }
 0x2e5   : > { %v7143_v32 = vld [vmem:[%s7808_s24 + $0x74] ss:$24 sps:$4 sm:$0xff]   ;;  %s9101_s15 = sld [smem:[#allocation10_spill]]  ;;  %s9102_s6 = sld [smem:[#allocation22_spill]] }
 0x2e6   : > { %2530 = vmatpush1.bf16.msra.mxu0 %v7050_v53  ;;  %s9104_s11 = sld [smem:[#allocation23_spill]]  ;;  %s9106_s23 = sld [smem:[#allocation24_spill]] }
 0x2e7   : > { %2531 = vmatprep.subr.bf16.mxu0 %v7051_v54 }
 0x2ea   : > { %2532 = vmatpush1.bf16.msra.mxu0 %v7053_v55 }
 0x2eb   : > { %2533 = vmatprep.subr.bf16.mxu0 %v7054_v56  ;;  %s9103_s26 = scalar_lea.vmem %s9102_s6, %s7820_s28 }
 0x2ec   : > { %s9105_s19 = scalar_lea.vmem %s9104_s11, %s7820_s28  ;;  %s9107_s21 = scalar_lea.vmem %s9106_s23, %s7820_s28 }
 0x2ee   : > { %2534 = vmatpush1.bf16.msra.mxu0 %v7056_v57 }
 0x2ef   : > { %2535 = vmatprep.subr.bf16.mxu0 %v7057_v58 }
 0x2f2   : > { %2536 = vmatpush1.bf16.msra.mxu0 %v7059_v59 }
 0x2f3   : > { %2537 = vmatprep.subr.bf16.mxu0 %v7060_v60  ;;  %v7087_v60 = vld [vmem:[%s7808_s24 + $0x8] ss:$24 sps:$4 sm:$0xff]  }
 0x2f6   : > { %2538 = vmatpush1.bf16.msra.mxu0 %v7062_v61 }
 0x2f7   : > { %2539 = vmatprep.subr.bf16.mxu0 %v7063_v62  ;;  %v7092_v62 = vld [vmem:[%s7808_s24 + $0x3c] ss:$24 sps:$4 sm:$0xff]  }
 0x2fa   : > { %2540 = vmatpush1.bf16.msra.mxu0 %v7065_v63  ;;  %v7090_v63 = vld [vmem:[%s7808_s24 + $0x38] ss:$24 sps:$4 sm:$0xff]  }
 0x2fb   : > { %2541 = vmatprep.subr.bf16.mxu0 %v7066_v0  ;;  %v7095_v0 = vld [vmem:[%s7808_s24 + $0x6c] ss:$24 sps:$4 sm:$0xff]  }
 0x2fe   : > { %2542 = vmatpush1.bf16.msra.mxu0 %v7068_v1  ;;  %v7093_v1 = vld [vmem:[%s7808_s24 + $0x68] ss:$24 sps:$4 sm:$0xff]  }
 0x2ff   : > { %2543 = vmatprep.subr.bf16.mxu0 %v7069_v2  ;;  %v7098_v2 = vld [vmem:[%s7808_s24 + $0x9c] ss:$24 sps:$4 sm:$0xff]  }
 0x302   : > { %2544 = vmatpush1.bf16.msra.mxu0 %v7071_v17  ;;  %v7117_v17 = vld [vmem:[%s7808_s24 + $0x1e8] ss:$24 sps:$4 sm:$0xff]  }
 0x303   : > { %2545 = vmatprep.subr.bf16.mxu0 %v7072_v18  ;;  %v7122_v18 = vld [vmem:[%s7808_s24 + $0x21c] ss:$24 sps:$4 sm:$0xff]  }
 0x306   : > { %2546 = vmatpush1.bf16.msra.mxu0 %v7074_v19  ;;  %v7120_v19 = vld [vmem:[%s7808_s24 + $0x218] ss:$24 sps:$4 sm:$0xff]  }
 0x307   : > { %2547 = vmatprep.subr.bf16.mxu0 %v7075_v20  ;;  %v7125_v20 = vld [vmem:[%s7808_s24 + $0x24c] ss:$24 sps:$4 sm:$0xff]  }
 0x30a   : > { %2548 = vmatpush1.bf16.msra.mxu0 %v7077_v21  ;;  %v7123_v21 = vld [vmem:[%s7808_s24 + $0x248] ss:$24 sps:$4 sm:$0xff]  }
 0x30b   : > { %2549 = vmatprep.subr.bf16.mxu0 %v7078_v22  ;;  %v7128_v22 = vld [vmem:[%s7808_s24 + $0x27c] ss:$24 sps:$4 sm:$0xff]  }
 0x30e   : > { %2550 = vmatpush1.bf16.msra.mxu0 %v7080_v23  ;;  %v7126_v23 = vld [vmem:[%s7808_s24 + $0x278] ss:$24 sps:$4 sm:$0xff]  }
 0x30f   : > { %2551 = vmatprep.subr.bf16.mxu0 %v7081_v24  ;;  %v7131_v24 = vld [vmem:[%s7808_s24 + $0x2ac] ss:$24 sps:$4 sm:$0xff]  }
 0x312   : > { %2552 = vmatpush1.bf16.msra.mxu0 %v7083_v25  ;;  %v7129_v25 = vld [vmem:[%s7808_s24 + $0x2a8] ss:$24 sps:$4 sm:$0xff]  }
 0x313   : > { %2553 = vmatprep.subr.bf16.mxu0 %v7084_v26  ;;  %v7134_v26 = vld [vmem:[%s7808_s24 + $0x2dc] ss:$24 sps:$4 sm:$0xff]  }
 0x316   : > { %2554 = vmatpush1.bf16.msra.mxu0 %v7086_v27  ;;  %v7132_v27 = vld [vmem:[%s7808_s24 + $0x2d8] ss:$24 sps:$4 sm:$0xff]  }
 0x317   : > { %2564 = vmatprep.subr.bf16.mxu0 %v7089_v28  ;;  %v7137_v28 = vld [vmem:[%s7808_s24 + $0x14] ss:$24 sps:$4 sm:$0xff]  }
 0x36a   : > { %v1850_v5 = vpop.xlane.xlu1 %1849 }
 0x36b   : > { %v1855_v6 = vmul.f32 0.00390625, %v1850_v5  ;;  %v7099_v5 = vld [vmem:[%s7808_s24 + $0xc8] ss:$24 sps:$4 sm:$0xff]  }
 0x36d   : > { %v1857_v9 = vsub.f32 %v1840_v42, %v1855_v6  ;;  %v1858_v10 = vsub.f32 %v1841_v44, %v1855_v6  ;;  %v1885_v42 = vrot.slane %v1846_v39, %v8227_v38  ;;  %v7104_v6 = vld [vmem:[%s7808_s24 + $0xfc] ss:$24 sps:$4 sm:$0xff]  }
 0x36e   : > { %v1853_v3 = vpop.xlane.xlu0 %1852 }
 0x36f   : > { %v1856_v4 = vmul.f32 0.00390625, %v1853_v3  ;;  %v1861_v13 = vmul.f32 %v1857_v9, %v1857_v9  ;;  %v1862_v14 = vmul.f32 %v1858_v10, %v1858_v10  ;;  %v7096_v3 = vld [vmem:[%s7808_s24 + $0x98] ss:$24 sps:$4 sm:$0xff]  }
 0x371   : > { %v1859_v7 = vsub.f32 %v1842_v40, %v1856_v4  ;;  %v1860_v8 = vsub.f32 %v1843_v41, %v1856_v4  ;;  %v1865_v16 = vadd.f32 %v1862_v14, %v1861_v13  ;;  %v1847_v40 = vld [vmem:[%s9099_s8] sm:$0x3]  ;;  %v1889_v41 = vrot.slane %v1846_v39, %v8224_v37  ;;  %v7101_v4 = vld [vmem:[%s7808_s24 + $0xcc] ss:$24 sps:$4 sm:$0xff]   ;;  %v7116_v14 = vld [vmem:[%s7808_s24 + $0x1bc] ss:$24 sps:$4 sm:$0xff]  }
 0x372   : > { %v1904_v46 = vrot.slane %v1847_v40, %v8224_v37  ;;  %v1900_v48 = vrot.slane %v1847_v40, %v8227_v38  ;;  %v7111_v13 = vld [vmem:[%s7808_s24 + $0x188] ss:$24 sps:$4 sm:$0xff]   ;;  %v7149_v39 = vld [vmem:[%s7808_s24 + $0xd4] ss:$24 sps:$4 sm:$0xff]  }
 0x373   : > { %v1863_v11 = vmul.f32 %v1859_v7, %v1859_v7  ;;  %v1864_v12 = vmul.f32 %v1860_v8, %v1860_v8  ;;  %1866 = vadd.xlane.f32.xlu1 %v1865_v16  ;;  %v7119_v16 = vld [vmem:[%s7808_s24 + $0x1ec] ss:$24 sps:$4 sm:$0xff]   ;;  %v7147_v40 = vld [vmem:[%s7808_s24 + $0xd0] ss:$24 sps:$4 sm:$0xff]  }
 0x375   : > { %v1868_v15 = vadd.f32 %v1864_v12, %v1863_v11  ;;  %v7108_v11 = vld [vmem:[%s7808_s24 + $0x158] ss:$24 sps:$4 sm:$0xff]   ;;  %v7113_v12 = vld [vmem:[%s7808_s24 + $0x18c] ss:$24 sps:$4 sm:$0xff]  }
 0x377   : > { %1869 = vadd.xlane.f32.xlu0 %v1868_v15  ;;  %v7114_v15 = vld [vmem:[%s7808_s24 + $0x1b8] ss:$24 sps:$4 sm:$0xff]  }
 0x400   : > { %v1867_v31 = vpop.xlane.xlu1 %1866 }
 0x401   : > { %v1871_v33 = vmul.f32 0.00390625, %v1867_v31  ;;  %v7138_v31 = vld [vmem:[%s7808_s24 + $0x40] ss:$24 sps:$4 sm:$0xff]  }
 0x403   : > { %v1873_v35 = vadd.f32 1e-05, %v1871_v33  ;;  %v7141_v33 = vld [vmem:[%s7808_s24 + $0x70] ss:$24 sps:$4 sm:$0xff]  }
 0x404   : > { %v1870_v29 = vpop.xlane.xlu0 %1869 }
 0x405   : > { %v1872_v30 = vmul.f32 0.00390625, %v1870_v29  ;;  %v7135_v29 = vld [vmem:[%s7808_s24 + $0x10] ss:$24 sps:$4 sm:$0xff]  }
 0x407   : > { %v1874_v34 = vadd.f32 1e-05, %v1872_v30  ;;  %v7140_v30 = vld [vmem:[%s7808_s24 + $0x44] ss:$24 sps:$4 sm:$0xff]  }
 0x409   : > { %7471 = vrsqrt.f32 %v1874_v34  ;;  %v7146_v34 = vld [vmem:[%s7808_s24 + $0xa4] ss:$24 sps:$4 sm:$0xff]  }
 0x40a   : > { %7473 = vrsqrt.f32 %v1873_v35  ;;  %v7144_v35 = vld [vmem:[%s7808_s24 + $0xa0] ss:$24 sps:$4 sm:$0xff]  }
 0x413   : > { %v7472_v43 = vpop.eup %7471 }
 0x414   : > { %v7474_v44 = vpop.eup %7473  ;;  %v1880_v45 = vmul.f32 %v7472_v43, %v1860_v8  ;;  %v1879_v47 = vmul.f32 %v7472_v43, %v1859_v7  ;;  %v7102_v7 = vld [vmem:[%s7808_s24 + $0xf8] ss:$24 sps:$4 sm:$0xff]   ;;  %v7107_v8 = vld [vmem:[%s7808_s24 + $0x12c] ss:$24 sps:$4 sm:$0xff]  }
 0x415   : > { %v1878_v49 = vmul.f32 %v7474_v44, %v1858_v10  ;;  %v1877_v50 = vmul.f32 %v7474_v44, %v1857_v9  ;;  %v7105_v9 = vld [vmem:[%s7808_s24 + $0x128] ss:$24 sps:$4 sm:$0xff]   ;;  %v7110_v10 = vld [vmem:[%s7808_s24 + $0x15c] ss:$24 sps:$4 sm:$0xff]  }
 0x416   : > { %v1895_v51 = vmul.f32 %v1889_v41, %v1880_v45  ;;  %v1894_v52 = vmul.f32 %v1885_v42, %v1879_v47  ;;  %v7155_v43 = vld [vmem:[%s7808_s24 + $0x134] ss:$24 sps:$4 sm:$0xff]   ;;  %v7153_v44 = vld [vmem:[%s7808_s24 + $0x130] ss:$24 sps:$4 sm:$0xff]   ;;  %v7158_v45 = vld [vmem:[%s7808_s24 + $0x164] ss:$24 sps:$4 sm:$0xff]  }
 0x417   : > { %v1893_v53 = vmul.f32 %v1889_v41, %v1878_v49  ;;  %v1892_v54 = vmul.f32 %v1885_v42, %v1877_v50  ;;  %v7152_v41 = vld [vmem:[%s7808_s24 + $0x104] ss:$24 sps:$4 sm:$0xff]   ;;  %v7150_v42 = vld [vmem:[%s7808_s24 + $0x100] ss:$24 sps:$4 sm:$0xff]   ;;  %v7161_v47 = vld [vmem:[%s7808_s24 + $0x194] ss:$24 sps:$4 sm:$0xff]  }
 0x418   : > { %v1910_v55 = vadd.f32 %v1904_v46, %v1895_v51  ;;  %v1909_v56 = vadd.f32 %v1900_v48, %v1894_v52  ;;  %v7164_v49 = vld [vmem:[%s7808_s24 + $0x1c4] ss:$24 sps:$4 sm:$0xff]   ;;  %v7162_v50 = vld [vmem:[%s7808_s24 + $0x1c0] ss:$24 sps:$4 sm:$0xff]   ;;  %v7167_v51 = vld [vmem:[%s7808_s24 + $0x1f4] ss:$24 sps:$4 sm:$0xff]  }
 0x419   : > { %v8243_v57 = vadd.f32 %v1904_v46, %v1893_v53  ;;  %v8245_v58 = vadd.f32 %v1900_v48, %v1892_v54  ;;  %v7156_v46 = vld [vmem:[%s7808_s24 + $0x160] ss:$24 sps:$4 sm:$0xff]   ;;  %v7159_v48 = vld [vmem:[%s7808_s24 + $0x190] ss:$24 sps:$4 sm:$0xff]   ;;  %v7170_v53 = vld [vmem:[%s7808_s24 + $0x224] ss:$24 sps:$4 sm:$0xff]  }
 0x41a   : > { %v8247_v59 = vpack.c.bf16 %v1910_v55, %v1910_v55  ;;  %v8250_v61 = vpack.c.bf16 %v1909_v56, %v1909_v56  ;;  %v7165_v52 = vld [vmem:[%s7808_s24 + $0x1f0] ss:$24 sps:$4 sm:$0xff]   ;;  %v7168_v54 = vld [vmem:[%s7808_s24 + $0x220] ss:$24 sps:$4 sm:$0xff]   ;;  %v7173_v55 = vld [vmem:[%s7808_s24 + $0x254] ss:$24 sps:$4 sm:$0xff]  }
 0x41b   : > { %v7171_v56 = vld [vmem:[%s7808_s24 + $0x250] ss:$24 sps:$4 sm:$0xff]  }
 0x41c   : > { %2555 = vmatprep.mubr.bf16.mxu0 %v8247_v59 }
 0x41d   : > { %2556 = vmatmul.mubr.bf16.vlgmr.msra.gmra.mrb[0].mxu0 %v8250_v61 }
 0x41e   : > { %2565 = vmatpush1.bf16.msra.mxu0 %v7087_v60  ;;  %2596 = vmatprep.mubr.bf16.mxu0 %v8247_v59  ;;  %v7174_v60 = vld [vmem:[%s7808_s24 + $0x280] ss:$24 sps:$4 sm:$0xff]  }
 0x41f   : > { %2566 = vmatprep.subr.bf16.mxu0 %v7092_v62  ;;  %v7179_v62 = vld [vmem:[%s7808_s24 + $0x2b4] ss:$24 sps:$4 sm:$0xff]  }
 0x422   : > { %2567 = vmatpush1.bf16.msra.mxu0 %v7090_v63  ;;  %v7177_v63 = vld [vmem:[%s7808_s24 + $0x2b0] ss:$24 sps:$4 sm:$0xff]  }
 0x423   : > { %2568 = vmatprep.subr.bf16.mxu0 %v7095_v0  ;;  %v7182_v0 = vld [vmem:[%s7808_s24 + $0x2e4] ss:$24 sps:$4 sm:$0xff]  }
 0x426   : > { %2569 = vmatpush1.bf16.msra.mxu0 %v7093_v1  ;;  %v7180_v1 = vld [vmem:[%s7808_s24 + $0x2e0] ss:$24 sps:$4 sm:$0xff]  }
 0x427   : > { %2570 = vmatprep.subr.bf16.mxu0 %v7098_v2  ;;  %v7185_v2 = vld [vmem:[%s7818_s25 + $0x4] ss:$8 sps:$4 sm:$0xff]  }
 0x42a   : > { %2571 = vmatpush1.bf16.msra.mxu0 %v7096_v3  ;;  %v7183_v3 = vld [vmem:[%s7818_s25] ss:$8 sps:$4 sm:$0xff]  }
 0x42b   : > { %2572 = vmatprep.subr.bf16.mxu0 %v7101_v4  ;;  %v7188_v4 = vld [vmem:[%s7818_s25 + $0x14] ss:$8 sps:$4 sm:$0xff]  }
 0x42e   : > { %2573 = vmatpush1.bf16.msra.mxu0 %v7099_v5  ;;  %v1914_v5 = vpack.c.bf16 %v8243_v57, %v8243_v57  ;;  %v7197_v57 = vld [vmem:[%s7818_s25 + $0x44] ss:$8 sps:$4 sm:$0xff]  }
 0x42f   : > { %2574 = vmatprep.subr.bf16.mxu0 %v7104_v6  ;;  %v7186_v6 = vld [vmem:[%s7818_s25 + $0x10] ss:$8 sps:$4 sm:$0xff]  }
 0x432   : > { %2575 = vmatpush1.bf16.msra.mxu0 %v7102_v7  ;;  %v7191_v7 = vld [vmem:[%s7818_s25 + $0x24] ss:$8 sps:$4 sm:$0xff]  }
 0x433   : > { %2576 = vmatprep.subr.bf16.mxu0 %v7107_v8  ;;  %v7189_v8 = vld [vmem:[%s7818_s25 + $0x20] ss:$8 sps:$4 sm:$0xff]  }
 0x436   : > { %2577 = vmatpush1.bf16.msra.mxu0 %v7105_v9  ;;  %v7194_v9 = vld [vmem:[%s7818_s25 + $0x34] ss:$8 sps:$4 sm:$0xff]  }
 0x437   : > { %2578 = vmatprep.subr.bf16.mxu0 %v7110_v10  ;;  %v7192_v10 = vld [vmem:[%s7818_s25 + $0x30] ss:$8 sps:$4 sm:$0xff]  }
 0x43a   : > { %2579 = vmatpush1.bf16.msra.mxu0 %v7108_v11  ;;  %v7200_v11 = vld [vmem:[%s7818_s25 + $0x54] ss:$8 sps:$4 sm:$0xff]  }
 0x43b   : > { %2580 = vmatprep.subr.bf16.mxu0 %v7113_v12  ;;  %v7198_v12 = vld [vmem:[%s7818_s25 + $0x50] ss:$8 sps:$4 sm:$0xff]  }
 0x43e   : > { %2581 = vmatpush1.bf16.msra.mxu0 %v7111_v13  ;;  %v7203_v13 = vld [vmem:[%s7818_s25 + $0x64] ss:$8 sps:$4 sm:$0xff]  }
 0x43f   : > { %2582 = vmatprep.subr.bf16.mxu0 %v7116_v14  ;;  %v7201_v14 = vld [vmem:[%s7818_s25 + $0x60] ss:$8 sps:$4 sm:$0xff]  }
 0x442   : > { %2583 = vmatpush1.bf16.msra.mxu0 %v7114_v15  ;;  %v7206_v15 = vld [vmem:[%s7818_s25 + $0x74] ss:$8 sps:$4 sm:$0xff]  }
 0x443   : > { %2584 = vmatprep.subr.bf16.mxu0 %v7119_v16  ;;  %v7204_v16 = vld [vmem:[%s7818_s25 + $0x70] ss:$8 sps:$4 sm:$0xff]  }
 0x446   : > { %2585 = vmatpush1.bf16.msra.mxu0 %v7117_v17  ;;  %v7209_v17 = vld [vmem:[%s7818_s25 + $0x84] ss:$8 sps:$4 sm:$0xff]  }
 0x447   : > { %2586 = vmatprep.subr.bf16.mxu0 %v7122_v18  ;;  %v7207_v18 = vld [vmem:[%s7818_s25 + $0x80] ss:$8 sps:$4 sm:$0xff]  }
 0x44a   : > { %2587 = vmatpush1.bf16.msra.mxu0 %v7120_v19  ;;  %v7212_v19 = vld [vmem:[%s7818_s25 + $0x94] ss:$8 sps:$4 sm:$0xff]  }
 0x44b   : > { %2588 = vmatprep.subr.bf16.mxu0 %v7125_v20  ;;  %v7210_v20 = vld [vmem:[%s7818_s25 + $0x90] ss:$8 sps:$4 sm:$0xff]  }
 0x44e   : > { %2589 = vmatpush1.bf16.msra.mxu0 %v7123_v21  ;;  %v7215_v21 = vld [vmem:[%s7818_s25 + $0xa4] ss:$8 sps:$4 sm:$0xff]  }
 0x44f   : > { %2590 = vmatprep.subr.bf16.mxu0 %v7128_v22  ;;  %v7213_v22 = vld [vmem:[%s7818_s25 + $0xa0] ss:$8 sps:$4 sm:$0xff]  }
 0x452   : > { %2591 = vmatpush1.bf16.msra.mxu0 %v7126_v23  ;;  %v7218_v23 = vld [vmem:[%s7818_s25 + $0xb4] ss:$8 sps:$4 sm:$0xff]  }
 0x453   : > { %2592 = vmatprep.subr.bf16.mxu0 %v7131_v24  ;;  %v7216_v24 = vld [vmem:[%s7818_s25 + $0xb0] ss:$8 sps:$4 sm:$0xff]  }
 0x456   : > { %2593 = vmatpush1.bf16.msra.mxu0 %v7129_v25  ;;  %v7221_v25 = vld [vmem:[%s7818_s25 + $0xc4] ss:$8 sps:$4 sm:$0xff]  }
 0x457   : > { %2594 = vmatprep.subr.bf16.mxu0 %v7134_v26  ;;  %v7219_v26 = vld [vmem:[%s7818_s25 + $0xc0] ss:$8 sps:$4 sm:$0xff]  }
 0x45a   : > { %2595 = vmatpush1.bf16.msra.mxu0 %v7132_v27  ;;  %v7224_v27 = vld [vmem:[%s7818_s25 + $0xd4] ss:$8 sps:$4 sm:$0xff]  }
 0x45b   : > { %2605 = vmatprep.subr.bf16.mxu0 %v7137_v28  ;;  %v7222_v28 = vld [vmem:[%s7818_s25 + $0xd0] ss:$8 sps:$4 sm:$0xff]  }
 0x45d   : > { %2597 = vmatmul.mubr.bf16.vlgmr.msra.gmra.mrb[4].mxu0 %v8250_v61 }
 0x45e   : > { %2606 = vmatpush1.bf16.msra.mxu0 %v7135_v29  ;;  %2637 = vmatprep.mubr.bf16.mxu0 %v8247_v59  ;;  %v7176_v59 = vld [vmem:[%s7808_s24 + $0x284] ss:$24 sps:$4 sm:$0xff]  }
 0x45f   : > { %2607 = vmatprep.subr.bf16.mxu0 %v7140_v30  ;;  %v7227_v29 = vld [vmem:[%s7818_s25 + $0xe4] ss:$8 sps:$4 sm:$0xff]   ;;  %v7225_v30 = vld [vmem:[%s7818_s25 + $0xe0] ss:$8 sps:$4 sm:$0xff]  }
 0x462   : > { %2608 = vmatpush1.bf16.msra.mxu0 %v7138_v31  ;;  %v7230_v31 = vld [vmem:[%s7818_s25 + $0xf4] ss:$8 sps:$4 sm:$0xff]  }
 0x463   : > { %2609 = vmatprep.subr.bf16.mxu0 %v7143_v32  ;;  %v7228_v32 = vld [vmem:[%s7818_s25 + $0xf0] ss:$8 sps:$4 sm:$0xff]  }
 0x466   : > { %2610 = vmatpush1.bf16.msra.mxu0 %v7141_v33  ;;  %v1913_v33 = vpack.c.bf16 %v8245_v58, %v8245_v58 }
 0x467   : > { %2611 = vmatprep.subr.bf16.mxu0 %v7146_v34  ;;  %v7631_v34 = vmov 0.0  }
 0x46a   : > { %2612 = vmatpush1.bf16.msra.mxu0 %v7144_v35 }
 0x46b   : > { %2613 = vmatprep.subr.bf16.mxu0 %v7149_v39 }
 0x46e   : > { %2614 = vmatpush1.bf16.msra.mxu0 %v7147_v40 }
 0x46f   : > { %2615 = vmatprep.subr.bf16.mxu0 %v7152_v41 }
 0x472   : > { %2616 = vmatpush1.bf16.msra.mxu0 %v7150_v42  ;;  %v2023_v42 = vsub.s32 2, %v8221_v36 }
 0x473   : > { %2617 = vmatprep.subr.bf16.mxu0 %v7155_v43  ;;  %v8359_v43 = vld [vmem:[%s7813_s17] sm:$0x3f] }
 0x476   : > { %2618 = vmatpush1.bf16.msra.mxu0 %v7153_v44  ;;  %v2024_v44 = vrot.slane %v8359_v43, %v2023_v42 }
 0x477   : > { %2619 = vmatprep.subr.bf16.mxu0 %v7158_v45 }
 0x47a   : > { %2620 = vmatpush1.bf16.msra.mxu0 %v7156_v46 }
 0x47b   : > { %2621 = vmatprep.subr.bf16.mxu0 %v7161_v47 }
 0x47e   : > { %2622 = vmatpush1.bf16.msra.mxu0 %v7159_v48 }
 0x47f   : > { %2623 = vmatprep.subr.bf16.mxu0 %v7164_v49 }
 0x482   : > { %2624 = vmatpush1.bf16.msra.mxu0 %v7162_v50  ;;  %v2035_v50 = vsub.s32 5, %v8221_v36 }
 0x483   : > { %2625 = vmatprep.subr.bf16.mxu0 %v7167_v51 }
 0x484   : > { %v2036_v51 = vrot.slane %v8359_v43, %v2035_v50 }
 0x486   : > { %2626 = vmatpush1.bf16.msra.mxu0 %v7165_v52 }
 0x487   : > { %2627 = vmatprep.subr.bf16.mxu0 %v7170_v53 }
 0x48a   : > { %2628 = vmatpush1.bf16.msra.mxu0 %v7168_v54 }
 0x48b   : > { %2629 = vmatprep.subr.bf16.mxu0 %v7173_v55 }
 0x48e   : > { %2630 = vmatpush1.bf16.msra.mxu0 %v7171_v56 }
 0x48f   : > { %2631 = vmatprep.subr.bf16.mxu0 %v7176_v59 }
 0x492   : > { %2632 = vmatpush1.bf16.msra.mxu0 %v7174_v60 }
 0x493   : > { %2633 = vmatprep.subr.bf16.mxu0 %v7179_v62  ;;  %v2031_v62 = vsub.s32 4, %v8221_v36 }
 0x496   : > { %2634 = vmatpush1.bf16.msra.mxu0 %v7177_v63  ;;  %v2032_v63 = vrot.slane %v8359_v43, %v2031_v62 }
 0x497   : > { %2635 = vmatprep.subr.bf16.mxu0 %v7182_v0 }
 0x49a   : > { %2636 = vmatpush1.bf16.msra.mxu0 %v7180_v1  ;;  %v2016_v1 = vrot.slane %v8359_v43, %v8227_v38 }
 0x49b   : > { %2850 = vmatprep.subr.bf16.mxu0 %v7185_v2 }
 0x49d   : > { %2638 = vmatmul.mubr.bf16.vlgmr.msra.gmra.mrb[8].mxu0 %v8250_v61  ;;  %v7195_v61 = vld [vmem:[%s7818_s25 + $0x40] ss:$8 sps:$4 sm:$0xff]   ;;  %s9100_s25 = scalar_lea.vmem %s9025_s10, %s7820_s28  ;;  %s9109_s28 = sld [smem:[#allocation4_spill]] }
 0x49e   : > { %2851 = vmatpush1.bf16.msra.mxu0 %v7183_v3  ;;  %2882 = vmatprep.mubr.bf16.mxu0 %v1914_v5  ;;  %v2678_v0 = vld [vmem:[%s9100_s25] sm:$0x3] }
 0x49f   : > { %2852 = vmatprep.subr.bf16.mxu0 %v7188_v4  ;;  %v2683_v3 = vrot.slane %v2678_v0, %v8227_v38  ;;  %v2020_v4 = vrot.slane %v8359_v43, %v8224_v37  ;;  %v2687_v5 = vrot.slane %v2678_v0, %v8224_v37 }
 0x4a2   : > { %2853 = vmatpush1.bf16.msra.mxu0 %v7186_v6 }
 0x4a3   : > { %2854 = vmatprep.subr.bf16.mxu0 %v7191_v7  ;;  %p6683_p8 = scmp.ne.s32.totalorder %s9109_s28, 1 }
 0x4a4   : > { %s9110_s27 = sld [smem:[#allocation31_spill]] (!%p6683_p8)  ;;  %s9113_s11 = sld [smem:[#allocation30_spill]] (!%p6683_p8)  ;;  %vm7635_vm3 = vmmov (!%p6683_p8), 0  }
 0x4a5   : > { %s9114_s22 = sld [smem:[#allocation13_spill]] (!%p6683_p8) }
 0x4a6   : > { %2855 = vmatpush1.bf16.msra.mxu0 %v7189_v8 }
 0x4a7   : > { %2856 = vmatprep.subr.bf16.mxu0 %v7194_v9 }
 0x4aa   : > { %2857 = vmatpush1.bf16.msra.mxu0 %v7192_v10  ;;  %s9111_s8 = smov (!%p6683_p8), %s9110_s27 }
 0x4ab   : > { %2858 = vmatprep.subr.bf16.mxu0 %v7197_v57 }
 0x4ae   : > { %2859 = vmatpush1.bf16.msra.mxu0 %v7195_v61 }
 0x4af   : > { %2860 = vmatprep.subr.bf16.mxu0 %v7200_v11 }
 0x4b2   : > { %2861 = vmatpush1.bf16.msra.mxu0 %v7198_v12 }
 0x4b3   : > { %2862 = vmatprep.subr.bf16.mxu0 %v7203_v13 }
 0x4b6   : > { %2863 = vmatpush1.bf16.msra.mxu0 %v7201_v14 }
 0x4b7   : > { %2864 = vmatprep.subr.bf16.mxu0 %v7206_v15 }
 0x4ba   : > { %2865 = vmatpush1.bf16.msra.mxu0 %v7204_v16  ;;  %v8401_v16 = vld [vmem:[%s7798_s4] sm:$0xff] }
 0x4bb   : > { %2866 = vmatprep.subr.bf16.mxu0 %v7209_v17 }
 0x4be   : > { %2867 = vmatpush1.bf16.msra.mxu0 %v7207_v18  ;;  %v8404_v18 = vld [vmem:[%s7798_s4 + $0x8] sm:$0xff] }
 0x4bf   : > { %2868 = vmatprep.subr.bf16.mxu0 %v7212_v19 }
 0x4c2   : > { %2869 = vmatpush1.bf16.msra.mxu0 %v7210_v20 }
 0x4c3   : > { %2870 = vmatprep.subr.bf16.mxu0 %v7215_v21 }
 0x4c6   : > { %2871 = vmatpush1.bf16.msra.mxu0 %v7213_v22 }
 0x4c7   : > { %2872 = vmatprep.subr.bf16.mxu0 %v7218_v23 }
 0x4ca   : > { %2873 = vmatpush1.bf16.msra.mxu0 %v7216_v24 }
 0x4cb   : > { %2874 = vmatprep.subr.bf16.mxu0 %v7221_v25 }
 0x4ce   : > { %2875 = vmatpush1.bf16.msra.mxu0 %v7219_v26 }
 0x4cf   : > { %2876 = vmatprep.subr.bf16.mxu0 %v7224_v27 }
 0x4d2   : > { %2877 = vmatpush1.bf16.msra.mxu0 %v7222_v28 }
 0x4d3   : > { %2878 = vmatprep.subr.bf16.mxu0 %v7227_v29 }
 0x4d6   : > { %2879 = vmatpush1.bf16.msra.mxu0 %v7225_v30 }
 0x4d7   : > { %2880 = vmatprep.subr.bf16.mxu0 %v7230_v31 }
 0x4da   : > { %2881 = vmatpush1.bf16.msra.mxu0 %v7228_v32 }
 0x4db   : > { %6754 = vmatprep.subr.bf16.mxu0 %v7631_v34 }
 0x4dd   : > { %2883 = vmatmul.mubr.bf16.vlgmr.msra.gmra.mrb[12].mxu0 %v1913_v33 }
 0x4de   : > { %6756 = vmatprep.mubr.msk.bf16.mxu0 %vm7632_vm0, %v7631_v34 }
 0x4f0   : > { %v2557_v35 = vpop.f32.mrb[0].mxu0 }
 0x4f1   : > { %v2559_v39 = vpop.f32.mrb[1].mxu0  ;;  %v2558_v7 = vadd.f32 %v2557_v35, %v2016_v1 }
 0x4f2   : > { %v2561_v40 = vpop.f32.mrb[2].mxu0  ;;  %v8391_v57 = vadd.f32 %v2559_v39, %v2020_v4 }
 0x4f3   : > { %v2562_v41 = vpop.f32.mrb[3].mxu0  ;;  %v7231_v40 = vld [vmem:[%s9101_s15 + $0x4] ss:$8 sps:$4 sm:$0xff]  }
 0x4f4   : > { %v7233_v41 = vld [vmem:[%s9101_s15] ss:$8 sps:$4 sm:$0xff]   ;;  %3129 = vmatprep.subr.bf16.mxu1 %v7231_v40  ;;  %v7258_v40 = vld [vmem:[%s9101_s15 + $0x90] ss:$8 sps:$4 sm:$0xff]  }
 0x4f5   : > { %3130 = vmatpush1.bf16.msra.mxu1 %v7233_v41  ;;  %v7263_v41 = vld [vmem:[%s9101_s15 + $0xa4] ss:$8 sps:$4 sm:$0xff]  }
 0x530   : > { %v2598_v45 = vpop.f32.mrb[4].mxu0 }
 0x531   : > { %v2599_v46 = vadd.f32 %v2598_v45, %v2024_v44  ;;  %v8364_v47 = vpop.f32.mrb[5].mxu0  ;;  %v7234_v44 = vld [vmem:[%s9101_s15 + $0x14] ss:$8 sps:$4 sm:$0xff]   ;;  %v7236_v45 = vld [vmem:[%s9101_s15 + $0x10] ss:$8 sps:$4 sm:$0xff]  }
 0x532   : > { %v2602_v58 = vpop.f32.mrb[6].mxu0  ;;  %3131 = vmatprep.subr.bf16.mxu1 %v7234_v44  ;;  %v7261_v44 = vld [vmem:[%s9101_s15 + $0xa0] ss:$8 sps:$4 sm:$0xff]  }
 0x533   : > { %v2933_v48 = vpack.c.bf16 %v2599_v46, %v2599_v46  ;;  %v2603_v49 = vpop.f32.mrb[7].mxu0  ;;  %v7237_v46 = vld [vmem:[%s9101_s15 + $0x24] ss:$8 sps:$4 sm:$0xff]   ;;  %3132 = vmatpush1.bf16.msra.mxu1 %v7236_v45  ;;  %v7239_v58 = vld [vmem:[%s9101_s15 + $0x20] ss:$8 sps:$4 sm:$0xff]  }
 0x534   : > { %3133 = vmatprep.subr.bf16.mxu1 %v7237_v46  ;;  %v7242_v49 = vld [vmem:[%s9101_s15 + $0x30] ss:$8 sps:$4 sm:$0xff]   ;;  %v7266_v45 = vld [vmem:[%s9101_s15 + $0xb4] ss:$8 sps:$4 sm:$0xff]  }
 0x535   : > { %6755 = vmatpush3.bf16.xpose.msra.mxu0 %v2933_v48  ;;  %v7240_v48 = vld [vmem:[%s9101_s15 + $0x34] ss:$8 sps:$4 sm:$0xff]   ;;  %v7264_v46 = vld [vmem:[%s9101_s15 + $0xb0] ss:$8 sps:$4 sm:$0xff]  }
 0x536   : > { %6760 = vmatprep.subr.bf16.mxu0 %v7631_v34 }
 0x537   : > { %3134 = vmatpush1.bf16.msra.mxu1 %v7239_v58  ;;  %v7269_v58 = vld [vmem:[%s9101_s15 + $0xc4] ss:$8 sps:$4 sm:$0xff]  }
 0x538   : > { %3135 = vmatprep.subr.bf16.mxu1 %v7240_v48  ;;  %v7267_v48 = vld [vmem:[%s9101_s15 + $0xc0] ss:$8 sps:$4 sm:$0xff]  }
 0x53b   : > { %3136 = vmatpush1.bf16.msra.mxu1 %v7242_v49  ;;  %v7272_v49 = vld [vmem:[%s9101_s15 + $0xd4] ss:$8 sps:$4 sm:$0xff]  }
 0x570   : > { %v2639_v52 = vpop.f32.mrb[8].mxu0 }
 0x571   : > { %v2641_v53 = vpop.f32.mrb[9].mxu0  ;;  %v2640_v2 = vadd.f32 %v2639_v52, %v2032_v63  ;;  %v7245_v52 = vld [vmem:[%s9101_s15 + $0x40] ss:$8 sps:$4 sm:$0xff]   ;;  %v7254_v63 = vld [vmem:[%s9101_s15 + $0x70] ss:$8 sps:$4 sm:$0xff]  }
 0x572   : > { %v2642_v54 = vadd.f32 %v2641_v53, %v2036_v51  ;;  %v2643_v55 = vpop.f32.mrb[10].mxu0  ;;  %v7243_v51 = vld [vmem:[%s9101_s15 + $0x44] ss:$8 sps:$4 sm:$0xff]   ;;  %v7246_v53 = vld [vmem:[%s9101_s15 + $0x54] ss:$8 sps:$4 sm:$0xff]  }
 0x573   : > { %v2644_v56 = vpop.f32.mrb[11].mxu0  ;;  %v2934_v8 = vpack.c.bf16 %v2640_v2, %v2640_v2  ;;  %3137 = vmatprep.subr.bf16.mxu1 %v7243_v51  ;;  %v7249_v55 = vld [vmem:[%s9101_s15 + $0x64] ss:$8 sps:$4 sm:$0xff]   ;;  %v7270_v51 = vld [vmem:[%s9101_s15 + $0xd0] ss:$8 sps:$4 sm:$0xff]  }
 0x574   : > { %v3189_v59 = vpack.c.bf16 %v2642_v54, %v2642_v54  ;;  %3138 = vmatpush1.bf16.msra.mxu1 %v7245_v52  ;;  %v7248_v54 = vld [vmem:[%s9101_s15 + $0x50] ss:$8 sps:$4 sm:$0xff]   ;;  %v7251_v56 = vld [vmem:[%s9101_s15 + $0x60] ss:$8 sps:$4 sm:$0xff]   ;;  %v7275_v52 = vld [vmem:[%s9101_s15 + $0xe4] ss:$8 sps:$4 sm:$0xff]  }
 0x575   : > { %v3005_v15 = vsel %vm3003_vm1, %v2934_v8, 0  ;;  %3139 = vmatprep.subr.bf16.mxu1 %v7246_v53  ;;  %v2027_v8 = vsub.s32 3, %v8221_v36  ;;  %v7273_v53 = vld [vmem:[%s9101_s15 + $0xe0] ss:$8 sps:$4 sm:$0xff]  }
 0x576   : > { %v8374_v60 = vsel %vm3003_vm1, %v3189_v59, 0  ;;  %v7252_v59 = vld [vmem:[%s9101_s15 + $0x74] ss:$8 sps:$4 sm:$0xff]  }
 0x578   : > { %3140 = vmatpush1.bf16.msra.mxu1 %v7248_v54 }
 0x579   : > { %3141 = vmatprep.subr.bf16.mxu1 %v7249_v55 }
 0x57c   : > { %3142 = vmatpush1.bf16.msra.mxu1 %v7251_v56 }
 0x57d   : > { %3143 = vmatprep.subr.bf16.mxu1 %v7252_v59 }
 0x580   : > { %3144 = vmatpush1.bf16.msra.mxu1 %v7254_v63 }
 0x581   : > { %6766 = vmatprep.subr.bf16.mxu1 %v7631_v34 }
 0x5b0   : > { %v2884_v6 = vpop.f32.mrb[12].mxu0 }
 0x5b1   : > { %v2885_v9 = vadd.f32 %v2884_v6, %v2683_v3  ;;  %v2886_v10 = vpop.f32.mrb[13].mxu0 }
 0x5b2   : > { %v8393_v61 = vadd.f32 %v2886_v10, %v2687_v5  ;;  %v2888_v11 = vpop.f32.mrb[14].mxu0 }
 0x5b3   : > { %v2932_v12 = vpack.c.bf16 %v2558_v7, %v2885_v9  ;;  %v2889_v13 = vpop.f32.mrb[15].mxu0  ;;  %v7633_v7 = vmov 0   ;;  %v2028_v9 = vrot.slane %v8359_v43, %v2027_v8 }
 0x5b4   : > { %v3187_v14 = vpack.c.bf16 %v8391_v57, %v8393_v61  ;;  %3161 = vmatprep.mubr.bf16.mxu1 %v7633_v7 }
 0x5b5   : > { %6757 = vmatmul.mubr.bf16.vlgmr.msra.gmra.mrb[16].mxu0 %v2932_v12  ;;  %v2601_v10 = vadd.f32 %v8364_v47, %v2028_v9 }
 0x5b6   : > { %6761 = vmatpush3.bf16.msra.mxu0 %v3005_v15  ;;  %6762 = vmatprep.mubr.msk.bf16.mxu0 %vm7632_vm0, %v7631_v34 }
 0x688   : > { %v2969_v17 = vpop.f32.mrb[16].mxu0 }
 0x689   : > { %v2970_v19 = vadd.f32 %v2969_v17, %v8401_v16  ;;  %v6758_v20 = vpop.f32.mrb[17].mxu0 }
 0x68a   : > { %v2972_v21 = vpop.f32.mrb[18].mxu0 }
 0x68b   : > { %v2973_v22 = vadd.f32 %v2972_v21, %v8404_v18  ;;  %v6759_v23 = vpop.f32.mrb[19].mxu0  ;;  %v2977_v24 = vsel %vm2976_vm2, %v2970_v19, -inf }
 0x68c   : > { %2978 = vmax.xlane.f32.xlu0 %v2977_v24 }
 0x68d   : > { %v2980_v25 = vsel %vm2976_vm2, %v2973_v22, -inf }
 0x68e   : > { %2981 = vmax.xlane.f32.xlu1 %v2980_v25 }
 0x719   : > { %v2979_v26 = vpop.xlane.xlu0 %2978 }
 0x71a   : > { %v2983_v27 = vsub.f32 %v2970_v19, %v2979_v26  ;;  %v3188_v19 = vpack.c.bf16 %v2601_v10, %v2601_v10  ;;  %v2931_v10 = vld [vmem:[%s9103_s26] sm:$0x3]  ;;  %s9112_s26 = sld [smem:[#allocation29_spill]] (!%p6683_p8) }
 0x71b   : > { %v2982_v28 = vpop.xlane.xlu1 %2981 }
 0x71c   : > { %v2985_v29 = vmul.f32 1.442695, %v2983_v27  ;;  %v2984_v30 = vsub.f32 %v2973_v22, %v2982_v28 }
 0x71e   : > { %7475 = vpow2.f32 %v2985_v29  ;;  %v2987_v31 = vmul.f32 1.442695, %v2984_v30 }
 0x720   : > { %7477 = vpow2.f32 %v2987_v31 }
 0x728   : > { %v7476_v32 = vpop.eup %7475 }
 0x729   : > { %v2989_v33 = vsel %vm2976_vm2, %v7476_v32, 0.0 }
 0x72a   : > { %v7478_v35 = vpop.eup %7477  ;;  %2990 = vadd.xlane.f32.xlu0 %v2989_v33  ;;  %v7255_v33 = vld [vmem:[%s9101_s15 + $0x80] ss:$8 sps:$4 sm:$0xff]  }
 0x72b   : > { %v2992_v39 = vsel %vm2976_vm2, %v7478_v35, 0.0 }
 0x72c   : > { %2993 = vadd.xlane.f32.xlu1 %v2992_v39  ;;  %v7260_v39 = vld [vmem:[%s9101_s15 + $0x94] ss:$8 sps:$4 sm:$0xff]  }
 0x7b7   : > { %v2991_v0 = vpop.xlane.xlu0 %2990 }
 0x7b8   : > { %7479 = vrcp.f32 %v2991_v0 }
 0x7b9   : > { %v2994_v1 = vpop.xlane.xlu1 %2993 }
 0x7ba   : > { %7481 = vrcp.f32 %v2994_v1 }
 0x7c2   : > { %v7480_v2 = vpop.eup %7479 }
 0x7c3   : > { %v2997_v4 = vmul.f32 %v7480_v2, %v7476_v32  ;;  %v7278_v2 = vld [vmem:[%s9101_s15 + $0xf4] ss:$8 sps:$4 sm:$0xff]  }
 0x7c4   : > { %v7482_v3 = vpop.eup %7481 }
 0x7c5   : > { %v2998_v5 = vmul.f32 %v7482_v3, %v7478_v35  ;;  %v7257_v35 = vld [vmem:[%s9101_s15 + $0x84] ss:$8 sps:$4 sm:$0xff]   ;;  %v7276_v3 = vld [vmem:[%s9101_s15 + $0xf0] ss:$8 sps:$4 sm:$0xff]  }
 0x7c6   : > { %3382 = vmatprep.subr.bf16.mxu0 %v7257_v35  ;;  %v3504_v35 = vld [vmem:[%s7854_s12 + $0x28] sm:$0xff] }
 0x7c7   : > { %v2999_v6 = vpack.c.bf16 %v2998_v5, %v2997_v4 }
 0x7c9   : > { %6763 = vmatmul.mubr.msk.bf16.vlgmr.msra.gmra.mrb[20].mxu0 %vm2976_vm2, %v2999_v6 }
 0x7ca   : > { %3414 = vmatprep.mubr.bf16.mxu0 %v7633_v7  ;;  %3383 = vmatpush1.bf16.msra.mxu0 %v7255_v33 }
 0x7cb   : > { %3384 = vmatprep.subr.bf16.mxu0 %v7260_v39  ;;  %v3507_v39 = vld [vmem:[%s7854_s12 + $0x40] sm:$0xff] }
 0x7ce   : > { %3385 = vmatpush1.bf16.msra.mxu0 %v7258_v40  ;;  %v3511_v40 = vld [vmem:[%s7854_s12 + $0x60] sm:$0xff] }
 0x7cf   : > { %3386 = vmatprep.subr.bf16.mxu0 %v7263_v41 }
 0x7d2   : > { %3387 = vmatpush1.bf16.msra.mxu0 %v7261_v44 }
 0x7d3   : > { %3388 = vmatprep.subr.bf16.mxu0 %v7266_v45  ;;  %v6436_v45 = vcombine.high %v3507_v39, %v3511_v40 }
 0x7d6   : > { %3389 = vmatpush1.bf16.msra.mxu0 %v7264_v46  ;;  %v3508_v46 = vld [vmem:[%s7854_s12 + $0x48] sm:$0xff] }
 0x7d7   : > { %3390 = vmatprep.subr.bf16.mxu0 %v7269_v58  ;;  %v3512_v58 = vld [vmem:[%s7854_s12 + $0x68] sm:$0xff] }
 0x7da   : > { %3391 = vmatpush1.bf16.msra.mxu0 %v7267_v48  ;;  %v3515_v48 = vld [vmem:[%s7854_s12 + $0x80] sm:$0xff] }
 0x7db   : > { %3392 = vmatprep.subr.bf16.mxu0 %v7272_v49  ;;  %v6438_v49 = vcombine.high %v3508_v46, %v3512_v58 }
 0x7de   : > { %3393 = vmatpush1.bf16.msra.mxu0 %v7270_v51  ;;  %v3519_v51 = vld [vmem:[%s7854_s12 + $0xa0] sm:$0xff] }
 0x7df   : > { %3394 = vmatprep.subr.bf16.mxu0 %v7275_v52  ;;  %v3516_v52 = vld [vmem:[%s7854_s12 + $0x88] sm:$0xff] }
 0x7e2   : > { %3395 = vmatpush1.bf16.msra.mxu0 %v7273_v53  ;;  %v3520_v53 = vld [vmem:[%s7854_s12 + $0xa8] sm:$0xff] }
 0x7e3   : > { %3396 = vmatprep.subr.bf16.mxu0 %v7278_v2  ;;  %v3528_v2 = vld [vmem:[%s7854_s12 + $0xe8] sm:$0xff] }
 0x7e6   : > { %3397 = vmatpush1.bf16.msra.mxu0 %v7276_v3  ;;  %v6443_v3 = vcombine.low %v3515_v48, %v3519_v51 }
 0x89c   : > { %v3041_v11 = vpop.f32.mrb[20].mxu0 }
 0x89d   : > { %v6764_v12 = vpop.f32.mrb[21].mxu0 }
 0x89e   : > { %v3044_v13 = vpop.f32.mrb[22].mxu0  ;;  %v3180_v12 = vrot.slane %v2931_v10, %v8224_v37 }
 0x89f   : > { %v3048_v15 = vpack.c.bf16 %v3044_v13, %v3041_v11  ;;  %v6765_v17 = vpop.f32.mrb[23].mxu0  ;;  %v3176_v11 = vrot.slane %v2931_v10, %v8227_v38  ;;  %v3532_v10 = vld [vmem:[%s7854_s12 + $0x108] sm:$0xff] }
 0x8a1   : > { %3162 = vmatmul.mubr.bf16.vlgmr.msra.gmra.mrb[0].mxu1 %v3048_v15 }
 0x8a2   : > { %6767 = vmatpush3.bf16.xpose.msra.mxu1 %v3188_v19  ;;  %6768 = vmatprep.mubr.msk.bf16.mxu1 %vm7632_vm0, %v7631_v34 }
 0x8a3   : > { %6772 = vmatprep.subr.bf16.mxu1 %v7631_v34 }
 0x8a9   : > { %6769 = vmatmul.mubr.bf16.vlgmr.msra.gmra.mrb[4].mxu1 %v3187_v14 }
 0x8aa   : > { %6773 = vmatpush3.bf16.msra.mxu1 %v8374_v60  ;;  %6774 = vmatprep.mubr.msk.bf16.mxu1 %vm7632_vm0, %v7631_v34 }
 0x974   : > { %v8444_v43 = vpop.f32.mrb[0].mxu1 }
 0x975   : > { %v8446_v47 = vpop.f32.mrb[1].mxu1  ;;  %v3183_v13 = vadd.f32 %v3176_v11, %v8444_v43  ;;  %v7560_v43 = vld [vmem:[#allocation2 + $0x8] sm:$0xff] }
 0x976   : > { %v8448_v20 = vpop.f32.mrb[2].mxu1  ;;  %v3184_v15 = vadd.f32 %v3180_v12, %v8446_v47 }
 0x977   : > { %v8450_v21 = vpop.f32.mrb[3].mxu1  ;;  %v3185_v19 = vadd.f32 %v3176_v11, %v8448_v20  ;;  %v3536_v11 = vld [vmem:[%s7854_s12 + $0x128] sm:$0xff] }
 0x97c   : > { %v3224_v22 = vpop.f32.mrb[4].mxu1 }
 0x97d   : > { %v3225_v23 = vadd.f32 %v3224_v22, %v8401_v16  ;;  %v6770_v24 = vpop.f32.mrb[5].mxu1 }
 0x97e   : > { %v3227_v25 = vpop.f32.mrb[6].mxu1  ;;  %v3186_v24 = vadd.f32 %v3180_v12, %v8450_v21  ;;  %v7562_v21 = vld [vmem:[#allocation2 + $0x18] sm:$0xff] }
 0x97f   : > { %v3228_v57 = vadd.f32 %v3227_v25, %v8404_v18  ;;  %v6771_v61 = vpop.f32.mrb[7].mxu1  ;;  %v3231_v60 = vsel %vm2976_vm2, %v3225_v23, -inf }
 0x980   : > { %3232 = vmax.xlane.f32.xlu0 %v3231_v60  ;;  %v7559_v61 = vld [vmem:[#allocation2] sm:$0xff] }
 0x981   : > { %v3234_v34 = vsel %vm2976_vm2, %v3228_v57, -inf }
 0x982   : > { %3235 = vmax.xlane.f32.xlu1 %v3234_v34 }
 0xa0d   : > { %v3233_v14 = vpop.xlane.xlu0 %3232 }
 0xa0e   : > { %v3237_v26 = vsub.f32 %v3225_v23, %v3233_v14 }
 0xa0f   : > { %v3236_v27 = vpop.xlane.xlu1 %3235 }
 0xa10   : > { %v3239_v28 = vmul.f32 1.442695, %v3237_v26  ;;  %v3238_v16 = vsub.f32 %v3228_v57, %v3236_v27  ;;  %v7561_v26 = vld [vmem:[#allocation2 + $0x10] sm:$0xff] }
 0xa12   : > { %7483 = vpow2.f32 %v3239_v28  ;;  %v3241_v29 = vmul.f32 1.442695, %v3238_v16 }
 0xa14   : > { %7485 = vpow2.f32 %v3241_v29 }
 0xa1c   : > { %v7484_v18 = vpop.eup %7483 }
 0xa1d   : > { %v3243_v30 = vsel %vm2976_vm2, %v7484_v18, 0.0 }
 0xa1e   : > { %v7486_v31 = vpop.eup %7485  ;;  %3244 = vadd.xlane.f32.xlu0 %v3243_v30  ;;  %v3503_v30 = vld [vmem:[%s7854_s12 + $0x20] sm:$0xff] }
 0xa1f   : > { %v3246_v32 = vsel %vm2976_vm2, %v7486_v31, 0.0 }
 0xa20   : > { %3247 = vadd.xlane.f32.xlu1 %v3246_v32 }
 0xaab   : > { %v3245_v54 = vpop.xlane.xlu0 %3244 }
 0xaac   : > { %7487 = vrcp.f32 %v3245_v54  ;;  %v6435_v54 = vcombine.low %v3507_v39, %v3511_v40 }
 0xaad   : > { %v3248_v55 = vpop.xlane.xlu1 %3247 }
 0xaae   : > { %7489 = vrcp.f32 %v3248_v55  ;;  %v6437_v55 = vcombine.low %v3508_v46, %v3512_v58  ;;  %v3564_v46 = vld [vmem:[%s7854_s12 + $0x208] sm:$0xff] }
 0xaaf   : > { %v3568_v58 = vld [vmem:[%s7854_s12 + $0x228] sm:$0xff] }
 0xab6   : > { %v7488_v56 = vpop.eup %7487 }
 0xab7   : > { %v3251_v63 = vmul.f32 %v7488_v56, %v7484_v18  ;;  %v3499_v18 = vld [vmem:[%s7854_s12] sm:$0xff]  ;;  %v6444_v56 = vcombine.high %v3515_v48, %v3519_v51 }
 0xab8   : > { %v7490_v59 = vpop.eup %7489  ;;  %v6427_v32 = vcombine.low %v3499_v18, %v3503_v30  ;;  %v6428_v33 = vcombine.high %v3499_v18, %v3503_v30  ;;  %v3555_v30 = vld [vmem:[%s7854_s12 + $0x1c0] sm:$0xff] }
 0xab9   : > { %v3252_v0 = vmul.f32 %v7490_v59, %v7486_v31  ;;  %v3500_v31 = vld [vmem:[%s7854_s12 + $0x8] sm:$0xff]  ;;  %v6446_v59 = vcombine.high %v3516_v52, %v3520_v53 }
 0xaba   : > { %v6429_v41 = vcombine.low %v3500_v31, %v3504_v35  ;;  %v6430_v44 = vcombine.high %v3500_v31, %v3504_v35  ;;  %4309 = vmatprep.subr.bf16.mxu1 %v6428_v33  ;;  %v3559_v31 = vld [vmem:[%s7854_s12 + $0x1e0] sm:$0xff]  ;;  %v3560_v33 = vld [vmem:[%s7854_s12 + $0x1e8] sm:$0xff] }
 0xabb   : > { %v3253_v1 = vpack.c.bf16 %v3252_v0, %v3251_v63  ;;  %v3523_v63 = vld [vmem:[%s7854_s12 + $0xc0] sm:$0xff]  ;;  %v6484_v40 = vcombine.high %v3555_v30, %v3559_v31  ;;  %v6483_v48 = vcombine.low %v3555_v30, %v3559_v31 }
 0xabc   : > { %4352 = vmatprep.subr.bf16.mxu0 %v6430_v44  ;;  %v3527_v0 = vld [vmem:[%s7854_s12 + $0xe0] sm:$0xff] }
 0xabd   : > { %6775 = vmatmul.mubr.msk.bf16.vlgmr.msra.gmra.mrb[8].mxu1 %vm2976_vm2, %v3253_v1  ;;  %v3524_v1 = vld [vmem:[%s7854_s12 + $0xc8] sm:$0xff]  ;;  %v6451_v12 = vcombine.low %v3523_v63, %v3527_v0  ;;  %v3563_v44 = vld [vmem:[%s7854_s12 + $0x200] sm:$0xff] }
 0xabe   : > { %4310 = vmatpush1.bf16.msra.mxu1 %v6427_v32  ;;  %v3556_v32 = vld [vmem:[%s7854_s12 + $0x1c8] sm:$0xff] }
 0xabf   : > { %4311 = vmatprep.subr.bf16.mxu1 %v6436_v45  ;;  %v3567_v45 = vld [vmem:[%s7854_s12 + $0x220] sm:$0xff] }
 0xac0   : > { %v6492_v51 = vcombine.high %v3563_v44, %v3567_v45 }
 0xac2   : > { %4312 = vmatpush1.bf16.msra.mxu1 %v6435_v54  ;;  %v3575_v54 = vld [vmem:[%s7854_s12 + $0x260] sm:$0xff] }
 0xac3   : > { %4313 = vmatprep.subr.bf16.mxu1 %v6444_v56  ;;  %v3576_v56 = vld [vmem:[%s7854_s12 + $0x268] sm:$0xff] }
 0xac6   : > { %4314 = vmatpush1.bf16.msra.mxu1 %v6443_v3 }
 0xb90   : > { %v3294_v4 = vpop.f32.mrb[8].mxu1 }
 0xb91   : > { %v6776_v5 = vpop.f32.mrb[9].mxu1 }
 0xb92   : > { %v3297_v6 = vpop.f32.mrb[10].mxu1  ;;  %v6452_v5 = vcombine.high %v3523_v63, %v3527_v0  ;;  %v6493_v63 = vcombine.low %v3564_v46, %v3568_v58 }
 0xb93   : > { %v3301_v7 = vpack.c.bf16 %v3297_v6, %v3294_v4  ;;  %v6777_v9 = vpop.f32.mrb[11].mxu1  ;;  %v6445_v4 = vcombine.low %v3516_v52, %v3520_v53  ;;  %v6454_v6 = vcombine.high %v3524_v1, %v3528_v2  ;;  %v6494_v52 = vcombine.high %v3564_v46, %v3568_v58  ;;  %v3571_v53 = vld [vmem:[%s7854_s12 + $0x240] sm:$0xff] }
 0xb94   : > { %v3535_v9 = vld [vmem:[%s7854_s12 + $0x120] sm:$0xff]  ;;  %4315 = vmatprep.subr.bf16.mxu1 %v6452_v5  ;;  %v6500_v0 = vcombine.high %v3571_v53, %v3575_v54 }
 0xb95   : > { %3415 = vmatmul.mubr.bf16.vlgmr.msra.gmra.mrb[24].mxu0 %v3301_v7  ;;  %v3531_v7 = vld [vmem:[%s7854_s12 + $0x100] sm:$0xff]  ;;  %4316 = vmatpush1.bf16.msra.mxu1 %v6451_v12 }
 0xb96   : > { %4353 = vmatpush1.bf16.msra.mxu0 %v6429_v41  ;;  %v6486_v41 = vcombine.high %v3556_v32, %v3560_v33  ;;  %v3603_v58 = vld [vmem:[%s7854_s12 + $0x340] sm:$0xff] }
 0xb97   : > { %4354 = vmatprep.subr.bf16.mxu0 %v6438_v49  ;;  %v6485_v49 = vcombine.low %v3556_v32, %v3560_v33  ;;  %v3595_v33 = vld [vmem:[%s7854_s12 + $0x300] sm:$0xff] }
 0xb9a   : > { %4355 = vmatpush1.bf16.msra.mxu0 %v6437_v55  ;;  %v3572_v55 = vld [vmem:[%s7854_s12 + $0x248] sm:$0xff] }
 0xb9b   : > { %4356 = vmatprep.subr.bf16.mxu0 %v6446_v59  ;;  %v6491_v59 = vcombine.low %v3563_v44, %v3567_v45  ;;  %v6501_v3 = vcombine.low %v3572_v55, %v3576_v56 }
 0xb9e   : > { %4357 = vmatpush1.bf16.msra.mxu0 %v6445_v4 }
 0xb9f   : > { %4358 = vmatprep.subr.bf16.mxu0 %v6454_v6 }
 0xc68   : > { %v3416_v17 = vpop.f32.mrb[24].mxu0 }
 0xc69   : > { %v3425_v22 = vadd.f32 %v3416_v17, %v3183_v13  ;;  %v3418_v23 = vpop.f32.mrb[25].mxu0  ;;  %v6453_v13 = vcombine.low %v3524_v1, %v3528_v2  ;;  %v6462_v17 = vcombine.high %v3532_v10, %v3536_v11  ;;  %v6502_v1 = vcombine.high %v3572_v55, %v3576_v56  ;;  %v3611_v56 = vld [vmem:[%s7854_s12 + $0x380] sm:$0xff] }
 0xc6a   : > { %v3426_v25 = vadd.f32 %v3418_v23, %v3184_v15  ;;  %v3420_v57 = vpop.f32.mrb[26].mxu0  ;;  %v6460_v15 = vcombine.high %v3531_v7, %v3535_v9  ;;  %v3540_v23 = vld [vmem:[%s7854_s12 + $0x148] sm:$0xff]  ;;  %v6499_v2 = vcombine.low %v3571_v53, %v3575_v54 }
 0xc6b   : > { %v8486_v60 = vadd.f32 %v7559_v61, %v3425_v22  ;;  %v3427_v34 = vadd.f32 %v3420_v57, %v3185_v19  ;;  %v3422_v14 = vpop.f32.mrb[27].mxu0  ;;  %v3539_v19 = vld [vmem:[%s7854_s12 + $0x140] sm:$0xff]  ;;  %4359 = vmatpush1.bf16.msra.mxu0 %v6453_v13  ;;  %v6461_v57 = vcombine.low %v3532_v10, %v3536_v11 }
 0xc6c   : > { %v8488_v47 = vadd.f32 %v7560_v43, %v3426_v25  ;;  %v3428_v20 = vadd.f32 %v3422_v14, %v3186_v24  ;;  %v3543_v22 = vld [vmem:[%s7854_s12 + $0x160] sm:$0xff]  ;;  %v3544_v24 = vld [vmem:[%s7854_s12 + $0x168] sm:$0xff]  ;;  %v6459_v25 = vcombine.low %v3531_v7, %v3535_v9  ;;  %4317 = vmatprep.subr.bf16.mxu1 %v6460_v15  ;;  %4360 = vmatprep.subr.bf16.mxu0 %v6462_v17 }
 0xc6d   : > { %v8490_v27 = vadd.f32 %v7561_v26, %v3427_v34  ;;  %v6468_v61 = vcombine.high %v3539_v19, %v3543_v22  ;;  %v6470_v34 = vcombine.high %v3540_v23, %v3544_v24  ;;  %v3547_v14 = vld [vmem:[%s7854_s12 + $0x180] sm:$0xff]  ;;  %v3552_v26 = vld [vmem:[%s7854_s12 + $0x1a8] sm:$0xff] }
 0xc6e   : > { %v8492_v28 = vadd.f32 %v7562_v21, %v3428_v20  ;;  %v3435_v16 = vadd.f32 %v8488_v47, %v8486_v60  ;;  %v3551_v43 = vld [vmem:[%s7854_s12 + $0x1a0] sm:$0xff]  ;;  %v3548_v20 = vld [vmem:[%s7854_s12 + $0x188] sm:$0xff]  ;;  %4318 = vmatpush1.bf16.msra.mxu1 %v6459_v25  ;;  %v6467_v21 = vcombine.low %v3539_v19, %v3543_v22 }
 0xc6f   : > { %4361 = vmatpush1.bf16.msra.mxu0 %v6461_v57  ;;  %4319 = vmatprep.subr.bf16.mxu1 %v6468_v61  ;;  %v6478_v18 = vcombine.high %v3548_v20, %v3552_v26  ;;  %v6475_v35 = vcombine.low %v3547_v14, %v3551_v43  ;;  %v6477_v39 = vcombine.low %v3548_v20, %v3552_v26  ;;  %v3583_v25 = vld [vmem:[%s7854_s12 + $0x2a0] sm:$0xff]  ;;  %v3580_v57 = vld [vmem:[%s7854_s12 + $0x288] sm:$0xff] }
 0xc70   : > { %3436 = vadd.xlane.f32.xlu0 %v3435_v16  ;;  %v3438_v29 = vadd.f32 %v8492_v28, %v8490_v27  ;;  %v6469_v16 = vcombine.low %v3540_v23, %v3544_v24  ;;  %4362 = vmatprep.subr.bf16.mxu0 %v6470_v34  ;;  %v3579_v24 = vld [vmem:[%s7854_s12 + $0x280] sm:$0xff]  ;;  %v3584_v34 = vld [vmem:[%s7854_s12 + $0x2a8] sm:$0xff] }
 0xc71   : > { %v6508_v61 = vcombine.high %v3579_v24, %v3583_v25  ;;  %v6510_v20 = vcombine.high %v3580_v57, %v3584_v34  ;;  %v3587_v26 = vld [vmem:[%s7854_s12 + $0x2c0] sm:$0xff] }
 0xc72   : > { %3439 = vadd.xlane.f32.xlu1 %v3438_v29  ;;  %v6476_v29 = vcombine.high %v3547_v14, %v3551_v43  ;;  %4320 = vmatpush1.bf16.msra.mxu1 %v6467_v21  ;;  %v6507_v14 = vcombine.low %v3579_v24, %v3583_v25  ;;  %v6509_v43 = vcombine.low %v3580_v57, %v3584_v34  ;;  %v3591_v21 = vld [vmem:[%s7854_s12 + $0x2e0] sm:$0xff]  ;;  %v3505_v24 = vld [vmem:[%s7854_s12 + $0x30] sm:$0xff]  ;;  %v3502_v25 = vld [vmem:[%s7854_s12 + $0x18] sm:$0xff] }
 0xc73   : > { %4363 = vmatpush1.bf16.msra.mxu0 %v6469_v16  ;;  %v3588_v16 = vld [vmem:[%s7854_s12 + $0x2c8] sm:$0xff]  ;;  %v6515_v30 = vcombine.low %v3587_v26, %v3591_v21 }
 0xc74   : > { %4321 = vmatprep.subr.bf16.mxu1 %v6476_v29  ;;  %4364 = vmatprep.subr.bf16.mxu0 %v6478_v18  ;;  %v6516_v29 = vcombine.high %v3587_v26, %v3591_v21  ;;  %v3592_v18 = vld [vmem:[%s7854_s12 + $0x2e8] sm:$0xff] }
 0xc75   : > { %v6517_v31 = vcombine.low %v3588_v16, %v3592_v18  ;;  %v6518_v32 = vcombine.high %v3588_v16, %v3592_v18 }
 0xc76   : > { %4322 = vmatpush1.bf16.msra.mxu1 %v6475_v35  ;;  %v3599_v35 = vld [vmem:[%s7854_s12 + $0x320] sm:$0xff] }
 0xc77   : > { %4365 = vmatpush1.bf16.msra.mxu0 %v6477_v39  ;;  %4323 = vmatprep.subr.bf16.mxu1 %v6484_v40  ;;  %v3596_v39 = vld [vmem:[%s7854_s12 + $0x308] sm:$0xff]  ;;  %v6524_v40 = vcombine.high %v3595_v33, %v3599_v35  ;;  %v6523_v44 = vcombine.low %v3595_v33, %v3599_v35 }
 0xc78   : > { %4366 = vmatprep.subr.bf16.mxu0 %v6486_v41  ;;  %v3600_v41 = vld [vmem:[%s7854_s12 + $0x328] sm:$0xff] }
 0xc79   : > { %v6525_v45 = vcombine.low %v3596_v39, %v3600_v41  ;;  %v6526_v46 = vcombine.high %v3596_v39, %v3600_v41 }
 0xc7a   : > { %4324 = vmatpush1.bf16.msra.mxu1 %v6483_v48  ;;  %v3607_v48 = vld [vmem:[%s7854_s12 + $0x360] sm:$0xff] }
 0xc7b   : > { %4367 = vmatpush1.bf16.msra.mxu0 %v6485_v49  ;;  %4325 = vmatprep.subr.bf16.mxu1 %v6492_v51  ;;  %v3604_v49 = vld [vmem:[%s7854_s12 + $0x348] sm:$0xff]  ;;  %v6532_v51 = vcombine.high %v3603_v58, %v3607_v48  ;;  %v6531_v53 = vcombine.low %v3603_v58, %v3607_v48 }
 0xc7c   : > { %4368 = vmatprep.subr.bf16.mxu0 %v6494_v52  ;;  %v3608_v52 = vld [vmem:[%s7854_s12 + $0x368] sm:$0xff] }
 0xc7d   : > { %v6533_v54 = vcombine.low %v3604_v49, %v3608_v52  ;;  %v6534_v55 = vcombine.high %v3604_v49, %v3608_v52 }
 0xc7e   : > { %4326 = vmatpush1.bf16.msra.mxu1 %v6491_v59  ;;  %v3615_v59 = vld [vmem:[%s7854_s12 + $0x3a0] sm:$0xff] }
 0xc7f   : > { %4369 = vmatpush1.bf16.msra.mxu0 %v6493_v63  ;;  %4327 = vmatprep.subr.bf16.mxu1 %v6500_v0  ;;  %v3612_v63 = vld [vmem:[%s7854_s12 + $0x388] sm:$0xff]  ;;  %v6540_v0 = vcombine.high %v3611_v56, %v3615_v59 }
 0xc80   : > { %4370 = vmatprep.subr.bf16.mxu0 %v6502_v1  ;;  %v3616_v1 = vld [vmem:[%s7854_s12 + $0x3a8] sm:$0xff] }
 0xc82   : > { %4328 = vmatpush1.bf16.msra.mxu1 %v6499_v2  ;;  %v6539_v2 = vcombine.low %v3611_v56, %v3615_v59  ;;  %v3513_v56 = vld [vmem:[%s7854_s12 + $0x70] sm:$0xff]  ;;  %v3510_v59 = vld [vmem:[%s7854_s12 + $0x58] sm:$0xff] }
 0xc83   : > { %4371 = vmatpush1.bf16.msra.mxu0 %v6501_v3  ;;  %4329 = vmatprep.subr.bf16.mxu1 %v6508_v61  ;;  %v6541_v3 = vcombine.low %v3612_v63, %v3616_v1  ;;  %v3506_v61 = vld [vmem:[%s7854_s12 + $0x38] sm:$0xff] }
 0xc84   : > { %4372 = vmatprep.subr.bf16.mxu0 %v6510_v20 }
 0xc86   : > { %4330 = vmatpush1.bf16.msra.mxu1 %v6507_v14  ;;  %v6433_v14 = vcombine.low %v3502_v25, %v3506_v61 }
 0xc87   : > { %4373 = vmatpush1.bf16.msra.mxu0 %v6509_v43  ;;  %4331 = vmatprep.subr.bf16.mxu1 %v6516_v29  ;;  %v6434_v43 = vcombine.high %v3502_v25, %v3506_v61 }
 0xc88   : > { %4374 = vmatprep.subr.bf16.mxu0 %v6518_v32 }
 0xc8a   : > { %4332 = vmatpush1.bf16.msra.mxu1 %v6515_v30  ;;  %v3433_v30 = vld [vmem:[%s9105_s19] sm:$0x3] }
 0xc8b   : > { %4375 = vmatpush1.bf16.msra.mxu0 %v6517_v31  ;;  %4333 = vmatprep.subr.bf16.mxu1 %v6524_v40  ;;  %v3434_v31 = vld [vmem:[%s9107_s21] sm:$0x3]  ;;  %v3475_v32 = vrot.slane %v3433_v30, %v8224_v37  ;;  %v3471_v33 = vrot.slane %v3433_v30, %v8227_v38  ;;  %v3545_v30 = vld [vmem:[%s7854_s12 + $0x170] sm:$0xff] }
 0xc8c   : > { %4376 = vmatprep.subr.bf16.mxu0 %v6526_v46 }
 0xc8e   : > { %4334 = vmatpush1.bf16.msra.mxu1 %v6523_v44  ;;  %v3490_v44 = vrot.slane %v3434_v31, %v8224_v37 }
 0xc8f   : > { %4377 = vmatpush1.bf16.msra.mxu0 %v6525_v45  ;;  %4335 = vmatprep.subr.bf16.mxu1 %v6532_v51  ;;  %v3486_v45 = vrot.slane %v3434_v31, %v8227_v38  ;;  %v3542_v31 = vld [vmem:[%s7854_s12 + $0x158] sm:$0xff] }
 0xc90   : > { %4378 = vmatprep.subr.bf16.mxu0 %v6534_v55  ;;  %v3509_v55 = vld [vmem:[%s7854_s12 + $0x50] sm:$0xff] }
 0xc92   : > { %4336 = vmatpush1.bf16.msra.mxu1 %v6531_v53 }
 0xc93   : > { %4379 = vmatpush1.bf16.msra.mxu0 %v6533_v54  ;;  %4337 = vmatprep.subr.bf16.mxu1 %v6540_v0 }
 0xc96   : > { %4338 = vmatpush1.bf16.msra.mxu1 %v6539_v2 }
 0xcfd   : > { %v3437_v4 = vpop.xlane.xlu0 %3436 }
 0xcfe   : > { %v3441_v5 = vmul.f32 0.00390625, %v3437_v4  ;;  %v6542_v4 = vcombine.high %v3612_v63, %v3616_v1  ;;  %v3514_v63 = vld [vmem:[%s7854_s12 + $0x78] sm:$0xff]  ;;  %v3517_v1 = vld [vmem:[%s7854_s12 + $0x90] sm:$0xff] }
 0xcff   : > { %v3440_v6 = vpop.xlane.xlu1 %3439  ;;  %v6442_v2 = vcombine.high %v3510_v59, %v3514_v63 }
 0xd00   : > { %v8539_v7 = vsub.f32 %v8486_v60, %v3441_v5  ;;  %v8542_v9 = vsub.f32 %v8488_v47, %v3441_v5  ;;  %v3442_v10 = vmul.f32 0.00390625, %v3440_v6  ;;  %v3619_v5 = vld [vmem:[%s7854_s12 + $0x3c0] sm:$0xff]  ;;  %4380 = vmatprep.subr.bf16.mxu0 %v6542_v4  ;;  %v3518_v4 = vld [vmem:[%s7854_s12 + $0x98] sm:$0xff] }
 0xd01   : > { %v3623_v6 = vld [vmem:[%s7854_s12 + $0x3e0] sm:$0xff]  ;;  %4381 = vmatpush1.bf16.msra.mxu0 %v6541_v3  ;;  %v3521_v3 = vld [vmem:[%s7854_s12 + $0xb0] sm:$0xff] }
 0xd02   : > { %v8545_v11 = vsub.f32 %v8490_v27, %v3442_v10  ;;  %v8548_v12 = vsub.f32 %v8492_v28, %v3442_v10  ;;  %v3447_v13 = vmul.f32 %v8539_v7, %v8539_v7  ;;  %v3448_v15 = vmul.f32 %v8542_v9, %v8542_v9  ;;  %v3620_v10 = vld [vmem:[%s7854_s12 + $0x3c8] sm:$0xff] }
 0xd04   : > { %v3451_v17 = vadd.f32 %v3448_v15, %v3447_v13  ;;  %v3449_v19 = vmul.f32 %v8545_v11, %v8545_v11  ;;  %v3450_v22 = vmul.f32 %v8548_v12, %v8548_v12  ;;  %v6548_v13 = vcombine.high %v3619_v5, %v3623_v6  ;;  %v3624_v15 = vld [vmem:[%s7854_s12 + $0x3e8] sm:$0xff] }
 0xd06   : > { %3452 = vadd.xlane.f32.xlu0 %v3451_v17  ;;  %v3454_v23 = vadd.f32 %v3450_v22, %v3449_v19  ;;  %v6547_v17 = vcombine.low %v3619_v5, %v3623_v6  ;;  %v6550_v19 = vcombine.high %v3620_v10, %v3624_v15  ;;  %4339 = vmatprep.subr.bf16.mxu1 %v6548_v13  ;;  %v3522_v5 = vld [vmem:[%s7854_s12 + $0xb8] sm:$0xff] }
 0xd07   : > { %v6549_v22 = vcombine.low %v3620_v10, %v3624_v15  ;;  %v6439_v6 = vcombine.low %v3509_v55, %v3513_v56  ;;  %v6441_v10 = vcombine.low %v3510_v59, %v3514_v63  ;;  %v6448_v13 = vcombine.high %v3517_v1, %v3521_v3  ;;  %v3565_v63 = vld [vmem:[%s7854_s12 + $0x210] sm:$0xff] }
 0xd08   : > { %3455 = vadd.xlane.f32.xlu1 %v3454_v23  ;;  %4382 = vmatprep.subr.bf16.mxu0 %v6550_v19  ;;  %v3501_v23 = vld [vmem:[%s7854_s12 + $0x10] sm:$0xff]  ;;  %v6450_v15 = vcombine.high %v3518_v4, %v3522_v5  ;;  %v6449_v25 = vcombine.low %v3518_v4, %v3522_v5 }
 0xd09   : > { %4340 = vmatpush1.bf16.msra.mxu1 %v6547_v17  ;;  %4383 = vmatpush1.bf16.msra.mxu0 %v6549_v22  ;;  %v6432_v57 = vcombine.high %v3501_v23, %v3505_v24  ;;  %v6431_v34 = vcombine.low %v3501_v23, %v3505_v24  ;;  %v3525_v17 = vld [vmem:[%s7854_s12 + $0xd0] sm:$0xff]  ;;  %v3526_v22 = vld [vmem:[%s7854_s12 + $0xd8] sm:$0xff]  ;;  %v6447_v24 = vcombine.low %v3517_v1, %v3521_v3 }
 0xd0a   : > { %4438 = vmatprep.subr.bf16.mxu0 %v6434_v43  ;;  %v3529_v19 = vld [vmem:[%s7854_s12 + $0xf0] sm:$0xff]  ;;  %v3530_v23 = vld [vmem:[%s7854_s12 + $0xf8] sm:$0xff] }
 0xd0b   : > { %4395 = vmatprep.subr.bf16.mxu1 %v6432_v57  ;;  %v6456_v57 = vcombine.high %v3525_v17, %v3529_v19  ;;  %v6458_v61 = vcombine.high %v3526_v22, %v3530_v23  ;;  %v3534_v43 = vld [vmem:[%s7854_s12 + $0x118] sm:$0xff] }
 0xd0c   : > { %v3566_v1 = vld [vmem:[%s7854_s12 + $0x218] sm:$0xff] }
 0xd93   : > { %v3453_v20 = vpop.xlane.xlu0 %3452 }
 0xd94   : > { %v3457_v26 = vmul.f32 0.00390625, %v3453_v20  ;;  %v3538_v20 = vld [vmem:[%s7854_s12 + $0x138] sm:$0xff] }
 0xd95   : > { %v3456_v21 = vpop.xlane.xlu1 %3455 }
 0xd96   : > { %v3459_v16 = vadd.f32 1e-05, %v3457_v26  ;;  %v3458_v29 = vmul.f32 0.00390625, %v3456_v21  ;;  %v6455_v26 = vcombine.low %v3525_v17, %v3529_v19  ;;  %v6457_v21 = vcombine.low %v3526_v22, %v3530_v23 }
 0xd98   : > { %7491 = vrsqrt.f32 %v3459_v16  ;;  %v3460_v18 = vadd.f32 1e-05, %v3458_v29  ;;  %v6466_v29 = vcombine.high %v3534_v43, %v3538_v20 }
 0xd9a   : > { %7493 = vrsqrt.f32 %v3460_v18  ;;  %v3541_v18 = vld [vmem:[%s7854_s12 + $0x150] sm:$0xff] }
 0xda2   : > { %v7492_v35 = vpop.eup %7491 }
 0xda3   : > { %v3463_v39 = vmul.f32 %v7492_v35, %v8539_v7  ;;  %v3464_v40 = vmul.f32 %v7492_v35, %v8542_v9  ;;  %v6465_v35 = vcombine.low %v3534_v43, %v3538_v20 }
 0xda4   : > { %v7494_v41 = vpop.eup %7493 }
 0xda5   : > { %v3465_v46 = vmul.f32 %v7494_v41, %v8545_v11  ;;  %v3466_v58 = vmul.f32 %v7494_v41, %v8548_v12  ;;  %v3479_v48 = vmul.f32 %v3475_v32, %v3464_v40  ;;  %v3478_v49 = vmul.f32 %v3471_v33, %v3463_v39  ;;  %v3549_v41 = vld [vmem:[%s7854_s12 + $0x190] sm:$0xff] }
 0xda6   : > { %v6440_v12 = vcombine.high %v3509_v55, %v3513_v56  ;;  %v6472_v39 = vcombine.high %v3541_v18, %v3545_v30 }
 0xda7   : > { %v3481_v51 = vmul.f32 %v3475_v32, %v3466_v58  ;;  %v3480_v52 = vmul.f32 %v3471_v33, %v3465_v46  ;;  %v3494_v7 = vadd.f32 %v3490_v44, %v3479_v48  ;;  %v3493_v53 = vadd.f32 %v3486_v45, %v3478_v49  ;;  %v3546_v32 = vld [vmem:[%s7854_s12 + $0x178] sm:$0xff] }
 0xda8   : > { %v6474_v40 = vcombine.high %v3542_v31, %v3546_v32  ;;  %v3554_v46 = vld [vmem:[%s7854_s12 + $0x1b8] sm:$0xff]  ;;  %v6471_v58 = vcombine.low %v3541_v18, %v3545_v30  ;;  %v6473_v48 = vcombine.low %v3542_v31, %v3546_v32 }
 0xda9   : > { %v3496_v9 = vadd.f32 %v3490_v44, %v3481_v51  ;;  %v3495_v54 = vadd.f32 %v3486_v45, %v3480_v52  ;;  %v3553_v44 = vld [vmem:[%s7854_s12 + $0x1b0] sm:$0xff]  ;;  %v3550_v45 = vld [vmem:[%s7854_s12 + $0x198] sm:$0xff] }
 0xdaa   : > { %v6480_v49 = vcombine.high %v3549_v41, %v3553_v44  ;;  %v6482_v51 = vcombine.high %v3550_v45, %v3554_v46  ;;  %v3557_v52 = vld [vmem:[%s7854_s12 + $0x1d0] sm:$0xff]  ;;  %v6481_v55 = vcombine.low %v3550_v45, %v3554_v46 }
 0xdab   : > { %v3498_v0 = vpack.c.bf16 %v3496_v9, %v3494_v7  ;;  %v8608_v11 = vpack.c.bf16 %v3495_v54, %v3493_v53  ;;  %v3561_v7 = vld [vmem:[%s7854_s12 + $0x1f0] sm:$0xff]  ;;  %v3558_v9 = vld [vmem:[%s7854_s12 + $0x1d8] sm:$0xff]  ;;  %v6479_v54 = vcombine.low %v3549_v41, %v3553_v44 }
 0xdac   : > { %v3562_v53 = vld [vmem:[%s7854_s12 + $0x1f8] sm:$0xff]  ;;  %v6488_v56 = vcombine.high %v3557_v52, %v3561_v7 }
 0xdad   : > { %4341 = vmatprep.mubr.bf16.mxu1 %v3498_v0  ;;  %4384 = vmatprep.mubr.bf16.mxu0 %v3498_v0  ;;  %v6490_v59 = vcombine.high %v3558_v9, %v3562_v53  ;;  %v6489_v3 = vcombine.low %v3558_v9, %v3562_v53 }
 0xdae   : > { %4342 = vmatmul.mubr.bf16.vlgmr.msra.gmra.mrb[12].mxu1 %v8608_v11  ;;  %4385 = vmatmul.mubr.bf16.vlgmr.msra.gmra.mrb[28].mxu0 %v8608_v11 }
 0xdaf   : > { %4396 = vmatpush1.bf16.msra.mxu1 %v6431_v34  ;;  %4439 = vmatpush1.bf16.msra.mxu0 %v6433_v14  ;;  %v3533_v34 = vld [vmem:[%s7854_s12 + $0x110] sm:$0xff] }
 0xdb0   : > { %4427 = vmatprep.mubr.bf16.mxu1 %v3498_v0  ;;  %4470 = vmatprep.mubr.bf16.mxu0 %v3498_v0  ;;  %v3537_v14 = vld [vmem:[%s7854_s12 + $0x130] sm:$0xff] }
 0xdb1   : > { %4397 = vmatprep.subr.bf16.mxu1 %v6440_v12  ;;  %4440 = vmatprep.subr.bf16.mxu0 %v6442_v2  ;;  %v6464_v16 = vcombine.high %v3533_v34, %v3537_v14  ;;  %v6463_v33 = vcombine.low %v3533_v34, %v3537_v14  ;;  %v3569_v0 = vld [vmem:[%s7854_s12 + $0x230] sm:$0xff]  ;;  %v3570_v12 = vld [vmem:[%s7854_s12 + $0x238] sm:$0xff]  ;;  %v6487_v2 = vcombine.low %v3557_v52, %v3561_v7 }
 0xdb2   : > { %v6496_v4 = vcombine.high %v3565_v63, %v3569_v0  ;;  %v6498_v5 = vcombine.high %v3566_v1, %v3570_v12  ;;  %v6495_v17 = vcombine.low %v3565_v63, %v3569_v0  ;;  %v6497_v19 = vcombine.low %v3566_v1, %v3570_v12 }
 0xdb3   : > { %4398 = vmatpush1.bf16.msra.mxu1 %v6439_v6  ;;  %4441 = vmatpush1.bf16.msra.mxu0 %v6441_v10  ;;  %v3573_v6 = vld [vmem:[%s7854_s12 + $0x250] sm:$0xff] }
 0xdb4   : > { %4399 = vmatprep.subr.bf16.mxu1 %v6448_v13  ;;  %4442 = vmatprep.subr.bf16.mxu0 %v6450_v15  ;;  %v3577_v10 = vld [vmem:[%s7854_s12 + $0x270] sm:$0xff]  ;;  %v3574_v13 = vld [vmem:[%s7854_s12 + $0x258] sm:$0xff] }
 0xdb5   : > { %v3578_v15 = vld [vmem:[%s7854_s12 + $0x278] sm:$0xff]  ;;  %v6504_v22 = vcombine.high %v3573_v6, %v3577_v10  ;;  %v6503_v34 = vcombine.low %v3573_v6, %v3577_v10 }
 0xdb6   : > { %v6506_v23 = vcombine.high %v3574_v13, %v3578_v15  ;;  %v6505_v14 = vcombine.low %v3574_v13, %v3578_v15 }
 0xdb7   : > { %4400 = vmatpush1.bf16.msra.mxu1 %v6447_v24  ;;  %4443 = vmatpush1.bf16.msra.mxu0 %v6449_v25  ;;  %v3581_v24 = vld [vmem:[%s7854_s12 + $0x290] sm:$0xff] }
 0xdb8   : > { %4401 = vmatprep.subr.bf16.mxu1 %v6456_v57  ;;  %4444 = vmatprep.subr.bf16.mxu0 %v6458_v61  ;;  %v3585_v25 = vld [vmem:[%s7854_s12 + $0x2b0] sm:$0xff]  ;;  %v3582_v57 = vld [vmem:[%s7854_s12 + $0x298] sm:$0xff] }
 0xdb9   : > { %v3586_v61 = vld [vmem:[%s7854_s12 + $0x2b8] sm:$0xff]  ;;  %v6512_v43 = vcombine.high %v3581_v24, %v3585_v25  ;;  %v6511_v18 = vcombine.low %v3581_v24, %v3585_v25 }
 0xdba   : > { %v6514_v20 = vcombine.high %v3582_v57, %v3586_v61  ;;  %v6513_v30 = vcombine.low %v3582_v57, %v3586_v61  ;;  %v7284_v24 = vld [vmem:[%s7864_s2 + $0x14] ss:$8 sps:$4 sm:$0xff]   ;;  %v7282_v25 = vld [vmem:[%s7864_s2 + $0x10] ss:$8 sps:$4 sm:$0xff]   ;;  %v7287_v57 = vld [vmem:[%s7864_s2 + $0x24] ss:$8 sps:$4 sm:$0xff]  }
 0xdbb   : > { %4402 = vmatpush1.bf16.msra.mxu1 %v6455_v26  ;;  %4445 = vmatpush1.bf16.msra.mxu0 %v6457_v21  ;;  %v3589_v26 = vld [vmem:[%s7854_s12 + $0x2d0] sm:$0xff]  ;;  %v7285_v61 = vld [vmem:[%s7864_s2 + $0x20] ss:$8 sps:$4 sm:$0xff]  }
 0xdbc   : > { %4403 = vmatprep.subr.bf16.mxu1 %v6464_v16  ;;  %4446 = vmatprep.subr.bf16.mxu0 %v6466_v29  ;;  %v3593_v21 = vld [vmem:[%s7854_s12 + $0x2f0] sm:$0xff]  ;;  %v3590_v16 = vld [vmem:[%s7854_s12 + $0x2d8] sm:$0xff] }
 0xdbd   : > { %v3594_v29 = vld [vmem:[%s7854_s12 + $0x2f8] sm:$0xff]  ;;  %v6520_v31 = vcombine.high %v3589_v26, %v3593_v21  ;;  %v6519_v41 = vcombine.low %v3589_v26, %v3593_v21  ;;  %v7299_v21 = vld [vmem:[%s7864_s2 + $0x64] ss:$8 sps:$4 sm:$0xff]  }
 0xdbe   : > { %v6522_v32 = vcombine.high %v3590_v16, %v3594_v29  ;;  %v6521_v44 = vcombine.low %v3590_v16, %v3594_v29  ;;  %v7294_v26 = vld [vmem:[%s7864_s2 + $0x50] ss:$8 sps:$4 sm:$0xff]   ;;  %v7297_v16 = vld [vmem:[%s7864_s2 + $0x60] ss:$8 sps:$4 sm:$0xff]   ;;  %v7302_v29 = vld [vmem:[%s7864_s2 + $0x74] ss:$8 sps:$4 sm:$0xff]  }
 0xdbf   : > { %4404 = vmatpush1.bf16.msra.mxu1 %v6463_v33  ;;  %4447 = vmatpush1.bf16.msra.mxu0 %v6465_v35  ;;  %v3597_v33 = vld [vmem:[%s7854_s12 + $0x310] sm:$0xff] }
 0xdc0   : > { %4405 = vmatprep.subr.bf16.mxu1 %v6472_v39  ;;  %4448 = vmatprep.subr.bf16.mxu0 %v6474_v40  ;;  %v3601_v35 = vld [vmem:[%s7854_s12 + $0x330] sm:$0xff]  ;;  %v3598_v39 = vld [vmem:[%s7854_s12 + $0x318] sm:$0xff] }
 0xdc1   : > { %v3602_v40 = vld [vmem:[%s7854_s12 + $0x338] sm:$0xff]  ;;  %v6528_v45 = vcombine.high %v3597_v33, %v3601_v35  ;;  %v6527_v52 = vcombine.low %v3597_v33, %v3601_v35  ;;  %v7311_v35 = vld [vmem:[%s7864_s2 + $0xa4] ss:$8 sps:$4 sm:$0xff]  }
 0xdc2   : > { %v6530_v46 = vcombine.high %v3598_v39, %v3602_v40  ;;  %v6529_v7 = vcombine.low %v3598_v39, %v3602_v40  ;;  %v7306_v33 = vld [vmem:[%s7864_s2 + $0x90] ss:$8 sps:$4 sm:$0xff]   ;;  %v7309_v39 = vld [vmem:[%s7864_s2 + $0xa0] ss:$8 sps:$4 sm:$0xff]   ;;  %v7314_v40 = vld [vmem:[%s7864_s2 + $0xb4] ss:$8 sps:$4 sm:$0xff]  }
 0xdc3   : > { %4406 = vmatpush1.bf16.msra.mxu1 %v6471_v58  ;;  %4449 = vmatpush1.bf16.msra.mxu0 %v6473_v48  ;;  %v3605_v58 = vld [vmem:[%s7854_s12 + $0x350] sm:$0xff] }
 0xdc4   : > { %4407 = vmatprep.subr.bf16.mxu1 %v6480_v49  ;;  %4450 = vmatprep.subr.bf16.mxu0 %v6482_v51  ;;  %v3609_v48 = vld [vmem:[%s7854_s12 + $0x370] sm:$0xff]  ;;  %v3606_v49 = vld [vmem:[%s7854_s12 + $0x358] sm:$0xff] }
 0xdc5   : > { %v3610_v51 = vld [vmem:[%s7854_s12 + $0x378] sm:$0xff]  ;;  %v6536_v9 = vcombine.high %v3605_v58, %v3609_v48  ;;  %v6535_v63 = vcombine.low %v3605_v58, %v3609_v48  ;;  %v7323_v48 = vld [vmem:[%s7864_s2 + $0xe4] ss:$8 sps:$4 sm:$0xff]  }
 0xdc6   : > { %v6538_v53 = vcombine.high %v3606_v49, %v3610_v51  ;;  %v6537_v0 = vcombine.low %v3606_v49, %v3610_v51  ;;  %v7318_v58 = vld [vmem:[%s7864_s2 + $0xd0] ss:$8 sps:$4 sm:$0xff]   ;;  %v7321_v49 = vld [vmem:[%s7864_s2 + $0xe0] ss:$8 sps:$4 sm:$0xff]   ;;  %v7326_v51 = vld [vmem:[%s7864_s2 + $0xf4] ss:$8 sps:$4 sm:$0xff]  }
 0xdc7   : > { %4408 = vmatpush1.bf16.msra.mxu1 %v6479_v54  ;;  %4451 = vmatpush1.bf16.msra.mxu0 %v6481_v55  ;;  %v3613_v54 = vld [vmem:[%s7854_s12 + $0x390] sm:$0xff] }
 0xdc8   : > { %4409 = vmatprep.subr.bf16.mxu1 %v6488_v56  ;;  %4452 = vmatprep.subr.bf16.mxu0 %v6490_v59  ;;  %v3617_v55 = vld [vmem:[%s7854_s12 + $0x3b0] sm:$0xff]  ;;  %v3614_v56 = vld [vmem:[%s7854_s12 + $0x398] sm:$0xff] }
 0xdc9   : > { %v3618_v59 = vld [vmem:[%s7854_s12 + $0x3b8] sm:$0xff]  ;;  %v6544_v1 = vcombine.high %v3613_v54, %v3617_v55  ;;  %v6543_v6 = vcombine.low %v3613_v54, %v3617_v55 }
 0xdca   : > { %v6546_v12 = vcombine.high %v3614_v56, %v3618_v59  ;;  %v6545_v10 = vcombine.low %v3614_v56, %v3618_v59 }
 0xdcb   : > { %4410 = vmatpush1.bf16.msra.mxu1 %v6487_v2  ;;  %4453 = vmatpush1.bf16.msra.mxu0 %v6489_v3  ;;  %v3621_v2 = vld [vmem:[%s7854_s12 + $0x3d0] sm:$0xff] }
 0xdcc   : > { %4411 = vmatprep.subr.bf16.mxu1 %v6496_v4  ;;  %4454 = vmatprep.subr.bf16.mxu0 %v6498_v5  ;;  %v3625_v3 = vld [vmem:[%s7854_s12 + $0x3f0] sm:$0xff]  ;;  %v3622_v4 = vld [vmem:[%s7854_s12 + $0x3d8] sm:$0xff] }
 0xdcd   : > { %v3626_v5 = vld [vmem:[%s7854_s12 + $0x3f8] sm:$0xff]  ;;  %v6552_v13 = vcombine.high %v3621_v2, %v3625_v3 }
 0xdce   : > { %v6554_v15 = vcombine.high %v3622_v4, %v3626_v5 }
 0xdcf   : > { %4412 = vmatpush1.bf16.msra.mxu1 %v6495_v17  ;;  %4455 = vmatpush1.bf16.msra.mxu0 %v6497_v19  ;;  %v6551_v17 = vcombine.low %v3621_v2, %v3625_v3  ;;  %v6553_v19 = vcombine.low %v3622_v4, %v3626_v5 }
 0xdd0   : > { %4413 = vmatprep.subr.bf16.mxu1 %v6504_v22  ;;  %4456 = vmatprep.subr.bf16.mxu0 %v6506_v23  ;;  %v7281_v22 = vld [vmem:[%s7864_s2 + $0x4] ss:$8 sps:$4 sm:$0xff]   ;;  %v7279_v23 = vld [vmem:[%s7864_s2] ss:$8 sps:$4 sm:$0xff]  }
 0xdd3   : > { %4414 = vmatpush1.bf16.msra.mxu1 %v6503_v34  ;;  %4457 = vmatpush1.bf16.msra.mxu0 %v6505_v14  ;;  %v7290_v34 = vld [vmem:[%s7864_s2 + $0x34] ss:$8 sps:$4 sm:$0xff]   ;;  %v7288_v14 = vld [vmem:[%s7864_s2 + $0x30] ss:$8 sps:$4 sm:$0xff]  }
 0xdd4   : > { %4415 = vmatprep.subr.bf16.mxu1 %v6512_v43  ;;  %4458 = vmatprep.subr.bf16.mxu0 %v6514_v20  ;;  %v7293_v43 = vld [vmem:[%s7864_s2 + $0x44] ss:$8 sps:$4 sm:$0xff]   ;;  %v7296_v20 = vld [vmem:[%s7864_s2 + $0x54] ss:$8 sps:$4 sm:$0xff]  }
 0xdd7   : > { %4416 = vmatpush1.bf16.msra.mxu1 %v6511_v18  ;;  %4459 = vmatpush1.bf16.msra.mxu0 %v6513_v30  ;;  %v7300_v18 = vld [vmem:[%s7864_s2 + $0x70] ss:$8 sps:$4 sm:$0xff]   ;;  %v7305_v30 = vld [vmem:[%s7864_s2 + $0x84] ss:$8 sps:$4 sm:$0xff]  }
 0xdd8   : > { %4417 = vmatprep.subr.bf16.mxu1 %v6520_v31  ;;  %4460 = vmatprep.subr.bf16.mxu0 %v6522_v32  ;;  %v7303_v31 = vld [vmem:[%s7864_s2 + $0x80] ss:$8 sps:$4 sm:$0xff]   ;;  %v7308_v32 = vld [vmem:[%s7864_s2 + $0x94] ss:$8 sps:$4 sm:$0xff]  }
 0xddb   : > { %4418 = vmatpush1.bf16.msra.mxu1 %v6519_v41  ;;  %4461 = vmatpush1.bf16.msra.mxu0 %v6521_v44  ;;  %v7312_v41 = vld [vmem:[%s7864_s2 + $0xb0] ss:$8 sps:$4 sm:$0xff]   ;;  %v7317_v44 = vld [vmem:[%s7864_s2 + $0xc4] ss:$8 sps:$4 sm:$0xff]  }
 0xddc   : > { %4419 = vmatprep.subr.bf16.mxu1 %v6528_v45  ;;  %4462 = vmatprep.subr.bf16.mxu0 %v6530_v46  ;;  %v7315_v45 = vld [vmem:[%s7864_s2 + $0xc0] ss:$8 sps:$4 sm:$0xff]   ;;  %v7320_v46 = vld [vmem:[%s7864_s2 + $0xd4] ss:$8 sps:$4 sm:$0xff]  }
 0xddf   : > { %4420 = vmatpush1.bf16.msra.mxu1 %v6527_v52  ;;  %4463 = vmatpush1.bf16.msra.mxu0 %v6529_v7  ;;  %v7324_v52 = vld [vmem:[%s7864_s2 + $0xf0] ss:$8 sps:$4 sm:$0xff]   ;;  %v7329_v7 = vld [vmem:[%s7864_s2 + $0x104] ss:$8 sps:$4 sm:$0xff]  }
 0xde0   : > { %4421 = vmatprep.subr.bf16.mxu1 %v6536_v9  ;;  %4464 = vmatprep.subr.bf16.mxu0 %v6538_v53  ;;  %v8704_v9 = vld [vmem:[%s7859_s30] sm:$0xff] }
 0xde1   : > { %v3632_v53 = vrot.slane %v8704_v9, %v8227_v38  ;;  %v3640_v54 = vrot.slane %v8704_v9, %v2023_v42  ;;  %v3636_v55 = vrot.slane %v8704_v9, %v8224_v37  ;;  %v3644_v56 = vrot.slane %v8704_v9, %v2027_v8 }
 0xde3   : > { %4422 = vmatpush1.bf16.msra.mxu1 %v6535_v63  ;;  %4465 = vmatpush1.bf16.msra.mxu0 %v6537_v0 }
 0xde4   : > { %4423 = vmatprep.subr.bf16.mxu1 %v6544_v1  ;;  %4466 = vmatprep.subr.bf16.mxu0 %v6546_v12 }
 0xde7   : > { %4424 = vmatpush1.bf16.msra.mxu1 %v6543_v6  ;;  %4467 = vmatpush1.bf16.msra.mxu0 %v6545_v10 }
 0xde8   : > { %4425 = vmatprep.subr.bf16.mxu1 %v6552_v13  ;;  %4468 = vmatprep.subr.bf16.mxu0 %v6554_v15 }
 0xdeb   : > { %4426 = vmatpush1.bf16.msra.mxu1 %v6551_v17  ;;  %4469 = vmatpush1.bf16.msra.mxu0 %v6553_v19 }
 0xdec   : > { %5381 = vmatprep.subr.bf16.mxu1 %v7281_v22 }
 0xdee   : > { %4428 = vmatmul.mubr.bf16.vlgmr.msra.gmra.mrb[16].mxu1 %v8608_v11  ;;  %4471 = vmatmul.mubr.bf16.vlgmr.msra.gmra.mrb[32].mxu0 %v8608_v11  ;;  %v7291_v11 = vld [vmem:[%s7864_s2 + $0x40] ss:$8 sps:$4 sm:$0xff]  }
 0xdef   : > { %5382 = vmatpush1.bf16.msra.mxu1 %v7279_v23 }
 0xdf0   : > { %5383 = vmatprep.subr.bf16.mxu1 %v7284_v24 }
 0xdf3   : > { %5384 = vmatpush1.bf16.msra.mxu1 %v7282_v25 }
 0xdf4   : > { %5385 = vmatprep.subr.bf16.mxu1 %v7287_v57 }
 0xdf7   : > { %5386 = vmatpush1.bf16.msra.mxu1 %v7285_v61 }
 0xdf8   : > { %5387 = vmatprep.subr.bf16.mxu1 %v7290_v34 }
 0xdfb   : > { %5388 = vmatpush1.bf16.msra.mxu1 %v7288_v14 }
 0xdfc   : > { %5389 = vmatprep.subr.bf16.mxu1 %v7293_v43 }
 0xdff   : > { %5390 = vmatpush1.bf16.msra.mxu1 %v7291_v11 }
 0xe00   : > { %5391 = vmatprep.subr.bf16.mxu1 %v7296_v20 }
 0xe03   : > { %5392 = vmatpush1.bf16.msra.mxu1 %v7294_v26 }
 0xe04   : > { %5393 = vmatprep.subr.bf16.mxu1 %v7299_v21 }
 0xe07   : > { %5394 = vmatpush1.bf16.msra.mxu1 %v7297_v16 }
 0xe08   : > { %5395 = vmatprep.subr.bf16.mxu1 %v7302_v29 }
 0xe0b   : > { %5396 = vmatpush1.bf16.msra.mxu1 %v7300_v18 }
 0xe0c   : > { %5397 = vmatprep.subr.bf16.mxu1 %v7305_v30 }
 0xe0f   : > { %5398 = vmatpush1.bf16.msra.mxu1 %v7303_v31 }
 0xe10   : > { %5399 = vmatprep.subr.bf16.mxu1 %v7308_v32 }
 0xe13   : > { %5400 = vmatpush1.bf16.msra.mxu1 %v7306_v33 }
 0xe14   : > { %5401 = vmatprep.subr.bf16.mxu1 %v7311_v35 }
 0xe17   : > { %5402 = vmatpush1.bf16.msra.mxu1 %v7309_v39 }
 0xe18   : > { %5403 = vmatprep.subr.bf16.mxu1 %v7314_v40 }
 0xe1b   : > { %5404 = vmatpush1.bf16.msra.mxu1 %v7312_v41 }
 0xe1c   : > { %5405 = vmatprep.subr.bf16.mxu1 %v7317_v44 }
 0xe1f   : > { %5406 = vmatpush1.bf16.msra.mxu1 %v7315_v45 }
 0xe20   : > { %5407 = vmatprep.subr.bf16.mxu1 %v7320_v46 }
 0xe23   : > { %5408 = vmatpush1.bf16.msra.mxu1 %v7318_v58 }
 0xe24   : > { %5409 = vmatprep.subr.bf16.mxu1 %v7323_v48 }
 0xe27   : > { %5410 = vmatpush1.bf16.msra.mxu1 %v7321_v49 }
 0xe28   : > { %5411 = vmatprep.subr.bf16.mxu1 %v7326_v51 }
 0xe2b   : > { %5412 = vmatpush1.bf16.msra.mxu1 %v7324_v52 }
 0xe2c   : > { %5424 = vmatprep.subr.bf16.mxu1 %v7329_v7 }
 0xe81   : > { %v4343_v59 = vpop.f32.mrb[12].mxu1  ;;  %v4386_v63 = vpop.f32.mrb[28].mxu0 }
 0xe82   : > { %v8716_v0 = vadd.f32 %v4343_v59, %v3632_v53  ;;  %v8718_v1 = vadd.f32 %v4386_v63, %v3640_v54  ;;  %v4345_v12 = vpop.f32.mrb[13].mxu1  ;;  %v4388_v2 = vpop.f32.mrb[29].mxu0 }
 0xe83   : > { %v8720_v3 = vadd.f32 %v4345_v12, %v3636_v55  ;;  %v8722_v4 = vadd.f32 %v4388_v2, %v3644_v56  ;;  %v4347_v42 = vpop.f32.mrb[14].mxu1  ;;  %v4390_v5 = vpop.f32.mrb[30].mxu0 }
 0xe84   : > { %v4481_v6 = vmul.f32 -1.702, %v8716_v0  ;;  %v4483_v10 = vmul.f32 -1.702, %v8718_v1  ;;  %v4348_v13 = vadd.f32 %v4347_v42, %v3632_v53  ;;  %v4391_v8 = vadd.f32 %v4390_v5, %v3640_v54  ;;  %v4349_v15 = vpop.f32.mrb[15].mxu1  ;;  %v4392_v17 = vpop.f32.mrb[31].mxu0 }
 0xe85   : > { %v4482_v19 = vmul.f32 -1.702, %v8720_v3  ;;  %v4484_v22 = vmul.f32 -1.702, %v8722_v4  ;;  %v4350_v23 = vadd.f32 %v4349_v15, %v3636_v55  ;;  %v4393_v24 = vadd.f32 %v4392_v17, %v3644_v56 }
 0xe86   : > { %v4497_v25 = vmul.f32 1.442695, %v4481_v6  ;;  %v4501_v57 = vmul.f32 1.442695, %v4483_v10  ;;  %v4489_v61 = vmul.f32 -1.702, %v4348_v13 }
 0xe87   : > { %v4499_v34 = vmul.f32 1.442695, %v4482_v19  ;;  %v4503_v14 = vmul.f32 1.442695, %v4484_v22  ;;  %v4491_v43 = vmul.f32 -1.702, %v4391_v8 }
 0xe88   : > { %7495 = vpow2.f32 %v4497_v25  ;;  %v4513_v11 = vmul.f32 1.442695, %v4489_v61  ;;  %v4490_v20 = vmul.f32 -1.702, %v4350_v23  ;;  %v4492_v26 = vmul.f32 -1.702, %v4393_v24 }
 0xe89   : > { %7497 = vpow2.f32 %v4501_v57  ;;  %v4517_v21 = vmul.f32 1.442695, %v4491_v43  ;;  %v7332_v22 = vld [vmem:[%s7864_s2 + $0x114] ss:$8 sps:$4 sm:$0xff]   ;;  %v7336_v25 = vld [vmem:[%s7864_s2 + $0x130] ss:$8 sps:$4 sm:$0xff]  }
 0xe8a   : > { %7499 = vpow2.f32 %v4499_v34  ;;  %v4515_v16 = vmul.f32 1.442695, %v4490_v20  ;;  %v4519_v29 = vmul.f32 1.442695, %v4492_v26  ;;  %v7341_v57 = vld [vmem:[%s7864_s2 + $0x144] ss:$8 sps:$4 sm:$0xff]   ;;  %v3648_v26 = vrot.slane %v8704_v9, %v2031_v62 }
 0xe8b   : > { %7501 = vpow2.f32 %v4503_v14  ;;  %v7339_v61 = vld [vmem:[%s7864_s2 + $0x140] ss:$8 sps:$4 sm:$0xff]   ;;  %v7344_v34 = vld [vmem:[%s7864_s2 + $0x154] ss:$8 sps:$4 sm:$0xff]   ;;  %v3655_v14 = vsub.s32 6, %v8221_v36  ;;  %v3659_v43 = vsub.s32 7, %v8221_v36 }
 0xe8c   : > { %7503 = vpow2.f32 %v4513_v11  ;;  %v7342_v11 = vld [vmem:[%s7864_s2 + $0x150] ss:$8 sps:$4 sm:$0xff]   ;;  %v7347_v20 = vld [vmem:[%s7864_s2 + $0x164] ss:$8 sps:$4 sm:$0xff]  }
 0xe8d   : > { %7505 = vpow2.f32 %v4517_v21  ;;  %v3656_v21 = vrot.slane %v8704_v9, %v3655_v14  ;;  %v7360_v14 = vld [vmem:[%s7864_s2 + $0x1b0] ss:$8 sps:$4 sm:$0xff]  }
 0xe8e   : > { %7507 = vpow2.f32 %v4515_v16  ;;  %v3652_v16 = vrot.slane %v8704_v9, %v2035_v50 }
 0xe8f   : > { %7509 = vpow2.f32 %v4519_v29  ;;  %v3660_v29 = vrot.slane %v8704_v9, %v3659_v43  ;;  %v7348_v9 = vld [vmem:[%s7864_s2 + $0x170] ss:$8 sps:$4 sm:$0xff]  }
 0xe92   : > { %v7496_v18 = vpop.eup %7495 }
 0xe93   : > { %v7498_v30 = vpop.eup %7497  ;;  %v4529_v31 = vadd.f32 1.0, %v7496_v18  ;;  %v7345_v18 = vld [vmem:[%s7864_s2 + $0x160] ss:$8 sps:$4 sm:$0xff]  }
 0xe94   : > { %v7500_v32 = vpop.eup %7499  ;;  %v4531_v33 = vadd.f32 1.0, %v7498_v30 }
 0xe95   : > { %v7502_v35 = vpop.eup %7501  ;;  %7511 = vrcp.f32 %v4529_v31  ;;  %v4530_v39 = vadd.f32 1.0, %v7500_v32  ;;  %v7350_v32 = vld [vmem:[%s7864_s2 + $0x174] ss:$8 sps:$4 sm:$0xff]  }
 0xe96   : > { %v7504_v40 = vpop.eup %7503  ;;  %7513 = vrcp.f32 %v4531_v33  ;;  %v4532_v41 = vadd.f32 1.0, %v7502_v35 }
 0xe97   : > { %v7506_v44 = vpop.eup %7505  ;;  %7515 = vrcp.f32 %v4530_v39  ;;  %v4537_v45 = vadd.f32 1.0, %v7504_v40 }
 0xe98   : > { %v7508_v46 = vpop.eup %7507  ;;  %7517 = vrcp.f32 %v4532_v41  ;;  %v4539_v58 = vadd.f32 1.0, %v7506_v44 }
 0xe99   : > { %v7510_v48 = vpop.eup %7509  ;;  %7519 = vrcp.f32 %v4537_v45  ;;  %v4538_v49 = vadd.f32 1.0, %v7508_v46 }
 0xe9a   : > { %7521 = vrcp.f32 %v4539_v58  ;;  %v4540_v51 = vadd.f32 1.0, %v7510_v48 }
 0xe9b   : > { %7523 = vrcp.f32 %v4538_v49 }
 0xe9c   : > { %7525 = vrcp.f32 %v4540_v51 }
 0xe9f   : > { %v7512_v52 = vpop.eup %7511 }
 0xea0   : > { %v7514_v7 = vpop.eup %7513  ;;  %v4577_v59 = vmul.f32 %v7512_v52, %v8716_v0 }
 0xea1   : > { %v7516_v53 = vpop.eup %7515  ;;  %v8730_v2 = vmul.f32 %v7514_v7, %v8718_v1  ;;  %v7327_v1 = vld [vmem:[%s7864_s2 + $0x100] ss:$8 sps:$4 sm:$0xff]  }
 0xea2   : > { %v7518_v54 = vpop.eup %7517  ;;  %v4578_v6 = vmul.f32 %v7516_v53, %v8720_v3  ;;  %v7330_v3 = vld [vmem:[%s7864_s2 + $0x110] ss:$8 sps:$4 sm:$0xff]  }
 0xea3   : > { %v7520_v55 = vpop.eup %7519  ;;  %v4580_v17 = vmul.f32 %v7518_v54, %v8722_v4  ;;  %v7335_v4 = vld [vmem:[%s7864_s2 + $0x124] ss:$8 sps:$4 sm:$0xff]  }
 0xea4   : > { %v7522_v56 = vpop.eup %7521  ;;  %v4585_v63 = vmul.f32 %v7520_v55, %v4348_v13  ;;  %v7353_v54 = vld [vmem:[%s7864_s2 + $0x184] ss:$8 sps:$4 sm:$0xff]  }
 0xea5   : > { %v7524_v12 = vpop.eup %7523  ;;  %v8732_v42 = vmul.f32 %v7522_v56, %v4391_v8 }
 0xea6   : > { %v7526_v5 = vpop.eup %7525  ;;  %v4593_v10 = vpack.c.bf16 %v4585_v63, %v4577_v59  ;;  %v4586_v15 = vmul.f32 %v7524_v12, %v4350_v23  ;;  %v7333_v23 = vld [vmem:[%s7864_s2 + $0x120] ss:$8 sps:$4 sm:$0xff]  }
 0xea7   : > { %v4595_v0 = vpack.c.bf16 %v8732_v42, %v8730_v2  ;;  %v4588_v13 = vmul.f32 %v7526_v5, %v4393_v24  ;;  %v7338_v24 = vld [vmem:[%s7864_s2 + $0x134] ss:$8 sps:$4 sm:$0xff]   ;;  %v7351_v63 = vld [vmem:[%s7864_s2 + $0x180] ss:$8 sps:$4 sm:$0xff]   ;;  %v7389_v2 = vld [vmem:[%s7864_s2 + $0x244] ss:$8 sps:$4 sm:$0xff]  }
 0xea8   : > { %v4594_v19 = vpack.c.bf16 %v4586_v15, %v4578_v6  ;;  %v7387_v42 = vld [vmem:[%s7864_s2 + $0x240] ss:$8 sps:$4 sm:$0xff]  }
 0xea9   : > { %v4596_v8 = vpack.c.bf16 %v4588_v13, %v4580_v17 }
 0xeaa   : > { %5413 = vmatprep.mubr.bf16.mxu1 %v4594_v19  ;;  %v7356_v19 = vld [vmem:[%s7864_s2 + $0x194] ss:$8 sps:$4 sm:$0xff]  }
 0xeab   : > { %5414 = vmatmul.mubr.bf16.vlgmr.msra.gmra.mrb[20].mxu1 %v4593_v10 }
 0xeac   : > { %5425 = vmatpush1.bf16.msra.mxu1 %v7327_v1  ;;  %5456 = vmatprep.mubr.bf16.mxu1 %v4596_v8 }
 0xead   : > { %5426 = vmatprep.subr.bf16.mxu1 %v7332_v22  ;;  %v7354_v22 = vld [vmem:[%s7864_s2 + $0x190] ss:$8 sps:$4 sm:$0xff]  }
 0xeb0   : > { %5427 = vmatpush1.bf16.msra.mxu1 %v7330_v3  ;;  %v7359_v3 = vld [vmem:[%s7864_s2 + $0x1a4] ss:$8 sps:$4 sm:$0xff]  }
 0xeb1   : > { %5428 = vmatprep.subr.bf16.mxu1 %v7335_v4  ;;  %v7357_v4 = vld [vmem:[%s7864_s2 + $0x1a0] ss:$8 sps:$4 sm:$0xff]  }
 0xeb4   : > { %5429 = vmatpush1.bf16.msra.mxu1 %v7333_v23  ;;  %v7362_v23 = vld [vmem:[%s7864_s2 + $0x1b4] ss:$8 sps:$4 sm:$0xff]  }
 0xeb5   : > { %5430 = vmatprep.subr.bf16.mxu1 %v7338_v24 }
 0xeb8   : > { %5431 = vmatpush1.bf16.msra.mxu1 %v7336_v25 }
 0xeb9   : > { %5432 = vmatprep.subr.bf16.mxu1 %v7341_v57 }
 0xebc   : > { %5433 = vmatpush1.bf16.msra.mxu1 %v7339_v61 }
 0xebd   : > { %5434 = vmatprep.subr.bf16.mxu1 %v7344_v34 }
 0xec0   : > { %5435 = vmatpush1.bf16.msra.mxu1 %v7342_v11 }
 0xec1   : > { %5436 = vmatprep.subr.bf16.mxu1 %v7347_v20  ;;  %v4429_v30 = vpop.f32.mrb[16].mxu1  ;;  %v4472_v31 = vpop.f32.mrb[32].mxu0  ;;  %v7365_v20 = vld [vmem:[%s7864_s2 + $0x1c4] ss:$8 sps:$4 sm:$0xff]  }
 0xec2   : > { %v8762_v33 = vadd.f32 %v4429_v30, %v3648_v26  ;;  %v8764_v35 = vadd.f32 %v4472_v31, %v3656_v21  ;;  %v4431_v62 = vpop.f32.mrb[17].mxu1  ;;  %v4474_v39 = vpop.f32.mrb[33].mxu0  ;;  %v7363_v31 = vld [vmem:[%s7864_s2 + $0x1c0] ss:$8 sps:$4 sm:$0xff]  }
 0xec3   : > { %v8766_v40 = vadd.f32 %v4431_v62, %v3652_v16  ;;  %v8768_v36 = vadd.f32 %v4474_v39, %v3660_v29  ;;  %v4433_v50 = vpop.f32.mrb[18].mxu1  ;;  %v4476_v41 = vpop.f32.mrb[34].mxu0  ;;  %v7368_v39 = vld [vmem:[%s7864_s2 + $0x1d4] ss:$8 sps:$4 sm:$0xff]  }
 0xec4   : > { %v4485_v44 = vmul.f32 -1.702, %v8762_v33  ;;  %v4487_v45 = vmul.f32 -1.702, %v8764_v35  ;;  %5437 = vmatpush1.bf16.msra.mxu1 %v7345_v18  ;;  %v8773_v46 = vadd.f32 %v4433_v50, %v3648_v26  ;;  %v8775_v58 = vadd.f32 %v4476_v41, %v3656_v21  ;;  %v4435_v48 = vpop.f32.mrb[19].mxu1  ;;  %v4478_v49 = vpop.f32.mrb[35].mxu0 }
 0xec5   : > { %v4486_v51 = vmul.f32 -1.702, %v8766_v40  ;;  %v4488_v52 = vmul.f32 -1.702, %v8768_v36  ;;  %v8779_v7 = vadd.f32 %v4435_v48, %v3652_v16  ;;  %v8781_v53 = vadd.f32 %v4478_v49, %v3660_v29  ;;  %5438 = vmatprep.subr.bf16.mxu1 %v7350_v32  ;;  %v7366_v41 = vld [vmem:[%s7864_s2 + $0x1d0] ss:$8 sps:$4 sm:$0xff]  }
 0xec6   : > { %v4505_v55 = vmul.f32 1.442695, %v4485_v44  ;;  %v4509_v56 = vmul.f32 1.442695, %v4487_v45  ;;  %v4493_v59 = vmul.f32 -1.702, %v8773_v46 }
 0xec7   : > { %v4507_v12 = vmul.f32 1.442695, %v4486_v51  ;;  %v4511_v5 = vmul.f32 1.442695, %v4488_v52  ;;  %v4495_v6 = vmul.f32 -1.702, %v8775_v58 }
 0xec8   : > { %7527 = vpow2.f32 %v4505_v55  ;;  %v4521_v10 = vmul.f32 1.442695, %v4493_v59  ;;  %v4494_v15 = vmul.f32 -1.702, %v8779_v7  ;;  %v4496_v17 = vmul.f32 -1.702, %v8781_v53  ;;  %5439 = vmatpush1.bf16.msra.mxu1 %v7348_v9 }
 0xec9   : > { %7529 = vpow2.f32 %v4509_v56  ;;  %v4525_v13 = vmul.f32 1.442695, %v4495_v6  ;;  %5440 = vmatprep.subr.bf16.mxu1 %v7353_v54  ;;  %v7371_v9 = vld [vmem:[%s7864_s2 + $0x1e4] ss:$8 sps:$4 sm:$0xff]   ;;  %v7369_v48 = vld [vmem:[%s7864_s2 + $0x1e0] ss:$8 sps:$4 sm:$0xff]  }
 0xeca   : > { %7531 = vpow2.f32 %v4507_v12  ;;  %v4523_v1 = vmul.f32 1.442695, %v4494_v15  ;;  %v4527_v8 = vmul.f32 1.442695, %v4496_v17  ;;  %v7374_v51 = vld [vmem:[%s7864_s2 + $0x1f4] ss:$8 sps:$4 sm:$0xff]  }
 0xecb   : > { %7533 = vpow2.f32 %v4511_v5 }
 0xecc   : > { %7535 = vpow2.f32 %v4521_v10  ;;  %5441 = vmatpush1.bf16.msra.mxu1 %v7351_v63  ;;  %v7372_v63 = vld [vmem:[%s7864_s2 + $0x1f0] ss:$8 sps:$4 sm:$0xff]   ;;  %v7377_v10 = vld [vmem:[%s7864_s2 + $0x204] ss:$8 sps:$4 sm:$0xff]  }
 0xecd   : > { %7537 = vpow2.f32 %v4525_v13  ;;  %5442 = vmatprep.subr.bf16.mxu1 %v7356_v19  ;;  %v7375_v19 = vld [vmem:[%s7864_s2 + $0x200] ss:$8 sps:$4 sm:$0xff]  }
 0xece   : > { %7539 = vpow2.f32 %v4523_v1  ;;  %v7380_v1 = vld [vmem:[%s7864_s2 + $0x214] ss:$8 sps:$4 sm:$0xff]  }
 0xecf   : > { %7541 = vpow2.f32 %v4527_v8  ;;  %v7381_v8 = vld [vmem:[%s7864_s2 + $0x220] ss:$8 sps:$4 sm:$0xff]  }
 0xed0   : > { %5443 = vmatpush1.bf16.msra.mxu1 %v7354_v22  ;;  %v7386_v22 = vld [vmem:[%s7864_s2 + $0x234] ss:$8 sps:$4 sm:$0xff]  }
 0xed1   : > { %5444 = vmatprep.subr.bf16.mxu1 %v7359_v3  ;;  %v7384_v3 = vld [vmem:[%s7864_s2 + $0x230] ss:$8 sps:$4 sm:$0xff]  }
 0xed2   : > { %v7528_v24 = vpop.eup %7527 }
 0xed3   : > { %v7530_v25 = vpop.eup %7529  ;;  %v4533_v57 = vadd.f32 1.0, %v7528_v24  ;;  %v7393_v24 = vld [vmem:[%s7864_s2 + $0x260] ss:$8 sps:$4 sm:$0xff]  }
 0xed4   : > { %v7532_v61 = vpop.eup %7531  ;;  %v4535_v34 = vadd.f32 1.0, %v7530_v25  ;;  %5445 = vmatpush1.bf16.msra.mxu1 %v7357_v4  ;;  %v7390_v4 = vld [vmem:[%s7864_s2 + $0x250] ss:$8 sps:$4 sm:$0xff]   ;;  %v7398_v25 = vld [vmem:[%s7864_s2 + $0x274] ss:$8 sps:$4 sm:$0xff]  }
 0xed5   : > { %v7534_v43 = vpop.eup %7533  ;;  %7543 = vrcp.f32 %v4533_v57  ;;  %v4534_v11 = vadd.f32 1.0, %v7532_v61  ;;  %5446 = vmatprep.subr.bf16.mxu1 %v7362_v23  ;;  %v7395_v23 = vld [vmem:[%s7864_s2 + $0x264] ss:$8 sps:$4 sm:$0xff]   ;;  %v7396_v57 = vld [vmem:[%s7864_s2 + $0x270] ss:$8 sps:$4 sm:$0xff]  }
 0xed6   : > { %v7536_v26 = vpop.eup %7535  ;;  %7545 = vrcp.f32 %v4535_v34  ;;  %v4536_v21 = vadd.f32 1.0, %v7534_v43  ;;  %v7401_v61 = vld [vmem:[%s7864_s2 + $0x284] ss:$8 sps:$4 sm:$0xff]   ;;  %v7399_v34 = vld [vmem:[%s7864_s2 + $0x280] ss:$8 sps:$4 sm:$0xff]  }
 0xed7   : > { %v7538_v16 = vpop.eup %7537  ;;  %7547 = vrcp.f32 %v4534_v11  ;;  %v4541_v29 = vadd.f32 1.0, %v7536_v26  ;;  %v7402_v43 = vld [vmem:[%s7864_s2 + $0x290] ss:$8 sps:$4 sm:$0xff]   ;;  %v7407_v11 = vld [vmem:[%s7864_s2 + $0x2a4] ss:$8 sps:$4 sm:$0xff]  }
 0xed8   : > { %v7540_v18 = vpop.eup %7539  ;;  %7549 = vrcp.f32 %v4536_v21  ;;  %v4543_v30 = vadd.f32 1.0, %v7538_v16  ;;  %5447 = vmatpush1.bf16.msra.mxu1 %v7360_v14  ;;  %v7404_v14 = vld [vmem:[%s7864_s2 + $0x294] ss:$8 sps:$4 sm:$0xff]   ;;  %v7408_v21 = vld [vmem:[%s7864_s2 + $0x2b0] ss:$8 sps:$4 sm:$0xff]  }
 0xed9   : > { %v7542_v32 = vpop.eup %7541  ;;  %7551 = vrcp.f32 %v4541_v29  ;;  %v4542_v62 = vadd.f32 1.0, %v7540_v18  ;;  %5448 = vmatprep.subr.bf16.mxu1 %v7365_v20  ;;  %v7405_v20 = vld [vmem:[%s7864_s2 + $0x2a0] ss:$8 sps:$4 sm:$0xff]   ;;  %v7410_v26 = vld [vmem:[%s7864_s2 + $0x2b4] ss:$8 sps:$4 sm:$0xff]  }
 0xeda   : > { %7553 = vrcp.f32 %v4543_v30  ;;  %v4544_v50 = vadd.f32 1.0, %v7542_v32  ;;  %v7413_v16 = vld [vmem:[%s7864_s2 + $0x2c4] ss:$8 sps:$4 sm:$0xff]   ;;  %v7411_v29 = vld [vmem:[%s7864_s2 + $0x2c0] ss:$8 sps:$4 sm:$0xff]  }
 0xedb   : > { %7555 = vrcp.f32 %v4542_v62  ;;  %v7416_v18 = vld [vmem:[%s7864_s2 + $0x2d4] ss:$8 sps:$4 sm:$0xff]   ;;  %v7414_v30 = vld [vmem:[%s7864_s2 + $0x2d0] ss:$8 sps:$4 sm:$0xff]   ;;  %v7417_v32 = vld [vmem:[%s7864_s2 + $0x2e0] ss:$8 sps:$4 sm:$0xff]  }
 0xedc   : > { %7557 = vrcp.f32 %v4544_v50  ;;  %5449 = vmatpush1.bf16.msra.mxu1 %v7363_v31  ;;  %v7419_v31 = vld [vmem:[%s7864_s2 + $0x2e4] ss:$8 sps:$4 sm:$0xff]   ;;  %v7422_v62 = vld [vmem:[%s7864_s2 + $0x2f4] ss:$8 sps:$4 sm:$0xff]  }
 0xedd   : > { %5450 = vmatprep.subr.bf16.mxu1 %v7368_v39  ;;  %v7420_v39 = vld [vmem:[%s7864_s2 + $0x2f0] ss:$8 sps:$4 sm:$0xff]   ;;  %v7425_v50 = vld [vmem:[%s7864_s2 + $0x304] ss:$8 sps:$4 sm:$0xff]  }
 0xedf   : > { %v7544_v44 = vpop.eup %7543 }
 0xee0   : > { %v7546_v45 = vpop.eup %7545  ;;  %5451 = vmatpush1.bf16.msra.mxu1 %v7366_v41  ;;  %v8803_v56 = vmul.f32 %v7544_v44, %v8762_v33  ;;  %v7423_v41 = vld [vmem:[%s7864_s2 + $0x300] ss:$8 sps:$4 sm:$0xff]   ;;  %v7426_v44 = vld [vmem:[%s7864_s2 + $0x310] ss:$8 sps:$4 sm:$0xff]  }
 0xee1   : > { %v7548_v49 = vpop.eup %7547  ;;  %5452 = vmatprep.subr.bf16.mxu1 %v7371_v9  ;;  %v8810_v5 = vmul.f32 %v7546_v45, %v8764_v35  ;;  %v7428_v9 = vld [vmem:[%s7864_s2 + $0x314] ss:$8 sps:$4 sm:$0xff]   ;;  %v7431_v45 = vld [vmem:[%s7864_s2 + $0x324] ss:$8 sps:$4 sm:$0xff]  }
 0xee2   : > { %v7550_v52 = vpop.eup %7549  ;;  %v4582_v33 = vmul.f32 %v7548_v49, %v8766_v40  ;;  %v7434_v49 = vld [vmem:[%s7864_s2 + $0x334] ss:$8 sps:$4 sm:$0xff]  }
 0xee3   : > { %v7552_v54 = vpop.eup %7551  ;;  %v8821_v13 = vmul.f32 %v7550_v52, %v8768_v36  ;;  %v7378_v36 = vld [vmem:[%s7864_s2 + $0x210] ss:$8 sps:$4 sm:$0xff]   ;;  %v7437_v52 = vld [vmem:[%s7864_s2 + $0x344] ss:$8 sps:$4 sm:$0xff]  }
 0xee4   : > { %v7554_v55 = vpop.eup %7553  ;;  %v8806_v59 = vmul.f32 %v7552_v54, %v8773_v46  ;;  %5453 = vmatpush1.bf16.msra.mxu1 %v7369_v48  ;;  %v7429_v48 = vld [vmem:[%s7864_s2 + $0x320] ss:$8 sps:$4 sm:$0xff]  }
 0xee5   : > { %v7556_v12 = vpop.eup %7555  ;;  %v8813_v6 = vmul.f32 %v7554_v55, %v8775_v58  ;;  %5454 = vmatprep.subr.bf16.mxu1 %v7374_v51  ;;  %v7432_v51 = vld [vmem:[%s7864_s2 + $0x330] ss:$8 sps:$4 sm:$0xff]   ;;  %v7435_v54 = vld [vmem:[%s7864_s2 + $0x340] ss:$8 sps:$4 sm:$0xff]   ;;  %v7440_v55 = vld [vmem:[%s7864_s2 + $0x354] ss:$8 sps:$4 sm:$0xff]  }
 0xee6   : > { %v7558_v15 = vpop.eup %7557  ;;  %v4597_v46 = vpack.c.bf16 %v8806_v59, %v8803_v56  ;;  %v4590_v17 = vmul.f32 %v7556_v12, %v8779_v7  ;;  %v7438_v56 = vld [vmem:[%s7864_s2 + $0x350] ss:$8 sps:$4 sm:$0xff]   ;;  %v7443_v59 = vld [vmem:[%s7864_s2 + $0x364] ss:$8 sps:$4 sm:$0xff]   ;;  %v7446_v12 = vld [vmem:[%s7864_s2 + $0x374] ss:$8 sps:$4 sm:$0xff]  }
 0xee7   : > { %v4599_v35 = vpack.c.bf16 %v8813_v6, %v8810_v5  ;;  %v8826_v58 = vmul.f32 %v7558_v15, %v8781_v53  ;;  %v7383_v53 = vld [vmem:[%s7864_s2 + $0x224] ss:$8 sps:$4 sm:$0xff]  }
 0xee8   : > { %5455 = vmatpush1.bf16.msra.mxu1 %v7372_v63  ;;  %v4598_v40 = vpack.c.bf16 %v4590_v17, %v4582_v33  ;;  %v7441_v63 = vld [vmem:[%s7864_s2 + $0x360] ss:$8 sps:$4 sm:$0xff]   ;;  %v7449_v15 = vld [vmem:[%s7864_s2 + $0x384] ss:$8 sps:$4 sm:$0xff]   ;;  %v7450_v17 = vld [vmem:[%s7864_s2 + $0x390] ss:$8 sps:$4 sm:$0xff]  }
 0xee9   : > { %5467 = vmatprep.subr.bf16.mxu1 %v7377_v10  ;;  %v4600_v7 = vpack.c.bf16 %v8826_v58, %v8821_v13  ;;  %v7444_v10 = vld [vmem:[%s7864_s2 + $0x370] ss:$8 sps:$4 sm:$0xff]   ;;  %v7447_v33 = vld [vmem:[%s7864_s2 + $0x380] ss:$8 sps:$4 sm:$0xff]   ;;  %v7455_v13 = vld [vmem:[%s7864_s2 + $0x3a4] ss:$8 sps:$4 sm:$0xff]  }
 0xeea   : > { %v7453_v58 = vld [vmem:[%s7864_s2 + $0x3a0] ss:$8 sps:$4 sm:$0xff]  }
 0xeeb   : > { %5457 = vmatmul.mubr.bf16.vlgmr.msra.gmra.mrb[20].mxu1 %v4595_v0  ;;  %v7392_v0 = vld [vmem:[%s7864_s2 + $0x254] ss:$8 sps:$4 sm:$0xff]  }
 0xeec   : > { %5468 = vmatpush1.bf16.msra.mxu1 %v7375_v19  ;;  %5499 = vmatprep.mubr.bf16.mxu1 %v4598_v40  ;;  %v7458_v19 = vld [vmem:[%s7864_s2 + $0x3b4] ss:$8 sps:$4 sm:$0xff]   ;;  %v7456_v40 = vld [vmem:[%s7864_s2 + $0x3b0] ss:$8 sps:$4 sm:$0xff]  }
 0xeed   : > { %5469 = vmatprep.subr.bf16.mxu1 %v7380_v1  ;;  %v7461_v1 = vld [vmem:[%s7864_s2 + $0x3c4] ss:$8 sps:$4 sm:$0xff]  }
 0xef0   : > { %5470 = vmatpush1.bf16.msra.mxu1 %v7378_v36  ;;  %v7464_v36 = vld [vmem:[%s7864_s2 + $0x3d4] ss:$8 sps:$4 sm:$0xff]  }
 0xef1   : > { %5471 = vmatprep.subr.bf16.mxu1 %v7383_v53  ;;  %v7462_v53 = vld [vmem:[%s7864_s2 + $0x3d0] ss:$8 sps:$4 sm:$0xff]  }
 0xef4   : > { %5472 = vmatpush1.bf16.msra.mxu1 %v7381_v8  ;;  %v7467_v8 = vld [vmem:[%s7864_s2 + $0x3e4] ss:$8 sps:$4 sm:$0xff]  }
 0xef5   : > { %5473 = vmatprep.subr.bf16.mxu1 %v7386_v22  ;;  %v7465_v22 = vld [vmem:[%s7864_s2 + $0x3e0] ss:$8 sps:$4 sm:$0xff]  }
 0xef8   : > { %5474 = vmatpush1.bf16.msra.mxu1 %v7384_v3  ;;  %v7470_v3 = vld [vmem:[%s7864_s2 + $0x3f4] ss:$8 sps:$4 sm:$0xff]  }
 0xef9   : > { %5475 = vmatprep.subr.bf16.mxu1 %v7389_v2  ;;  %v7468_v2 = vld [vmem:[%s7864_s2 + $0x3f0] ss:$8 sps:$4 sm:$0xff]  }
 0xefc   : > { %5476 = vmatpush1.bf16.msra.mxu1 %v7387_v42  ;;  %v4729_v42 = vld [vmem:[%s1016_s18] sm:$0x3] }
 0xefd   : > { %5477 = vmatprep.subr.bf16.mxu1 %v7392_v0  ;;  %v4734_v0 = vrot.slane %v4729_v42, %v8227_v38 }
 0xf00   : > { %5478 = vmatpush1.bf16.msra.mxu1 %v7390_v4  ;;  %v4738_v4 = vrot.slane %v4729_v42, %v8224_v37 }
 0xf01   : > { %5479 = vmatprep.subr.bf16.mxu1 %v7395_v23 }
 0xf04   : > { %5480 = vmatpush1.bf16.msra.mxu1 %v7393_v24 }
 0xf05   : > { %5481 = vmatprep.subr.bf16.mxu1 %v7398_v25 }
 0xf08   : > { %5482 = vmatpush1.bf16.msra.mxu1 %v7396_v57 }
 0xf09   : > { %5483 = vmatprep.subr.bf16.mxu1 %v7401_v61 }
 0xf0c   : > { %5484 = vmatpush1.bf16.msra.mxu1 %v7399_v34 }
 0xf0d   : > { %5485 = vmatprep.subr.bf16.mxu1 %v7404_v14 }
 0xf10   : > { %5486 = vmatpush1.bf16.msra.mxu1 %v7402_v43 }
 0xf11   : > { %5487 = vmatprep.subr.bf16.mxu1 %v7407_v11 }
 0xf14   : > { %5488 = vmatpush1.bf16.msra.mxu1 %v7405_v20 }
 0xf15   : > { %5489 = vmatprep.subr.bf16.mxu1 %v7410_v26 }
 0xf18   : > { %5490 = vmatpush1.bf16.msra.mxu1 %v7408_v21 }
 0xf19   : > { %5491 = vmatprep.subr.bf16.mxu1 %v7413_v16 }
 0xf1c   : > { %5492 = vmatpush1.bf16.msra.mxu1 %v7411_v29 }
 0xf1d   : > { %5493 = vmatprep.subr.bf16.mxu1 %v7416_v18 }
 0xf20   : > { %5494 = vmatpush1.bf16.msra.mxu1 %v7414_v30 }
 0xf21   : > { %5495 = vmatprep.subr.bf16.mxu1 %v7419_v31 }
 0xf24   : > { %5496 = vmatpush1.bf16.msra.mxu1 %v7417_v32  ;;  %v7567_v32 = vld [vmem:[%s9111_s8 + $0x50] sm:$0xff] (!%p6683_p8)  }
 0xf25   : > { %5497 = vmatprep.subr.bf16.mxu1 %v7422_v62  ;;  %v7568_v62 = vld [vmem:[%s9111_s8 + $0x10] sm:$0xff] (!%p6683_p8)  }
 0xf28   : > { %5498 = vmatpush1.bf16.msra.mxu1 %v7420_v39  ;;  %v7569_v39 = vld [vmem:[%s9111_s8 + $0x58] sm:$0xff] (!%p6683_p8)  }
 0xf29   : > { %5510 = vmatprep.subr.bf16.mxu1 %v7425_v50  ;;  %v7570_v50 = vld [vmem:[%s9111_s8 + $0x18] sm:$0xff] (!%p6683_p8)  }
 0xf2b   : > { %5500 = vmatmul.mubr.bf16.vlgmr.msra.gmra.mrb[20].mxu1 %v4597_v46  ;;  %v7452_v46 = vld [vmem:[%s7864_s2 + $0x394] ss:$8 sps:$4 sm:$0xff]  }
 0xf2c   : > { %5511 = vmatpush1.bf16.msra.mxu1 %v7423_v41  ;;  %5542 = vmatprep.mubr.bf16.mxu1 %v4600_v7  ;;  %v7459_v7 = vld [vmem:[%s7864_s2 + $0x3c0] ss:$8 sps:$4 sm:$0xff]  }
 0xf2d   : > { %5512 = vmatprep.subr.bf16.mxu1 %v7428_v9  ;;  %v7571_v41 = vld [vmem:[%s9111_s8 + $0x60] sm:$0xff] (!%p6683_p8)  }
 0xf2e   : > { %v7572_v9 = vld [vmem:[%s9111_s8 + $0x20] sm:$0xff] (!%p6683_p8)  }
 0xf30   : > { %5513 = vmatpush1.bf16.msra.mxu1 %v7426_v44  ;;  %v7573_v44 = vld [vmem:[%s9111_s8 + $0x68] sm:$0xff] (!%p6683_p8)  }
 0xf31   : > { %5514 = vmatprep.subr.bf16.mxu1 %v7431_v45  ;;  %v7574_v45 = vld [vmem:[%s9111_s8 + $0x28] sm:$0xff] (!%p6683_p8)  }
 0xf34   : > { %5515 = vmatpush1.bf16.msra.mxu1 %v7429_v48  ;;  %v7575_v48 = vld [vmem:[%s9111_s8 + $0x70] sm:$0xff] (!%p6683_p8)  }
 0xf35   : > { %5516 = vmatprep.subr.bf16.mxu1 %v7434_v49  ;;  %v7576_v49 = vld [vmem:[%s9111_s8 + $0x30] sm:$0xff] (!%p6683_p8)  }
 0xf38   : > { %5517 = vmatpush1.bf16.msra.mxu1 %v7432_v51  ;;  %v7577_v51 = vld [vmem:[%s9111_s8 + $0x78] sm:$0xff] (!%p6683_p8)  }
 0xf39   : > { %5518 = vmatprep.subr.bf16.mxu1 %v7437_v52  ;;  %v7578_v52 = vld [vmem:[%s9111_s8 + $0x38] sm:$0xff] (!%p6683_p8)  }
 0xf3c   : > { %5519 = vmatpush1.bf16.msra.mxu1 %v7435_v54 }
 0xf3d   : > { %5520 = vmatprep.subr.bf16.mxu1 %v7440_v55 }
 0xf40   : > { %5521 = vmatpush1.bf16.msra.mxu1 %v7438_v56 }
 0xf41   : > { %5522 = vmatprep.subr.bf16.mxu1 %v7443_v59  ;;  %v5565_v59 = vld [vmem:[%s9112_s26] sm:$0x3] (!%p6683_p8) }
 0xf44   : > { %5523 = vmatpush1.bf16.msra.mxu1 %v7441_v63  ;;  %v5566_v63 = vld [vmem:[%s9113_s11] sm:$0x3] (!%p6683_p8) }
 0xf45   : > { %5524 = vmatprep.subr.bf16.mxu1 %v7446_v12  ;;  %v5587_v12 = vrot.slane (!%p6683_p8), %v5565_v59, %v8227_v38 }
 0xf48   : > { %5525 = vmatpush1.bf16.msra.mxu1 %v7444_v10  ;;  %v5591_v10 = vrot.slane (!%p6683_p8), %v5565_v59, %v8224_v37 }
 0xf49   : > { %5526 = vmatprep.subr.bf16.mxu1 %v7449_v15 }
 0xf4c   : > { %5527 = vmatpush1.bf16.msra.mxu1 %v7447_v33 }
 0xf4d   : > { %5528 = vmatprep.subr.bf16.mxu1 %v7452_v46  ;;  %v5600_v46 = vrot.slane (!%p6683_p8), %v5566_v63, %v8227_v38  ;;  %v7581_v38 = vld [vmem:[%s9114_s22 + $0x10] sm:$0xff] (!%p6683_p8)  }
 0xf50   : > { %5529 = vmatpush1.bf16.msra.mxu1 %v7450_v17  ;;  %v5604_v17 = vrot.slane (!%p6683_p8), %v5566_v63, %v8224_v37  ;;  %v7580_v37 = vld [vmem:[%s9114_s22 + $0x8] sm:$0xff] (!%p6683_p8)  }
 0xf51   : > { %5530 = vmatprep.subr.bf16.mxu1 %v7455_v13 }
 0xf54   : > { %5531 = vmatpush1.bf16.msra.mxu1 %v7453_v58 }
 0xf55   : > { %5532 = vmatprep.subr.bf16.mxu1 %v7458_v19 }
 0xf58   : > { %5533 = vmatpush1.bf16.msra.mxu1 %v7456_v40 }
 0xf59   : > { %5534 = vmatprep.subr.bf16.mxu1 %v7461_v1 }
 0xf5c   : > { %5535 = vmatpush1.bf16.msra.mxu1 %v7459_v7 }
 0xf5d   : > { %5536 = vmatprep.subr.bf16.mxu1 %v7464_v36 }
 0xf60   : > { %5537 = vmatpush1.bf16.msra.mxu1 %v7462_v53  ;;  %v7579_v53 = vld [vmem:[%s9114_s22] sm:$0xff] (!%p6683_p8)  }
 0xf61   : > { %5538 = vmatprep.subr.bf16.mxu1 %v7467_v8  ;;  %v7634_v8 = vmov (!%p6683_p8), 0.0  }
 0xf64   : > { %5539 = vmatpush1.bf16.msra.mxu1 %v7465_v22  ;;  %v7582_v22 = vld [vmem:[%s9114_s22 + $0x18] sm:$0xff] (!%p6683_p8)  }
 0xf65   : > { %5540 = vmatprep.subr.bf16.mxu1 %v7470_v3 }
 0xf68   : > { %5541 = vmatpush1.bf16.msra.mxu1 %v7468_v2 }
 0xf69   : > { %6778 = vmatprep.subr.bf16.mxu1 (!%p6683_p8), %v7634_v8 }
 0xf6b   : > { %5543 = vmatmul.mubr.bf16.vlgmr.msra.gmra.mrb[20].mxu1 %v4599_v35 }
 0xf6c   : > { %6779 = vmatpush3.bf16.msra.mxu1 (!%p6683_p8), %v7579_v53  ;;  %6794 = vmatprep.mubr.msk.bf16.mxu1 (!%p6683_p8), %vm7635_vm3, %v7634_v8 }
 0xf6d   : > { %6780 = vmatprep.subr.bf16.mxu1 (!%p6683_p8), %v7634_v8 }
 0xf70   : > { %6781 = vmatpush3.bf16.msra.mxu1 (!%p6683_p8), %v7580_v37 }
 0xf71   : > { %6782 = vmatprep.subr.bf16.mxu1 (!%p6683_p8), %v7634_v8 }
 0xf74   : > { %6783 = vmatpush3.bf16.msra.mxu1 (!%p6683_p8), %v7581_v38 }
 0xf75   : > { %6784 = vmatprep.subr.bf16.mxu1 (!%p6683_p8), %v7634_v8 }
 0xf78   : > { %6785 = vmatpush3.bf16.msra.mxu1 (!%p6683_p8), %v7582_v22 }
 0xf79   : > { %6786 = vmatprep.subr.bf16.mxu1 (!%p6683_p8), %v7634_v8 }
0x103e   : > { %v5544_v23 = vpop.f32.mrb[20].mxu1 }
0x103f   : > { %v6818_v24 = vadd.f32 %v5544_v23, %v4734_v0  ;;  %v5546_v25 = vpop.f32.mrb[21].mxu1 }
0x1040   : > { %v6819_v57 = vadd.f32 %v5546_v25, %v4738_v4  ;;  %v5548_v61 = vpop.f32.mrb[22].mxu1  ;;  %5564 = sbr.rel (%p6683_p8) target bundleno = 5073 (0x13d1), region = 124  ;;  %v7584_v25 = vld [vmem:[%s9114_s22 + $0x28] sm:$0xff] (!%p6683_p8)  }
0x1041   : > { %v5553_v34 = vadd.f32 %v6818_v24, %v8486_v60  ;;  %v6820_v14 = vadd.f32 %v5548_v61, %v4734_v0  ;;  %v5550_v43 = vpop.f32.mrb[23].mxu1  ;;  %v7563_v60 = vld [vmem:[%s9110_s27 + $0x40] sm:$0xff] (!%p6683_p8)   ;;  %v7586_v61 = vld [vmem:[%s9114_s22 + $0x38] sm:$0xff] (!%p6683_p8)  }
0x1042   : > { %v5554_v5 = vadd.f32 %v6819_v57, %v8488_v47  ;;  %v6821_v6 = vadd.f32 %v5550_v43, %v4738_v4  ;;  %v7564_v47 = vld [vmem:[%s9111_s8] sm:$0xff] (!%p6683_p8)   ;;  %6723 = vmatprep.subr.bf16.mxu0 (!%p6683_p8), %v7563_v60  ;;  %v7585_v57 = vld [vmem:[%s9114_s22 + $0x30] sm:$0xff] (!%p6683_p8)  }
0x1043   : > { %5557 = vst [vmem:[#allocation2] sm:$0xff] %v5553_v34  ;;  %v5555_v35 = vadd.f32 %v6820_v14, %v8490_v27  ;;  %v7565_v27 = vld [vmem:[%s9111_s8 + $0x48] sm:$0xff] (!%p6683_p8)   ;;  %6724 = vmatpush3.bf16.msra.mxu0 (!%p6683_p8), %v7564_v47  ;;  %v7583_v24 = vld [vmem:[%s9114_s22 + $0x20] sm:$0xff] (!%p6683_p8)  }
0x1044   : > { %5558 = vst [vmem:[#allocation2 + $0x8] sm:$0xff] %v5554_v5  ;;  %v5556_v11 = vadd.f32 %v6821_v6, %v8492_v28  ;;  %v5567_v20 = vadd.f32 (!%p6683_p8), %v5554_v5, %v5553_v34  ;;  %v7566_v28 = vld [vmem:[%s9111_s8 + $0x8] sm:$0xff] (!%p6683_p8)   ;;  %6725 = vmatprep.subr.bf16.mxu0 (!%p6683_p8), %v7565_v27  ;;  %6787 = vmatpush3.bf16.msra.mxu1 (!%p6683_p8), %v7583_v24 }
0x1045   : > { %5559 = vst [vmem:[#allocation2 + $0x10] sm:$0xff] %v5555_v35  ;;  %6788 = vmatprep.subr.bf16.mxu1 (!%p6683_p8), %v7634_v8 }
0x1046   : > { %5560 = vst [vmem:[#allocation2 + $0x18] sm:$0xff] %v5556_v11  ;;  %5568 = vadd.xlane.f32.xlu0 (!%p6683_p8), %v5567_v20 }
0x1047   : > { %6726 = vmatpush3.bf16.msra.mxu0 %v7566_v28 }
0x1048   : > { %6727 = vmatprep.subr.bf16.mxu0 %v7567_v32  ;;  %6789 = vmatpush3.bf16.msra.mxu1 %v7584_v25 }
0x1049   : > { %6790 = vmatprep.subr.bf16.mxu1 %v7634_v8 }
0x104b   : > { %6728 = vmatpush3.bf16.msra.mxu0 %v7568_v62 }
0x104c   : > { %6729 = vmatprep.subr.bf16.mxu0 %v7569_v39  ;;  %6791 = vmatpush3.bf16.msra.mxu1 %v7585_v57 }
0x104d   : > { %6792 = vmatprep.subr.bf16.mxu1 %v7634_v8 }
0x104f   : > { %6730 = vmatpush3.bf16.msra.mxu0 %v7570_v50 }
0x1050   : > { %6731 = vmatprep.subr.bf16.mxu0 %v7571_v41  ;;  %6793 = vmatpush3.bf16.msra.mxu1 %v7586_v61 }
0x1053   : > { %6732 = vmatpush3.bf16.msra.mxu0 %v7572_v9 }
0x1054   : > { %6733 = vmatprep.subr.bf16.mxu0 %v7573_v44 }
0x1057   : > { %6734 = vmatpush3.bf16.msra.mxu0 %v7574_v45 }
0x1058   : > { %6735 = vmatprep.subr.bf16.mxu0 %v7575_v48 }
0x105b   : > { %6736 = vmatpush3.bf16.msra.mxu0 %v7576_v49 }
0x105c   : > { %6737 = vmatprep.subr.bf16.mxu0 %v7577_v51 }
0x105f   : > { %6738 = vmatpush3.bf16.msra.mxu0 %v7578_v52 }
0x10d3   : > { %v5569_v26 = vpop.xlane.xlu0 %5568 }
0x10d4   : > { %v5570_v21 = vmul.f32 0.00390625, %v5569_v26 }
0x10d6   : > { %v5571_v16 = vsub.f32 %v5553_v34, %v5570_v21  ;;  %v5572_v29 = vsub.f32 %v5554_v5, %v5570_v21 }
0x10d8   : > { %v5573_v18 = vmul.f32 %v5571_v16, %v5571_v16  ;;  %v5574_v30 = vmul.f32 %v5572_v29, %v5572_v29 }
0x10da   : > { %v5575_v31 = vadd.f32 %v5574_v30, %v5573_v18 }
0x10dc   : > { %5576 = vadd.xlane.f32.xlu0 %v5575_v31 }
0x1169   : > { %v5577_v54 = vpop.xlane.xlu0 %5576 }
0x116a   : > { %v5578_v55 = vmul.f32 0.00390625, %v5577_v54 }
0x116c   : > { %v5579_v56 = vadd.f32 1e-05, %v5578_v55 }
0x116e   : > { %7587 = vrsqrt.f32 %v5579_v56 }
0x1178   : > { %v7588_v15 = vpop.eup %7587 }
0x1179   : > { %v5582_v33 = vmul.f32 %v7588_v15, %v5572_v29  ;;  %v5581_v13 = vmul.f32 %v7588_v15, %v5571_v16 }
0x117b   : > { %v5595_v58 = vmul.f32 %v5591_v10, %v5582_v33  ;;  %v5594_v19 = vmul.f32 %v5587_v12, %v5581_v13 }
0x117d   : > { %v5608_v40 = vadd.f32 %v5604_v17, %v5595_v58  ;;  %v5607_v1 = vadd.f32 %v5600_v46, %v5594_v19 }
0x117f   : > { %v5610_v7 = vpack.c.bf16 %v5608_v40, %v5608_v40  ;;  %v5609_v36 = vpack.c.bf16 %v5607_v1, %v5607_v1 }
0x1181   : > { %5771 = vmatprep.mubr.bf16.mxu0 %v5610_v7 }
0x1182   : > { %5772 = vmatmul.mubr.bf16.vlgmr.msra.gmra.mrb[0].mxu0 %v5609_v36 }
0x1255   : > { %v6739_v3 = vpop.f32.mrb[0].mxu0 }
0x1256   : > { %v6740_v2 = vpop.f32.mrb[1].mxu0 }
0x1257   : > { %v6741_v42 = vadd.f32 %v6740_v2, %v6739_v3  ;;  %v6742_v0 = vpop.f32.mrb[2].mxu0 }
0x1258   : > { %v6743_v4 = vpop.f32.mrb[3].mxu0 }
0x1259   : > { %v5779_v23 = vmul.f32 %v6741_v42, %v6741_v42 }
0x125b   : > { %5780 = vadd.xlane.f32.xlu1 %v5779_v23 }
0x12e8   : > { %v5781_v34 = vpop.xlane.xlu1 %5780 }
0x12e9   : > { %v5782_v14 = vadd.f32 1e-12, %v5781_v34 }
0x12eb   : > { %7589 = vrsqrt.f32 %v5782_v14 }
0x12f5   : > { %v7590_v43 = vpop.eup %7589 }
0x12f6   : > { %v5784_v5 = vmul.f32 %v7590_v43, %v6741_v42 }
0x12f8   : > { %v5785_v6 = vpack.c.bf16 %v5784_v5, %v5784_v5 }
0x12fa   : > { %6795 = vmatmul.mubr.bf16.vlgmr.msra.gmra.mrb[0].mxu1 %v5785_v6 }
0x13cd   : > { %v5884_v35 = vpop.f32.mrb[0].mxu1 }
0x13ce   : > { %v5890_v11 = vmul.f32 100.0, %v5884_v35  ;;  %v6796_v20 = vpop.f32.mrb[1].mxu1 }
0x13cf   : > { %v5887_v60 = vpop.f32.mrb[2].mxu1 }
0x13d0   : > { %5891 = vst [vmem:[%s7873_s29] sm:$0xff] %v5890_v11  ;;  %v6797_v47 = vpop.f32.mrb[3].mxu1 }
0x13d1 PF: > { %s9115_s4 = sld [smem:[#allocation7_spill]]  ;;  %s9116_s5 = sld [smem:[#allocation5_spill]] }
0x13d2   : > { %s9117_s26 = sld [smem:[#allocation6_spill]]  ;;  %s9118_s27 = sld [smem:[#allocation8_spill]] }
0x13d3   : > { %s9119_s28 = sld [smem:[#allocation9_spill]] }
0x13d7   : > { %s34_s6 = sadd.s32 1, %s9115_s4  }
0x13d8   : > { %p31_p9 = scmp.ge.s32.totalorder %s34_s6, 6  }
0x13da   :  { %33 = sbr.rel (!%p31_p9) target bundleno = 23 (0x17), region = 199 }

</bundles_post_ra>
